<compile_context>
chip_gen: v7x
topology: tpu7x:2x2x1
jax: 0.10.0
libtpu: 0.0.40
codegen_flags: <defaults>
</compile_context>

<pallas_src>
import math

import jax
import jax.numpy as jnp
import numpy as np
from jax.experimental import pallas as pl
from jax.experimental.pallas import tpu as pltpu

LN_EPS = 1e-5
_INV_SQRT2 = 1.0 / math.sqrt(2.0)
VMEM_LIMIT_BYTES = 48 * 1024 * 1024  # <= v7x 64 MiB physical; ample on v5e/v6e


# ---------------------------------------------------------------------------
# tiling helper
# ---------------------------------------------------------------------------
def _choose_seq_tile(L, HB, B, target):
    """Sequence tile TL.

    For TL < L we need: L % TL == 0, TL % 128 == 0 (lane-dense output block),
    TL % HB == 0 and TL >= HB (halo block arithmetic).  TL == L is always valid
    (all blocks equal full dims).  When B == 1 the sequence is split so the grid
    has >= 2 parallel steps (v7x megacore)."""

    def ok(tl):
        if L % tl != 0 or tl % 8 != 0:
            return False
        if tl != L and tl % 128 != 0:
            return False
        if HB and (tl % HB != 0 or tl < HB):
            return False
        return True

    cap = min(target, L)
    if B == 1 and L >= 256:
        cap = min(cap, L // 2)
    for tl in range(cap, 127, -1):
        if ok(tl):
            return tl
    return L  # single tile; halo rows are zero-filled in-kernel


# ---------------------------------------------------------------------------
# fused decoder kernel
# ---------------------------------------------------------------------------
def _make_decoder_kernel(*, L, TL, HB, hidden, blocks, rem, fetch_halo,
                         use_halo, cout, lane_dense):
    n = len(blocks)

    def kernel(*refs):
        idx = 0
        x_ref = refs[idx]; idx += 1
        if fetch_halo:
            xl_ref, xr_ref = refs[idx], refs[idx + 1]; idx += 2
        inw_ref, inb_ref = refs[idx], refs[idx + 1]; idx += 2
        bw = []
        for _ in range(n):
            bw.append(refs[idx:idx + 4]); idx += 4
        outw_ref, outb_ref = refs[idx], refs[idx + 1]; idx += 2
        o_ref = refs[idx]; idx += 1
        acts = refs[idx:idx + n]  # scratch: acts[i] = input buffer of block i

        t = pl.program_id(1)
        inw = inw_ref[...]
        inb = inb_ref[...]

        # ---- stage 0: 1x1 input projection over the halo-extended window ----
        xm = x_ref[0].astype(jnp.float32)                         # (TL, Cin)
        acts[0][HB:HB + TL, :] = (
            jnp.dot(xm, inw, preferred_element_type=jnp.float32) + inb)
        if HB > 0:
            if fetch_halo:
                xl = xl_ref[0].astype(jnp.float32)                # (HB, Cin)
                xr = xr_ref[0].astype(jnp.float32)
                al = jnp.dot(xl, inw, preferred_element_type=jnp.float32) + inb
                ar = jnp.dot(xr, inw, preferred_element_type=jnp.float32) + inb
                r = jax.lax.broadcasted_iota(jnp.int32, (HB, 1), 0)
                # zero rows that fall outside the true sequence [0, L)
                acts[0][0:HB, :] = jnp.where(r + (t * TL - HB) >= 0, al, 0.0)
                acts[0][HB + TL:HB + TL + HB, :] = jnp.where(
                    r + (t * TL + TL) < L, ar, 0.0)
            else:
                z = jnp.zeros((HB, hidden[0]), jnp.float32)
                acts[0][0:HB, :] = z
                acts[0][HB + TL:HB + TL + HB, :] = z

        # ---- conv blocks: dilated conv + skip + LayerNorm + GELU -------------
        h_val = None
        for i, blk in enumerate(blocks):
            K, dil, cout_i, same = blk["K"], blk["dil"], blk["cout"], blk["same"]
            c = (K - 1) // 2
            rem_out = rem[i + 1]
            out_len = TL + 2 * rem_out
            in_start = 0 if i == 0 else HB - rem[i]
            base = (HB - rem_out) - in_start
            src = acts[i]
            w_ref, b_ref, g_ref, beta_ref = bw[i]

            # K accumulating MXU matmuls straight out of the stage buffer.
            acc = None
            center = None
            for k in range(K):
                off = base + (k - c) * dil
                slab = src[off:off + out_len, :]
                if k == c:
                    center = slab
                part = jnp.dot(slab, w_ref[k], preferred_element_type=jnp.float32)
                acc = part if acc is None else acc + part
            acc = acc + b_ref[...]
            if same:
                acc = acc + center  # identity skip (channel_map folded otherwise)

            # LayerNorm over channels (one-pass statistics) + exact GELU.
            inv_c = 1.0 / cout_i
            mean = jnp.sum(acc, axis=-1, keepdims=True) * inv_c
            var = jnp.sum(acc * acc, axis=-1, keepdims=True) * inv_c - mean * mean
            y = (acc - mean) * jax.lax.rsqrt(var + LN_EPS) * g_ref[...] + beta_ref[...]
            y = 0.5 * y * (1.0 + jax.lax.erf(y * _INV_SQRT2))

            if use_halo and rem_out > 0:
                # rows outside [0, L) act as zero padding for the next conv
                rr = jax.lax.broadcasted_iota(jnp.int32, (out_len, 1), 0)
                g = rr + (t * TL - rem_out)
                y = jnp.where(jnp.logical_and(g >= 0, g < L), y, 0.0)

            if i + 1 < n:
                acts[i + 1][...] = y
            else:
                h_val = y                                          # (TL, hidden[-1])

        # ---- fused ReLU + output projection, lane-dense store ----------------
        hr = jnp.maximum(h_val, 0.0)
        yo = jnp.dot(hr, outw_ref[...], preferred_element_type=jnp.float32) + outb_ref[...]
        if lane_dense:
            # (TL, 128-padded cout) -> (cout, TL): sequence lands on the lane axis
            o_ref[0] = jnp.transpose(yo)[:cout, :].astype(o_ref.dtype)
        else:
            o_ref[0] = yo.astype(o_ref.dtype)

    return kernel


# ---------------------------------------------------------------------------
# wrapper: full decoder forward in one pallas_call
# ---------------------------------------------------------------------------
def conv1d_decoder_forward(x, params, kernel_sizes, dilations, seq_tile=2048):
    """x: [B, L, input_channels] -> [B, L, output_channels] (torch forward parity)."""
    B, L, Cin = x.shape
    blocks_p = params["blocks"]
    n = len(blocks_p)
    assert n >= 1
    hidden = [bp["conv_w"].shape[2] for bp in blocks_p]
    assert params["in_proj_w"].shape[1] == hidden[0]
    cout = params["out_proj_w"].shape[1]

    pads = []
    for bp, ks, d in zip(blocks_p, kernel_sizes, dilations):
        assert ks % 2 == 1, "even kernel_size changes the sequence length (unsupported)"
        assert bp["conv_w"].shape[0] == ks
        pads.append((ks - 1) // 2 * d)
    P = sum(pads)
    rem = [P]
    for p in pads:
        rem.append(rem[-1] - p)          # rem[i] = receptive-field halo left after block i-1
    use_halo = P > 0
    HB = 8 * ((P + 7) // 8) if use_halo else 0

    TL = _choose_seq_tile(L, HB, B, seq_tile)
    nt = L // TL
    fetch_halo = use_halo and nt > 1
    assert (not fetch_halo) or (TL % HB == 0 and L % TL == 0 and TL >= HB)
    Wfull = TL + 2 * HB

    # Fold channel_map 1x1 skips into the centre conv tap (wrapper-side, one-off).
    blocks_cfg, conv_ws, conv_bs = [], [], []
    for i, bp in enumerate(blocks_p):
        ks, d = kernel_sizes[i], dilations[i]
        c = (ks - 1) // 2
        w, b = bp["conv_w"], bp["conv_b"]
        same = "cm_w" not in bp
        if not same:
            w = w.at[c].add(bp["cm_w"])
            b = b + bp["cm_b"]
        conv_ws.append(w)
        conv_bs.append(b)
        blocks_cfg.append(dict(K=ks, dil=d, cout=w.shape[2], same=same))

    # Lane-dense output layout for small output_channels (module default: 1).
    lane_dense = cout < 128
    if lane_dense:
        cp = 128
        outw = jnp.zeros((hidden[-1], cp), jnp.float32).at[:, :cout].set(params["out_proj_w"])
        outb = jnp.zeros((1, cp), jnp.float32).at[:, :cout].set(params["out_proj_b"])
        out_shape = jax.ShapeDtypeStruct((B, cout, L), jnp.float32)
        out_spec = pl.BlockSpec((1, cout, TL), lambda b, t: (b, 0, t))
    else:
        cp = cout
        outw, outb = params["out_proj_w"], params["out_proj_b"]
        out_shape = jax.ShapeDtypeStruct((B, L, cout), jnp.float32)
        out_spec = pl.BlockSpec((1, TL, cout), lambda b, t: (b, t, 0))

    full2 = lambda b, t: (0, 0)
    full3 = lambda b, t: (0, 0, 0)

    in_specs = [pl.BlockSpec((1, TL, Cin), lambda b, t: (b, t, 0))]
    inputs = [x]
    if fetch_halo:
        R = TL // HB
        nH = L // HB
        in_specs += [
            pl.BlockSpec((1, HB, Cin), lambda b, t: (b, jnp.maximum(t * R - 1, 0), 0)),
            pl.BlockSpec((1, HB, Cin), lambda b, t: (b, jnp.minimum((t + 1) * R, nH - 1), 0)),
        ]
        inputs += [x, x]
    in_specs += [pl.BlockSpec((Cin, hidden[0]), full2), pl.BlockSpec((1, hidden[0]), full2)]
    inputs += [params["in_proj_w"], params["in_proj_b"]]
    for i, bp in enumerate(blocks_p):
        cfg = blocks_cfg[i]
        cin_i = conv_ws[i].shape[1]
        in_specs += [
            pl.BlockSpec((cfg["K"], cin_i, cfg["cout"]), full3),
            pl.BlockSpec((1, cfg["cout"]), full2),
            pl.BlockSpec((1, cfg["cout"]), full2),
            pl.BlockSpec((1, cfg["cout"]), full2),
        ]
        inputs += [conv_ws[i], conv_bs[i], bp["ln_g"], bp["ln_b"]]
    in_specs += [pl.BlockSpec((hidden[-1], cp), full2), pl.BlockSpec((1, cp), full2)]
    inputs += [outw, outb]

    # acts[i] = input buffer of block i (kept in VMEM for the whole fused pass)
    scratch_shapes = [pltpu.VMEM((Wfull, hidden[0]), jnp.float32)]
    for i in range(1, n):
        scratch_shapes.append(pltpu.VMEM((TL + 2 * rem[i], hidden[i - 1]), jnp.float32))

    kern = _make_decoder_kernel(
        L=L, TL=TL, HB=HB, hidden=hidden, blocks=blocks_cfg, rem=rem,
        fetch_halo=fetch_halo, use_halo=use_halo, cout=cout, lane_dense=lane_dense)

    res = pl.pallas_call(
        kern,
        out_shape=out_shape,
        grid_spec=pltpu.PrefetchScalarGridSpec(
            num_scalar_prefetch=0,
            grid=(B, nt),
            in_specs=in_specs,
            out_specs=out_spec,
            scratch_shapes=scratch_shapes,
        ),
        compiler_params=pltpu.CompilerParams(
            dimension_semantics=("parallel", "parallel"),
            vmem_limit_bytes=VMEM_LIMIT_BYTES,
        ),
    )(*inputs)

    if lane_dense:
        # (B, cout, L) -> (B, L, cout); a free reshape when cout == 1
        res = jnp.transpose(res, (0, 2, 1))
    return res


# ---------------------------------------------------------------------------
# Parameter construction (deterministic, synthetic)
# ---------------------------------------------------------------------------
def init_params(key, input_channels, hidden_dims, kernel_sizes, output_channels):
    params = {}
    key, k0 = jax.random.split(key)
    params["in_proj_w"] = 0.2 * jax.random.normal(
        k0, (input_channels, hidden_dims[0]), jnp.float32)
    key, k0 = jax.random.split(key)
    params["in_proj_b"] = 0.1 * jax.random.normal(k0, (1, hidden_dims[0]), jnp.float32)

    blocks = []
    in_ch = hidden_dims[0]
    for h, ks in zip(hidden_dims, kernel_sizes):
        bp = {}
        key, k0 = jax.random.split(key)
        # tap-major layout: (K, Cin, Cout); tap t == torch weight[:, :, t].T
        bp["conv_w"] = (1.0 / math.sqrt(in_ch * ks)) * jax.random.normal(
            k0, (ks, in_ch, h), jnp.float32)
        key, k0 = jax.random.split(key)
        bp["conv_b"] = 0.1 * jax.random.normal(k0, (1, h), jnp.float32)
        key, k0 = jax.random.split(key)
        bp["ln_g"] = 1.0 + 0.1 * jax.random.normal(k0, (1, h), jnp.float32)
        key, k0 = jax.random.split(key)
        bp["ln_b"] = 0.1 * jax.random.normal(k0, (1, h), jnp.float32)
        if in_ch != h:
            key, k0 = jax.random.split(key)
            bp["cm_w"] = (1.0 / math.sqrt(in_ch)) * jax.random.normal(
                k0, (in_ch, h), jnp.float32)
            key, k0 = jax.random.split(key)
            bp["cm_b"] = 0.1 * jax.random.normal(k0, (1, h), jnp.float32)
        blocks.append(bp)
        in_ch = h
    params["blocks"] = blocks

    key, k0 = jax.random.split(key)
    params["out_proj_w"] = (1.0 / math.sqrt(hidden_dims[-1])) * jax.random.normal(
        k0, (hidden_dims[-1], output_channels), jnp.float32)
    key, k0 = jax.random.split(key)
    params["out_proj_b"] = 0.1 * jax.random.normal(
        k0, (1, output_channels), jnp.float32)
    return params


# ---------------------------------------------------------------------------
# Pure-JAX reference (mirrors the torch module)
# ---------------------------------------------------------------------------
def _ref_conv1d(x, w_taps, b, dilation):
    K = w_taps.shape[0]
    pad = (K - 1) // 2 * dilation
    xp = jnp.pad(x, ((0, 0), (pad, pad), (0, 0)))
    L = x.shape[1]
    out = b[None]
    for t in range(K):
        out = out + jnp.einsum(
            "blc,cd->bld", xp[:, t * dilation: t * dilation + L, :], w_taps[t])
    return out


def conv1d_decoder_reference(x, params, kernel_sizes, dilations):
    h = jnp.einsum("blc,cd->bld", x, params["in_proj_w"]) + params["in_proj_b"][None]
    for bp, ks, dil in zip(params["blocks"], kernel_sizes, dilations):
        identity = h
        out = _ref_conv1d(h, bp["conv_w"], bp["conv_b"], dil)
        if "cm_w" in bp:
            identity = jnp.einsum("blc,cd->bld", h, bp["cm_w"]) + bp["cm_b"][None]
        out = out + identity
        mean = jnp.mean(out, axis=-1, keepdims=True)
        var = jnp.mean((out - mean) ** 2, axis=-1, keepdims=True)
        out = (out - mean) * jax.lax.rsqrt(var + LN_EPS) * bp["ln_g"][None] + bp["ln_b"][None]
        h = 0.5 * out * (1.0 + jax.lax.erf(out * _INV_SQRT2))
    h = jnp.maximum(h, 0.0)
    return jnp.einsum("blc,cd->bld", h, params["out_proj_w"]) + params["out_proj_b"][None]


# ---------------------------------------------------------------------------
if __name__ == "__main__":
    B, L = 2, 256
    input_channels = 16
    hidden_dims = [64, 32]
    kernel_sizes = [3, 3]
    dilations = [1, 2]
    output_channels = 1  # module default

    key = jax.random.PRNGKey(0)
    key, kx = jax.random.split(key)
    x = jax.random.normal(kx, (B, L, input_channels), jnp.float32)
    params = init_params(key, input_channels, hidden_dims, kernel_sizes, output_channels)

    # seq_tile=128 -> grid (B, 2): exercises the cross-tile halo exchange, the
    # zero-masked sequence edges and the lane-dense (cout=1) output path.
    out = conv1d_decoder_forward(x, params, kernel_sizes, dilations, seq_tile=128)
    out = jax.block_until_ready(out)

    ref = conv1d_decoder_reference(x, params, kernel_sizes, dilations)
    ref = jax.block_until_ready(ref)

    assert out.shape == (B, L, output_channels), out.shape
    np.testing.assert_allclose(np.asarray(out), np.asarray(ref), rtol=5e-4, atol=5e-4)

    print("KERNEL_OK")
</pallas_src>

<mosaic_0001>
module attributes {stable_mosaic.version = 11 : i64} {
  func.func @kernel(%arg0: i32, %arg1: i32, %arg2: memref<1x128x16xf32, #tpu.memory_space<vmem>>, %arg3: memref<1x8x16xf32, #tpu.memory_space<vmem>>, %arg4: memref<1x8x16xf32, #tpu.memory_space<vmem>>, %arg5: memref<16x64xf32, #tpu.memory_space<vmem>>, %arg6: memref<1x64xf32, #tpu.memory_space<vmem>>, %arg7: memref<3x64x64xf32, #tpu.memory_space<vmem>>, %arg8: memref<1x64xf32, #tpu.memory_space<vmem>>, %arg9: memref<1x64xf32, #tpu.memory_space<vmem>>, %arg10: memref<1x64xf32, #tpu.memory_space<vmem>>, %arg11: memref<3x64x32xf32, #tpu.memory_space<vmem>>, %arg12: memref<1x32xf32, #tpu.memory_space<vmem>>, %arg13: memref<1x32xf32, #tpu.memory_space<vmem>>, %arg14: memref<1x32xf32, #tpu.memory_space<vmem>>, %arg15: memref<32x128xf32, #tpu.memory_space<vmem>>, %arg16: memref<1x128xf32, #tpu.memory_space<vmem>>, %arg17: memref<1x1x128xf32, #tpu.memory_space<vmem>>, %arg18: memref<144x64xf32, #tpu.memory_space<vmem>>, %arg19: memref<132x64xf32, #tpu.memory_space<vmem>>) attributes {dimension_semantics = [#tpu.dimension_semantics<parallel>, #tpu.dimension_semantics<parallel>], iteration_bounds = array<i64: 2, 2>, scalar_prefetch = 0 : i64, scratch_operands = 2 : i64, tpu.core_type = #tpu.core_type<tc>, window_params = [{transform_indices = @transform_0, window_bounds = array<i64: 1, 128, 16>}, {transform_indices = @transform_1, window_bounds = array<i64: 1, 8, 16>}, {transform_indices = @transform_2, window_bounds = array<i64: 1, 8, 16>}, {pipeline_mode = #tpu.pipeline_mode<synchronous>, transform_indices = @transform_3, window_bounds = array<i64: 16, 64>}, {pipeline_mode = #tpu.pipeline_mode<synchronous>, transform_indices = @transform_4, window_bounds = array<i64: 1, 64>}, {pipeline_mode = #tpu.pipeline_mode<synchronous>, transform_indices = @transform_5, window_bounds = array<i64: 3, 64, 64>}, {pipeline_mode = #tpu.pipeline_mode<synchronous>, transform_indices = @transform_6, window_bounds = array<i64: 1, 64>}, {pipeline_mode = #tpu.pipeline_mode<synchronous>, transform_indices = @transform_7, window_bounds = array<i64: 1, 64>}, {pipeline_mode = #tpu.pipeline_mode<synchronous>, transform_indices = @transform_8, window_bounds = array<i64: 1, 64>}, {pipeline_mode = #tpu.pipeline_mode<synchronous>, transform_indices = @transform_9, window_bounds = array<i64: 3, 64, 32>}, {pipeline_mode = #tpu.pipeline_mode<synchronous>, transform_indices = @transform_10, window_bounds = array<i64: 1, 32>}, {pipeline_mode = #tpu.pipeline_mode<synchronous>, transform_indices = @transform_11, window_bounds = array<i64: 1, 32>}, {pipeline_mode = #tpu.pipeline_mode<synchronous>, transform_indices = @transform_12, window_bounds = array<i64: 1, 32>}, {pipeline_mode = #tpu.pipeline_mode<synchronous>, transform_indices = @transform_13, window_bounds = array<i64: 32, 128>}, {pipeline_mode = #tpu.pipeline_mode<synchronous>, transform_indices = @transform_14, window_bounds = array<i64: 1, 128>}, {transform_indices = @transform_15, window_bounds = array<i64: 1, 1, 128>}]} {
    %c0 = arith.constant 0 : index
    %c0_0 = arith.constant 0 : index
    %0 = vector.load %arg5[%c0, %c0_0] : memref<16x64xf32, #tpu.memory_space<vmem>>, vector<16x64xf32>
    %c0_1 = arith.constant 0 : index
    %c0_2 = arith.constant 0 : index
    %1 = vector.load %arg6[%c0_1, %c0_2] : memref<1x64xf32, #tpu.memory_space<vmem>>, vector<1x64xf32>
    %c0_3 = arith.constant 0 : index
    %c0_4 = arith.constant 0 : index
    %c0_5 = arith.constant 0 : index
    %2 = vector.load %arg2[%c0_3, %c0_4, %c0_5] : memref<1x128x16xf32, #tpu.memory_space<vmem>>, vector<1x128x16xf32>
    %3 = vector.shape_cast %2 : vector<1x128x16xf32> to vector<128x16xf32>
    %cst = arith.constant dense<0.000000e+00> : vector<128x64xf32>
    %4 = tpu.matmul %3, %0, %cst {dimension_numbers = #tpu.dot_dimension_numbers<[1], [0], [0], [1], [0, 0, 1, 1], [], []>} : vector<128x16xf32>, vector<16x64xf32>, vector<128x64xf32> -> vector<128x64xf32>
    %5 = vector.broadcast %1 : vector<1x64xf32> to vector<128x64xf32>
    %6 = arith.addf %4, %5 : vector<128x64xf32>
    %c8 = arith.constant 8 : index
    %c0_6 = arith.constant 0 : index
    %7 = vector.load %arg18[%c8, %c0_6] : memref<144x64xf32, #tpu.memory_space<vmem>>, vector<128x64xf32>
    tpu.vector_store %arg18[%c8, %c0_6], %6 {strides = array<i32>} : memref<144x64xf32, #tpu.memory_space<vmem>>, vector<128x64xf32>,
    %c0_7 = arith.constant 0 : index
    %c0_8 = arith.constant 0 : index
    %c0_9 = arith.constant 0 : index
    %8 = vector.load %arg3[%c0_7, %c0_8, %c0_9] : memref<1x8x16xf32, #tpu.memory_space<vmem>>, vector<1x8x16xf32>
    %9 = vector.shape_cast %8 : vector<1x8x16xf32> to vector<8x16xf32>
    %c0_10 = arith.constant 0 : index
    %c0_11 = arith.constant 0 : index
    %c0_12 = arith.constant 0 : index
    %10 = vector.load %arg4[%c0_10, %c0_11, %c0_12] : memref<1x8x16xf32, #tpu.memory_space<vmem>>, vector<1x8x16xf32>
    %11 = vector.shape_cast %10 : vector<1x8x16xf32> to vector<8x16xf32>
    %cst_13 = arith.constant dense<0.000000e+00> : vector<8x64xf32>
    %12 = tpu.matmul %9, %0, %cst_13 {dimension_numbers = #tpu.dot_dimension_numbers<[1], [0], [0], [1], [0, 0, 1, 1], [], []>} : vector<8x16xf32>, vector<16x64xf32>, vector<8x64xf32> -> vector<8x64xf32>
    %13 = vector.broadcast %1 : vector<1x64xf32> to vector<8x64xf32>
    %14 = arith.addf %12, %13 : vector<8x64xf32>
    %cst_14 = arith.constant dense<0.000000e+00> : vector<8x64xf32>
    %15 = tpu.matmul %11, %0, %cst_14 {dimension_numbers = #tpu.dot_dimension_numbers<[1], [0], [0], [1], [0, 0, 1, 1], [], []>} : vector<8x16xf32>, vector<16x64xf32>, vector<8x64xf32> -> vector<8x64xf32>
    %16 = vector.broadcast %1 : vector<1x64xf32> to vector<8x64xf32>
    %17 = arith.addf %15, %16 : vector<8x64xf32>
    %18 = tpu.iota {dimensions = array<i32: 0>} : vector<8x1xi32>
    %c128_i32 = arith.constant 128 : i32
    %19 = arith.muli %arg1, %c128_i32 : i32
    %c8_i32 = arith.constant 8 : i32
    %20 = arith.subi %19, %c8_i32 : i32
    %21 = vector.broadcast %20 : i32 to vector<8x1xi32>
    %22 = arith.addi %18, %21 : vector<8x1xi32>
    %c0_i32 = arith.constant 0 : i32
    %23 = vector.broadcast %c0_i32 : i32 to vector<8x1xi32>
    %24 = arith.cmpi sge, %22, %23 : vector<8x1xi32>
    %cst_15 = arith.constant 0.000000e+00 : f32
    %25 = vector.shape_cast %24 : vector<8x1xi1> to vector<8x1xi1>
    %26 = vector.broadcast %25 : vector<8x1xi1> to vector<8x64xi1>
    %27 = vector.broadcast %cst_15 : f32 to vector<8x64xf32>
    %28 = arith.select %26, %14, %27 : vector<8x64xi1>, vector<8x64xf32>
    %c0_16 = arith.constant 0 : index
    %c0_17 = arith.constant 0 : index
    %29 = vector.load %arg18[%c0_16, %c0_17] : memref<144x64xf32, #tpu.memory_space<vmem>>, vector<8x64xf32>
    tpu.vector_store %arg18[%c0_16, %c0_17], %28 {strides = array<i32>} : memref<144x64xf32, #tpu.memory_space<vmem>>, vector<8x64xf32>,
    %c128_i32_18 = arith.constant 128 : i32
    %30 = arith.muli %arg1, %c128_i32_18 : i32
    %c128_i32_19 = arith.constant 128 : i32
    %31 = arith.addi %30, %c128_i32_19 : i32
    %32 = vector.broadcast %31 : i32 to vector<8x1xi32>
    %33 = arith.addi %18, %32 : vector<8x1xi32>
    %c256_i32 = arith.constant 256 : i32
    %34 = vector.broadcast %c256_i32 : i32 to vector<8x1xi32>
    %35 = arith.cmpi slt, %33, %34 : vector<8x1xi32>
    %cst_20 = arith.constant 0.000000e+00 : f32
    %36 = vector.shape_cast %35 : vector<8x1xi1> to vector<8x1xi1>
    %37 = vector.broadcast %36 : vector<8x1xi1> to vector<8x64xi1>
    %38 = vector.broadcast %cst_20 : f32 to vector<8x64xf32>
    %39 = arith.select %37, %17, %38 : vector<8x64xi1>, vector<8x64xf32>
    %c136 = arith.constant 136 : index
    %c0_21 = arith.constant 0 : index
    %40 = vector.load %arg18[%c136, %c0_21] : memref<144x64xf32, #tpu.memory_space<vmem>>, vector<8x64xf32>
    tpu.vector_store %arg18[%c136, %c0_21], %39 {strides = array<i32>} : memref<144x64xf32, #tpu.memory_space<vmem>>, vector<8x64xf32>,
    %c5 = arith.constant 5 : index
    %c0_22 = arith.constant 0 : index
    %41 = vector.load %arg18[%c5, %c0_22] : memref<144x64xf32, #tpu.memory_space<vmem>>, vector<132x64xf32>
    %c0_23 = arith.constant 0 : index
    %c0_24 = arith.constant 0 : index
    %c0_25 = arith.constant 0 : index
    %42 = vector.load %arg7[%c0_23, %c0_24, %c0_25] : memref<3x64x64xf32, #tpu.memory_space<vmem>>, vector<1x64x64xf32>
    %43 = vector.shape_cast %42 : vector<1x64x64xf32> to vector<64x64xf32>
    %cst_26 = arith.constant dense<0.000000e+00> : vector<132x64xf32>
    %44 = tpu.matmul %41, %43, %cst_26 {dimension_numbers = #tpu.dot_dimension_numbers<[1], [0], [0], [1], [0, 0, 1, 1], [], []>} : vector<132x64xf32>, vector<64x64xf32>, vector<132x64xf32> -> vector<132x64xf32>
    %c6 = arith.constant 6 : index
    %c0_27 = arith.constant 0 : index
    %45 = vector.load %arg18[%c6, %c0_27] : memref<144x64xf32, #tpu.memory_space<vmem>>, vector<132x64xf32>
    %c1 = arith.constant 1 : index
    %c0_28 = arith.constant 0 : index
    %c0_29 = arith.constant 0 : index
    %46 = vector.load %arg7[%c1, %c0_28, %c0_29] : memref<3x64x64xf32, #tpu.memory_space<vmem>>, vector<1x64x64xf32>
    %47 = vector.shape_cast %46 : vector<1x64x64xf32> to vector<64x64xf32>
    %cst_30 = arith.constant dense<0.000000e+00> : vector<132x64xf32>
    %48 = tpu.matmul %45, %47, %cst_30 {dimension_numbers = #tpu.dot_dimension_numbers<[1], [0], [0], [1], [0, 0, 1, 1], [], []>} : vector<132x64xf32>, vector<64x64xf32>, vector<132x64xf32> -> vector<132x64xf32>
    %49 = arith.addf %44, %48 : vector<132x64xf32>
    %c7 = arith.constant 7 : index
    %c0_31 = arith.constant 0 : index
    %50 = vector.load %arg18[%c7, %c0_31] : memref<144x64xf32, #tpu.memory_space<vmem>>, vector<132x64xf32>
    %c2 = arith.constant 2 : index
    %c0_32 = arith.constant 0 : index
    %c0_33 = arith.constant 0 : index
    %51 = vector.load %arg7[%c2, %c0_32, %c0_33] : memref<3x64x64xf32, #tpu.memory_space<vmem>>, vector<1x64x64xf32>
    %52 = vector.shape_cast %51 : vector<1x64x64xf32> to vector<64x64xf32>
    %cst_34 = arith.constant dense<0.000000e+00> : vector<132x64xf32>
    %53 = tpu.matmul %50, %52, %cst_34 {dimension_numbers = #tpu.dot_dimension_numbers<[1], [0], [0], [1], [0, 0, 1, 1], [], []>} : vector<132x64xf32>, vector<64x64xf32>, vector<132x64xf32> -> vector<132x64xf32>
    %54 = arith.addf %49, %53 : vector<132x64xf32>
    %c0_35 = arith.constant 0 : index
    %c0_36 = arith.constant 0 : index
    %55 = vector.load %arg8[%c0_35, %c0_36] : memref<1x64xf32, #tpu.memory_space<vmem>>, vector<1x64xf32>
    %56 = vector.broadcast %55 : vector<1x64xf32> to vector<132x64xf32>
    %57 = arith.addf %54, %56 : vector<132x64xf32>
    %58 = arith.addf %57, %45 : vector<132x64xf32>
    %cst_37 = arith.constant dense<0.000000e+00> : vector<132xf32>
    %59 = vector.multi_reduction <add>, %58, %cst_37 [1] : vector<132x64xf32> to vector<132xf32>
    %60 = vector.shape_cast %59 : vector<132xf32> to vector<132x1xf32>
    %cst_38 = arith.constant 1.562500e-02 : f32
    %61 = vector.broadcast %cst_38 : f32 to vector<132x1xf32>
    %62 = arith.mulf %60, %61 : vector<132x1xf32>
    %63 = arith.mulf %58, %58 : vector<132x64xf32>
    %cst_39 = arith.constant dense<0.000000e+00> : vector<132xf32>
    %64 = vector.multi_reduction <add>, %63, %cst_39 [1] : vector<132x64xf32> to vector<132xf32>
    %65 = vector.shape_cast %64 : vector<132xf32> to vector<132x1xf32>
    %cst_40 = arith.constant 1.562500e-02 : f32
    %66 = vector.broadcast %cst_40 : f32 to vector<132x1xf32>
    %67 = arith.mulf %65, %66 : vector<132x1xf32>
    %68 = arith.mulf %62, %62 : vector<132x1xf32>
    %69 = arith.subf %67, %68 : vector<132x1xf32>
    %70 = vector.broadcast %62 : vector<132x1xf32> to vector<132x64xf32>
    %71 = arith.subf %58, %70 : vector<132x64xf32>
    %cst_41 = arith.constant 9.99999974E-6 : f32
    %72 = vector.broadcast %cst_41 : f32 to vector<132x1xf32>
    %73 = arith.addf %69, %72 : vector<132x1xf32>
    %74 = math.rsqrt %73 : vector<132x1xf32>
    %75 = vector.broadcast %74 : vector<132x1xf32> to vector<132x64xf32>
    %76 = arith.mulf %71, %75 : vector<132x64xf32>
    %c0_42 = arith.constant 0 : index
    %c0_43 = arith.constant 0 : index
    %77 = vector.load %arg9[%c0_42, %c0_43] : memref<1x64xf32, #tpu.memory_space<vmem>>, vector<1x64xf32>
    %78 = vector.broadcast %77 : vector<1x64xf32> to vector<132x64xf32>
    %79 = arith.mulf %76, %78 : vector<132x64xf32>
    %c0_44 = arith.constant 0 : index
    %c0_45 = arith.constant 0 : index
    %80 = vector.load %arg10[%c0_44, %c0_45] : memref<1x64xf32, #tpu.memory_space<vmem>>, vector<1x64xf32>
    %81 = vector.broadcast %80 : vector<1x64xf32> to vector<132x64xf32>
    %82 = arith.addf %79, %81 : vector<132x64xf32>
    %cst_46 = arith.constant 5.000000e-01 : f32
    %83 = vector.broadcast %cst_46 : f32 to vector<132x64xf32>
    %84 = arith.mulf %83, %82 : vector<132x64xf32>
    %cst_47 = arith.constant 0.707106769 : f32
    %85 = vector.broadcast %cst_47 : f32 to vector<132x64xf32>
    %86 = arith.mulf %82, %85 : vector<132x64xf32>
    %87 = math.erf %86 : vector<132x64xf32>
    %cst_48 = arith.constant 1.000000e+00 : f32
    %88 = vector.broadcast %cst_48 : f32 to vector<132x64xf32>
    %89 = arith.addf %88, %87 : vector<132x64xf32>
    %90 = arith.mulf %84, %89 : vector<132x64xf32>
    %91 = tpu.iota {dimensions = array<i32: 0>} : vector<132x1xi32>
    %c128_i32_49 = arith.constant 128 : i32
    %92 = arith.muli %arg1, %c128_i32_49 : i32
    %c2_i32 = arith.constant 2 : i32
    %93 = arith.subi %92, %c2_i32 : i32
    %94 = vector.broadcast %93 : i32 to vector<132x1xi32>
    %95 = arith.addi %91, %94 : vector<132x1xi32>
    %c0_i32_50 = arith.constant 0 : i32
    %96 = vector.broadcast %c0_i32_50 : i32 to vector<132x1xi32>
    %97 = arith.cmpi sge, %95, %96 : vector<132x1xi32>
    %c256_i32_51 = arith.constant 256 : i32
    %98 = vector.broadcast %c256_i32_51 : i32 to vector<132x1xi32>
    %99 = arith.cmpi slt, %95, %98 : vector<132x1xi32>
    %100 = arith.andi %97, %99 : vector<132x1xi1>
    %cst_52 = arith.constant 0.000000e+00 : f32
    %101 = vector.shape_cast %100 : vector<132x1xi1> to vector<132x1xi1>
    %102 = vector.broadcast %101 : vector<132x1xi1> to vector<132x64xi1>
    %103 = vector.broadcast %cst_52 : f32 to vector<132x64xf32>
    %104 = arith.select %102, %90, %103 : vector<132x64xi1>, vector<132x64xf32>
    %c0_53 = arith.constant 0 : index
    %c0_54 = arith.constant 0 : index
    %105 = vector.load %arg19[%c0_53, %c0_54] : memref<132x64xf32, #tpu.memory_space<vmem>>, vector<132x64xf32>
    tpu.vector_store %arg19[%c0_53, %c0_54], %104 {strides = array<i32>} : memref<132x64xf32, #tpu.memory_space<vmem>>, vector<132x64xf32>,
    %c0_55 = arith.constant 0 : index
    %c0_56 = arith.constant 0 : index
    %106 = vector.load %arg19[%c0_55, %c0_56] : memref<132x64xf32, #tpu.memory_space<vmem>>, vector<128x64xf32>
    %c0_57 = arith.constant 0 : index
    %c0_58 = arith.constant 0 : index
    %c0_59 = arith.constant 0 : index
    %107 = vector.load %arg11[%c0_57, %c0_58, %c0_59] : memref<3x64x32xf32, #tpu.memory_space<vmem>>, vector<1x64x32xf32>
    %108 = vector.shape_cast %107 : vector<1x64x32xf32> to vector<64x32xf32>
    %cst_60 = arith.constant dense<0.000000e+00> : vector<128x32xf32>
    %109 = tpu.matmul %106, %108, %cst_60 {dimension_numbers = #tpu.dot_dimension_numbers<[1], [0], [0], [1], [0, 0, 1, 1], [], []>} : vector<128x64xf32>, vector<64x32xf32>, vector<128x32xf32> -> vector<128x32xf32>
    %c2_61 = arith.constant 2 : index
    %c0_62 = arith.constant 0 : index
    %110 = vector.load %arg19[%c2_61, %c0_62] : memref<132x64xf32, #tpu.memory_space<vmem>>, vector<128x64xf32>
    %c1_63 = arith.constant 1 : index
    %c0_64 = arith.constant 0 : index
    %c0_65 = arith.constant 0 : index
    %111 = vector.load %arg11[%c1_63, %c0_64, %c0_65] : memref<3x64x32xf32, #tpu.memory_space<vmem>>, vector<1x64x32xf32>
    %112 = vector.shape_cast %111 : vector<1x64x32xf32> to vector<64x32xf32>
    %cst_66 = arith.constant dense<0.000000e+00> : vector<128x32xf32>
    %113 = tpu.matmul %110, %112, %cst_66 {dimension_numbers = #tpu.dot_dimension_numbers<[1], [0], [0], [1], [0, 0, 1, 1], [], []>} : vector<128x64xf32>, vector<64x32xf32>, vector<128x32xf32> -> vector<128x32xf32>
    %114 = arith.addf %109, %113 : vector<128x32xf32>
    %c4 = arith.constant 4 : index
    %c0_67 = arith.constant 0 : index
    %115 = vector.load %arg19[%c4, %c0_67] : memref<132x64xf32, #tpu.memory_space<vmem>>, vector<128x64xf32>
    %c2_68 = arith.constant 2 : index
    %c0_69 = arith.constant 0 : index
    %c0_70 = arith.constant 0 : index
    %116 = vector.load %arg11[%c2_68, %c0_69, %c0_70] : memref<3x64x32xf32, #tpu.memory_space<vmem>>, vector<1x64x32xf32>
    %117 = vector.shape_cast %116 : vector<1x64x32xf32> to vector<64x32xf32>
    %cst_71 = arith.constant dense<0.000000e+00> : vector<128x32xf32>
    %118 = tpu.matmul %115, %117, %cst_71 {dimension_numbers = #tpu.dot_dimension_numbers<[1], [0], [0], [1], [0, 0, 1, 1], [], []>} : vector<128x64xf32>, vector<64x32xf32>, vector<128x32xf32> -> vector<128x32xf32>
    %119 = arith.addf %114, %118 : vector<128x32xf32>
    %c0_72 = arith.constant 0 : index
    %c0_73 = arith.constant 0 : index
    %120 = vector.load %arg12[%c0_72, %c0_73] : memref<1x32xf32, #tpu.memory_space<vmem>>, vector<1x32xf32>
    %121 = vector.broadcast %120 : vector<1x32xf32> to vector<128x32xf32>
    %122 = arith.addf %119, %121 : vector<128x32xf32>
    %cst_74 = arith.constant dense<0.000000e+00> : vector<128xf32>
    %123 = vector.multi_reduction <add>, %122, %cst_74 [1] : vector<128x32xf32> to vector<128xf32>
    %124 = vector.shape_cast %123 : vector<128xf32> to vector<128x1xf32>
    %cst_75 = arith.constant 3.125000e-02 : f32
    %125 = vector.broadcast %cst_75 : f32 to vector<128x1xf32>
    %126 = arith.mulf %124, %125 : vector<128x1xf32>
    %127 = arith.mulf %122, %122 : vector<128x32xf32>
    %cst_76 = arith.constant dense<0.000000e+00> : vector<128xf32>
    %128 = vector.multi_reduction <add>, %127, %cst_76 [1] : vector<128x32xf32> to vector<128xf32>
    %129 = vector.shape_cast %128 : vector<128xf32> to vector<128x1xf32>
    %cst_77 = arith.constant 3.125000e-02 : f32
    %130 = vector.broadcast %cst_77 : f32 to vector<128x1xf32>
    %131 = arith.mulf %129, %130 : vector<128x1xf32>
    %132 = arith.mulf %126, %126 : vector<128x1xf32>
    %133 = arith.subf %131, %132 : vector<128x1xf32>
    %134 = vector.broadcast %126 : vector<128x1xf32> to vector<128x32xf32>
    %135 = arith.subf %122, %134 : vector<128x32xf32>
    %cst_78 = arith.constant 9.99999974E-6 : f32
    %136 = vector.broadcast %cst_78 : f32 to vector<128x1xf32>
    %137 = arith.addf %133, %136 : vector<128x1xf32>
    %138 = math.rsqrt %137 : vector<128x1xf32>
    %139 = vector.broadcast %138 : vector<128x1xf32> to vector<128x32xf32>
    %140 = arith.mulf %135, %139 : vector<128x32xf32>
    %c0_79 = arith.constant 0 : index
    %c0_80 = arith.constant 0 : index
    %141 = vector.load %arg13[%c0_79, %c0_80] : memref<1x32xf32, #tpu.memory_space<vmem>>, vector<1x32xf32>
    %142 = vector.broadcast %141 : vector<1x32xf32> to vector<128x32xf32>
    %143 = arith.mulf %140, %142 : vector<128x32xf32>
    %c0_81 = arith.constant 0 : index
    %c0_82 = arith.constant 0 : index
    %144 = vector.load %arg14[%c0_81, %c0_82] : memref<1x32xf32, #tpu.memory_space<vmem>>, vector<1x32xf32>
    %145 = vector.broadcast %144 : vector<1x32xf32> to vector<128x32xf32>
    %146 = arith.addf %143, %145 : vector<128x32xf32>
    %cst_83 = arith.constant 5.000000e-01 : f32
    %147 = vector.broadcast %cst_83 : f32 to vector<128x32xf32>
    %148 = arith.mulf %147, %146 : vector<128x32xf32>
    %cst_84 = arith.constant 0.707106769 : f32
    %149 = vector.broadcast %cst_84 : f32 to vector<128x32xf32>
    %150 = arith.mulf %146, %149 : vector<128x32xf32>
    %151 = math.erf %150 : vector<128x32xf32>
    %cst_85 = arith.constant 1.000000e+00 : f32
    %152 = vector.broadcast %cst_85 : f32 to vector<128x32xf32>
    %153 = arith.addf %152, %151 : vector<128x32xf32>
    %154 = arith.mulf %148, %153 : vector<128x32xf32>
    %cst_86 = arith.constant 0.000000e+00 : f32
    %155 = vector.broadcast %cst_86 : f32 to vector<128x32xf32>
    %156 = arith.maximumf %154, %155 : vector<128x32xf32>
    %c0_87 = arith.constant 0 : index
    %c0_88 = arith.constant 0 : index
    %157 = vector.load %arg15[%c0_87, %c0_88] : memref<32x128xf32, #tpu.memory_space<vmem>>, vector<32x128xf32>
    %cst_89 = arith.constant dense<0.000000e+00> : vector<128x128xf32>
    %158 = tpu.matmul %156, %157, %cst_89 {dimension_numbers = #tpu.dot_dimension_numbers<[1], [0], [0], [1], [0, 0, 1, 1], [], []>} : vector<128x32xf32>, vector<32x128xf32>, vector<128x128xf32> -> vector<128x128xf32>
    %c0_90 = arith.constant 0 : index
    %c0_91 = arith.constant 0 : index
    %159 = vector.load %arg16[%c0_90, %c0_91] : memref<1x128xf32, #tpu.memory_space<vmem>>, vector<1x128xf32>
    %160 = vector.broadcast %159 : vector<1x128xf32> to vector<128x128xf32>
    %161 = arith.addf %158, %160 : vector<128x128xf32>
    %162 = tpu.transpose %161, [1, 0] : vector<128x128xf32> -> vector<128x128xf32>
    %163 = vector.extract_strided_slice %162 {offsets = [0, 0], sizes = [1, 128], strides = [1, 1]} : vector<128x128xf32> to vector<1x128xf32>
    %c0_92 = arith.constant 0 : index
    %c0_93 = arith.constant 0 : index
    %c0_94 = arith.constant 0 : index
    %164 = vector.load %arg17[%c0_92, %c0_93, %c0_94] : memref<1x1x128xf32, #tpu.memory_space<vmem>>, vector<1x1x128xf32>
    %165 = vector.shape_cast %164 : vector<1x1x128xf32> to vector<1x128xf32>
    %166 = vector.shape_cast %163 : vector<1x128xf32> to vector<1x1x128xf32>
    tpu.vector_store %arg17[%c0_92, %c0_93, %c0_94], %166 {strides = array<i32>} : memref<1x1x128xf32, #tpu.memory_space<vmem>>, vector<1x1x128xf32>,
    return
  }
  func.func @transform_0(%arg0: i32, %arg1: i32) -> (i32, i32, i32) {
    %c0_i32 = arith.constant 0 : i32
    %c0_i32_0 = arith.constant 0 : i32
    return %arg0, %arg1, %c0_i32 : i32, i32, i32
  }
  func.func @transform_1(%arg0: i32, %arg1: i32) -> (i32, i32, i32) {
    %c16_i32 = arith.constant 16 : i32
    %0 = arith.muli %arg1, %c16_i32 : i32
    %c1_i32 = arith.constant 1 : i32
    %1 = arith.subi %0, %c1_i32 : i32
    %c0_i32 = arith.constant 0 : i32
    %2 = arith.maxsi %1, %c0_i32 : i32
    %c0_i32_0 = arith.constant 0 : i32
    %c0_i32_1 = arith.constant 0 : i32
    return %arg0, %2, %c0_i32_0 : i32, i32, i32
  }
  func.func @transform_2(%arg0: i32, %arg1: i32) -> (i32, i32, i32) {
    %c1_i32 = arith.constant 1 : i32
    %0 = arith.addi %arg1, %c1_i32 : i32
    %c16_i32 = arith.constant 16 : i32
    %1 = arith.muli %0, %c16_i32 : i32
    %c31_i32 = arith.constant 31 : i32
    %2 = arith.minsi %1, %c31_i32 : i32
    %c0_i32 = arith.constant 0 : i32
    %c0_i32_0 = arith.constant 0 : i32
    return %arg0, %2, %c0_i32 : i32, i32, i32
  }
  func.func @transform_3(%arg0: i32, %arg1: i32) -> (i32, i32) {
    %c0_i32 = arith.constant 0 : i32
    %c0_i32_0 = arith.constant 0 : i32
    %c0_i32_1 = arith.constant 0 : i32
    return %c0_i32, %c0_i32_0 : i32, i32
  }
  func.func @transform_4(%arg0: i32, %arg1: i32) -> (i32, i32) {
    %c0_i32 = arith.constant 0 : i32
    %c0_i32_0 = arith.constant 0 : i32
    %c0_i32_1 = arith.constant 0 : i32
    return %c0_i32, %c0_i32_0 : i32, i32
  }
  func.func @transform_5(%arg0: i32, %arg1: i32) -> (i32, i32, i32) {
    %c0_i32 = arith.constant 0 : i32
    %c0_i32_0 = arith.constant 0 : i32
    %c0_i32_1 = arith.constant 0 : i32
    %c0_i32_2 = arith.constant 0 : i32
    return %c0_i32, %c0_i32_0, %c0_i32_1 : i32, i32, i32
  }
  func.func @transform_6(%arg0: i32, %arg1: i32) -> (i32, i32) {
    %c0_i32 = arith.constant 0 : i32
    %c0_i32_0 = arith.constant 0 : i32
    %c0_i32_1 = arith.constant 0 : i32
    return %c0_i32, %c0_i32_0 : i32, i32
  }
  func.func @transform_7(%arg0: i32, %arg1: i32) -> (i32, i32) {
    %c0_i32 = arith.constant 0 : i32
    %c0_i32_0 = arith.constant 0 : i32
    %c0_i32_1 = arith.constant 0 : i32
    return %c0_i32, %c0_i32_0 : i32, i32
  }
  func.func @transform_8(%arg0: i32, %arg1: i32) -> (i32, i32) {
    %c0_i32 = arith.constant 0 : i32
    %c0_i32_0 = arith.constant 0 : i32
    %c0_i32_1 = arith.constant 0 : i32
    return %c0_i32, %c0_i32_0 : i32, i32
  }
  func.func @transform_9(%arg0: i32, %arg1: i32) -> (i32, i32, i32) {
    %c0_i32 = arith.constant 0 : i32
    %c0_i32_0 = arith.constant 0 : i32
    %c0_i32_1 = arith.constant 0 : i32
    %c0_i32_2 = arith.constant 0 : i32
    return %c0_i32, %c0_i32_0, %c0_i32_1 : i32, i32, i32
  }
  func.func @transform_10(%arg0: i32, %arg1: i32) -> (i32, i32) {
    %c0_i32 = arith.constant 0 : i32
    %c0_i32_0 = arith.constant 0 : i32
    %c0_i32_1 = arith.constant 0 : i32
    return %c0_i32, %c0_i32_0 : i32, i32
  }
  func.func @transform_11(%arg0: i32, %arg1: i32) -> (i32, i32) {
    %c0_i32 = arith.constant 0 : i32
    %c0_i32_0 = arith.constant 0 : i32
    %c0_i32_1 = arith.constant 0 : i32
    return %c0_i32, %c0_i32_0 : i32, i32
  }
  func.func @transform_12(%arg0: i32, %arg1: i32) -> (i32, i32) {
    %c0_i32 = arith.constant 0 : i32
    %c0_i32_0 = arith.constant 0 : i32
    %c0_i32_1 = arith.constant 0 : i32
    return %c0_i32, %c0_i32_0 : i32, i32
  }
  func.func @transform_13(%arg0: i32, %arg1: i32) -> (i32, i32) {
    %c0_i32 = arith.constant 0 : i32
    %c0_i32_0 = arith.constant 0 : i32
    %c0_i32_1 = arith.constant 0 : i32
    return %c0_i32, %c0_i32_0 : i32, i32
  }
  func.func @transform_14(%arg0: i32, %arg1: i32) -> (i32, i32) {
    %c0_i32 = arith.constant 0 : i32
    %c0_i32_0 = arith.constant 0 : i32
    %c0_i32_1 = arith.constant 0 : i32
    return %c0_i32, %c0_i32_0 : i32, i32
  }
  func.func @transform_15(%arg0: i32, %arg1: i32) -> (i32, i32, i32) {
    %c0_i32 = arith.constant 0 : i32
    %c0_i32_0 = arith.constant 0 : i32
    return %arg0, %c0_i32, %arg1 : i32, i32, i32
  }
}

</mosaic_0001>

<bundles_post_ra>
// kernel: tpu_custom_call.1
= control target key start
LH: loop header
LB: loop body
LE: loop exit
PB: predicated region body
PF: predicated region fallthrough
CT: control target
= control target key end

     0   :  { %s6704_s0 = inlined_call_operand.vmem [shape: f32[2,256,16], index: 0, kind: input, shape index: {}]   ;;  %s6705_s1 = inlined_call_operand.vmem [shape: f32[2,256,16], index: 1, kind: input, shape index: {}]   ;;  %s6706_s2 = inlined_call_operand.vmem [shape: f32[2,256,16], index: 2, kind: input, shape index: {}]   ;;  %s6707_s3 = inlined_call_operand.vmem [shape: f32[16,64], index: 3, kind: input, shape index: {}]   ;;  %s6708_s4 = inlined_call_operand.vmem [shape: f32[1,64], index: 4, kind: input, shape index: {}]   ;;  %s6709_s5 = inlined_call_operand.vmem [shape: f32[3,64,64], index: 5, kind: input, shape index: {}]   ;;  %s6710_s6 = inlined_call_operand.vmem [shape: f32[1,64], index: 6, kind: input, shape index: {}]   ;;  %s6711_s7 = inlined_call_operand.vmem [shape: f32[1,64], index: 7, kind: input, shape index: {}]   ;;  %s6712_s8 = inlined_call_operand.vmem [shape: f32[1,64], index: 8, kind: input, shape index: {}]   ;;  %s6713_s9 = inlined_call_operand.vmem [shape: f32[3,64,32], index: 9, kind: input, shape index: {}]   ;;  %s6714_s10 = inlined_call_operand.vmem [shape: f32[1,32], index: 10, kind: input, shape index: {}]   ;;  %s6715_s11 = inlined_call_operand.vmem [shape: f32[1,32], index: 11, kind: input, shape index: {}]   ;;  %s6716_s12 = inlined_call_operand.vmem [shape: f32[1,32], index: 12, kind: input, shape index: {}]   ;;  %s6717_s13 = inlined_call_operand.vmem [shape: f32[32,128], index: 13, kind: input, shape index: {}]   ;;  %s6718_s14 = inlined_call_operand.vmem [shape: f32[1,128], index: 14, kind: input, shape index: {}]   ;;  %s6719_s15 = inlined_call_operand.hbm [shape: f32[2,1,256], index: 15, kind: output, shape index: {}]  }
   0x1   :  { %6729 = sst [smem:[#allocation14_spill]] %s6704_s0 }
   0x2   :  { %6730 = sst [smem:[#allocation15_spill]] %s6707_s3 }
   0x3   :  { %6731 = sst [smem:[#allocation16_spill]] %s6718_s14 }
   0x4   :  { %6732 = sst [smem:[#allocation17_spill]] %s6719_s15 }
   0x5   :  { %20 = vsyncpa [#allocation5], 0 }
   0x6   :  { %22 = vsyncpa [#allocation5 + $0x1], 0  ;;  %s5086_s18 = smov 0   ;;  %s5088_s19 = smov 0  }
   0x7   :  { %s5090_s20 = smov 0   ;;  %s5092_s21 = smov 0  }
   0x8   :  { %s5094_s22 = smov 0   ;;  %s5096_s23 = smov 0  }
   0x9   :  { %s5098_s24 = smov 0   ;;  %s5100_s25 = smov 0  }
   0xa LB: > { %6733 = sst [smem:[#allocation7_spill]] %s4972_s18  ;;  %s3761_s26 = sadd.s32 4294967295, %s5000_s25   ;;  %s5000_s25 = sphi %s5100_s25, %s28_s25   ;;  %s4996_s24 = sphi %s5098_s24, %s6777_s24   ;;  %s4992_s23 = sphi %s5096_s23, %s6776_s23   ;;  %s4988_s22 = sphi %s5094_s22, %s6775_s22   ;;  %s4984_s21 = sphi %s5092_s21, %s6774_s21   ;;  %s4980_s20 = sphi %s5090_s20, %s6780_s20   ;;  %s4976_s19 = sphi %s5088_s19, %s6779_s19   ;;  %s4972_s18 = sphi %s5086_s18, %s6778_s18  }
   0xb   : > { %6734 = sst [smem:[#allocation8_spill]] %s4992_s23  ;;  %s3762_s27 = sadd.s32 4294967294, %s5000_s25  }
   0xc   : > { %6735 = sst [smem:[#allocation9_spill]] %s4996_s24  ;;  %s37_s28 = sadd.s32 1, %s4992_s23 }
   0xd   : > { %p38_p0 = scmp.ge.s32.totalorder %s37_s28, 2  ;;  %s40_s29 = sadd.s32 1, %s4996_s24 }
   0xe   : > { %p411_p1 = scmp.ne.s32.totalorder %s4980_s20, %s4976_s19  ;;  %p412_p2 = scmp.eq.s32.totalorder %s3761_s26, 3 }
   0xf   : > { %s6782_s28 = smov (%p38_p0, %s37_s28), 0  ;;  %s6784_s29 = smov (!%p38_p0, %s40_s29), %s4996_s24 }
  0x10   : > { %6736 = sst [smem:[#allocation10_spill]] %s6782_s28  ;;  %s397_s30 = ssub.s32 %s4992_s23, %s6782_s28 }
  0x11   : > { %p5137_p3 = por %p412_p2, %p411_p1  ;;  %p42_p4 = scmp.ge.s32.totalorder %s6784_s29, 2 }
  0x12   : > { %p417_p5 = scmp.ne.s32.totalorder %s4976_s19, %s4972_s18  ;;  %p418_p6 = scmp.eq.s32.totalorder %s3762_s27, 3 }
  0x13   : > { %s6737_s16 = scalar_select %p5137_p3, 1, 0 }
  0x14   : > { %p3771_p7 = scmp.ge.s32.totalorder %s5000_s25, 1  ;;  %s6786_s29 = smov (%p42_p4, %s6784_s29), 0 }
  0x15   : > { %6738 = sst [smem:[#allocation11_spill]] %s6737_s16  ;;  %p5146_p8 = por %p418_p6, %p417_p5 }
  0x16   : > { %6739 = sst [smem:[#allocation12_spill]] %s6786_s29  ;;  %p523_p9 = scmp.lt.s32.totalorder %s5000_s25, 5 }
  0x17   : > { %s6740_s17 = scalar_select %p5146_p8, 1, 0 }
  0x18   : > { %s396_s26 = ssub.s32 %s4996_s24, %s6786_s29  ;;  %s401_s15 = sadd.s32 1, %s4980_s20 }
  0x19   : > { %6741 = sst [smem:[#allocation13_spill]] %s6740_s17  ;;  %s398_s14 = sor.u32 %s397_s30, %s396_s26 }
  0x1a   : > { %p524_p10 = pnand %p3771_p7, %p523_p9  ;;  %p399_p11 = scmp.eq.s32.totalorder %s398_s14, 0 }
  0x1b   : > { %s6742_s3 = sld [smem:[#allocation15_spill]] (!%p524_p10)  ;;  %s5164_s17 = sshll.u32 (!%p524_p10), %s4984_s21, 4  ;;  %v5002_v3 = vmov (!%p524_p10), 0.0|0.0   ;;  %vm665_vm0 = vcmask (!%p524_p10), 130048   ;;  %vm5003_vm1 = vmmov (!%p524_p10), 0   ;;  %v5004_v10 = vmov (!%p524_p10), 0.0  }
  0x1c   : > { %s5155_s28 = scalar_select %p399_p11, %s4980_s20, %s401_s15  }
  0x1d   : > { %527 = sbr.rel (%p524_p10) target bundleno = 1620 (0x654), region = 80  ;;  %p599_p12 = scmp.lt.s32.totalorder (!%p524_p10), %s4988_s22, 1  ;;  %v3811_v23 = vld [vmem:[%s6709_s5 + $0x40] sm:$0xff] (!%p524_p10)  ;;  %v3812_v24 = vld [vmem:[%s6709_s5 + $0x48] sm:$0xff] (!%p524_p10)  ;;  %v3813_v29 = vld [vmem:[%s6709_s5 + $0x50] sm:$0xff] (!%p524_p10)  ;;  %v1024_v47 = vlaneseq (!%p524_p10)  ;;  %vm859_vm2 = vcmask (!%p524_p10), 523264  }
  0x1e   : > { %p601_p13 = scmp.lt.s32.totalorder (!%p524_p10), %s5164_s17, 31  ;;  %s5169_s14 = sadd.s32 (!%p524_p10), 4294967295, %s5164_s17  ;;  %v1060_v25 = vld [vmem:[%s6709_s5] sm:$0xff] (!%p524_p10)  ;;  %v4575_v26 = vpack.c.bf16 (!%p524_p10), %v3812_v24, %v3811_v23  ;;  %v1061_v27 = vld [vmem:[%s6709_s5 + $0x8] sm:$0xff] (!%p524_p10)  ;;  %v3814_v30 = vld [vmem:[%s6709_s5 + $0x58] sm:$0xff] (!%p524_p10)  ;;  %vm1829_vm5 = vcmask (!%p524_p10), 519168  }
  0x1f   : > { %p610_p0 = scmp.gt.s32.totalorder (!%p524_p10), %s5169_s14, 0  ;;  %p3777_p1 = scmp.lt.s32.totalorder (!%p524_p10), %s5169_s14, 31  ;;  %v4587_v28 = vpack.c.bf16 (!%p524_p10), %v1061_v27, %v1060_v25  ;;  %v1062_v31 = vld [vmem:[%s6709_s5 + $0x10] sm:$0xff] (!%p524_p10)  ;;  %v4578_v32 = vpack.c.bf16 (!%p524_p10), %v3814_v30, %v3813_v29  ;;  %v1063_v33 = vld [vmem:[%s6709_s5 + $0x18] sm:$0xff] (!%p524_p10)  ;;  %v3815_v35 = vld [vmem:[%s6709_s5 + $0x60] sm:$0xff] (!%p524_p10)  ;;  %v5315_v49 = vshrl.u32 (!%p524_p10), %v1024_v47, 7 }
  0x20   : > { %s3977_s26 = sadd.s32 (!%p524_p10), 16, %s5164_s17  ;;  %s6743_s0 = sld [smem:[#allocation14_spill]] (!%p524_p10)  ;;  %v4590_v34 = vpack.c.bf16 (!%p524_p10), %v1063_v33, %v1062_v31  ;;  %v3816_v36 = vld [vmem:[%s6709_s5 + $0x68] sm:$0xff] (!%p524_p10)  ;;  %v1064_v37 = vld [vmem:[%s6709_s5 + $0x20] sm:$0xff] (!%p524_p10)  ;;  %v3817_v41 = vld [vmem:[%s6709_s5 + $0x70] sm:$0xff] (!%p524_p10) }
  0x21   : > { %v640_v0 = vld [vmem:[%s6742_s3] sm:$0xff] (!%p524_p10)  ;;  %v641_v1 = vld [vmem:[%s6742_s3 + $0x8] sm:$0xff] (!%p524_p10)  ;;  %p5186_p2 = scmp.lt.s32.totalorder (!%p524_p10), %s3977_s26, 31  ;;  %v4581_v38 = vpack.c.bf16 (!%p524_p10), %v3816_v36, %v3815_v35  ;;  %v3818_v42 = vld [vmem:[%s6709_s5 + $0x78] sm:$0xff] (!%p524_p10) }
  0x22   : > { %v4564_v2 = vpack.c.bf16 (!%p524_p10), %v641_v1, %v640_v0  ;;  %v1065_v39 = vld [vmem:[%s6709_s5 + $0x28] sm:$0xff] (!%p524_p10)  ;;  %v1066_v43 = vld [vmem:[%s6709_s5 + $0x30] sm:$0xff] (!%p524_p10)  ;;  %v4584_v44 = vpack.c.bf16 (!%p524_p10), %v3818_v42, %v3817_v41  ;;  %v1067_v45 = vld [vmem:[%s6709_s5 + $0x38] sm:$0xff] (!%p524_p10) }
  0x23   : > { %v4593_v40 = vpack.c.bf16 (!%p524_p10), %v1065_v39, %v1064_v37  ;;  %v4596_v46 = vpack.c.bf16 (!%p524_p10), %v1067_v45, %v1066_v43  ;;  %v5313_v48 = vld [vmem:[%s6708_s4] ss:$0 sm:$0xff] (!%p524_p10)  ;;  %v3855_v24 = vld [vmem:[%s6709_s5 + $0x90] sm:$0xff] (!%p524_p10)  ;;  %v3856_v29 = vld [vmem:[%s6709_s5 + $0x98] sm:$0xff] (!%p524_p10) }
  0x24   : > { %s600_s15 = scalar_select %p599_p12, %s4988_s22, 1  ;;  %4666 = vmatprep.subr.bf16.mxu1 %v4564_v2  ;;  %4565 = vmatprep.subr.bf16.mxu0 %v4564_v2  ;;  %v3857_v33 = vld [vmem:[%s6709_s5 + $0xa0] sm:$0xff]  ;;  %v3859_v42 = vld [vmem:[%s6709_s5 + $0xb0] sm:$0xff]  ;;  %v3860_v47 = vld [vmem:[%s6709_s5 + $0xb8] sm:$0xff] }
  0x25   : > { %s602_s18 = scalar_select %p601_p13, %s5164_s17, 31  ;;  %4667 = vmatpush3.bf16.msra.mxu1 %v4564_v2  ;;  %4567 = vmatpush3.bf16.msra.mxu0 %v4564_v2 }
  0x26   : > { %s5173_s23 = sshll.u32 %s600_s15, 5  ;;  %4568 = vmatprep.subr.bf16.mxu1 %v5002_v3  ;;  %4586 = vmatprep.subr.bf16.mxu0 %v5002_v3  ;;  %s6788_s26 = smov (!%p5186_p2, %s3977_s26), 31 }
  0x27   : > { %s604_s30 = sadd.s32 %s5173_s23, %s602_s18  ;;  %s6792_s26 = smov (!%p5186_p2, %s6788_s26), 31 }
  0x28   : > { %s3774_s16 = sshll.u32 %s604_s30, 3 }
  0x29   : > { %s5184_s29 = scalar_lea.vmem %s6743_s0, %s3774_s16 }
  0x2a   : > { %v643_v4 = vld [vmem:[%s5184_s29] sm:$0xff]  ;;  %v657_v5 = vld [vmem:[%s5184_s29 + $0x70] sm:$0xff]  ;;  %v644_v6 = vld [vmem:[%s5184_s29 + $0x8] sm:$0xff]  ;;  %s611_s17 = scalar_select %p610_p0, %s5169_s14, 0 }
  0x2b   : > { %4173 = vmatprep.mubr.msk.f32.mxu0 %vm665_vm0, %v643_v4  ;;  %4194 = vmatprep.mubr.msk.f32.mxu1 %vm665_vm0, %v657_v5  ;;  %v658_v7 = vld [vmem:[%s5184_s29 + $0x78] sm:$0xff]  ;;  %v645_v8 = vld [vmem:[%s5184_s29 + $0x10] sm:$0xff]  ;;  %v647_v11 = vld [vmem:[%s5184_s29 + $0x20] sm:$0xff]  ;;  %s633_s14 = sadd.s32 %s5173_s23, %s6792_s26 }
  0x2c   : > { %4174 = vmatmul.mubr.msk.f32.vlgmr.msra.gmra.mrb[0].mxu0 %vm665_vm0, %v644_v6  ;;  %4195 = vmatmul.mubr.msk.f32.vlgmr.msra.gmra.mrb[0].mxu1 %vm665_vm0, %v658_v7  ;;  %s6790_s17 = smov (!%p3777_p1, %s611_s17), 31  ;;  %v646_v9 = vld [vmem:[%s5184_s29 + $0x18] sm:$0xff]  ;;  %s3789_s15 = sshll.u32 %s633_s14, 3  ;;  %v648_v13 = vld [vmem:[%s5184_s29 + $0x28] sm:$0xff]  ;;  %v649_v14 = vld [vmem:[%s5184_s29 + $0x30] sm:$0xff] }
  0x2d   : > { %4570 = vmatpush3.bf16.msra.mxu1 %v4564_v2  ;;  %4176 = vmatprep.mubr.msk.f32.mxu0 %vm665_vm0, %v645_v8  ;;  %s617_s3 = sadd.s32 %s6790_s17, %s5173_s23  ;;  %s635_s24 = scalar_lea.vmem %s6706_s2, %s3789_s15  ;;  %v650_v16 = vld [vmem:[%s5184_s29 + $0x38] sm:$0xff]  ;;  %v651_v17 = vld [vmem:[%s5184_s29 + $0x40] sm:$0xff]  ;;  %v652_v18 = vld [vmem:[%s5184_s29 + $0x48] sm:$0xff] }
  0x2e   : > { %4201 = vmatprep.mubr.msk.f32.mxu1 %vm5003_vm1, %v5004_v10  ;;  %4571 = vmatprep.subr.bf16.mxu1 %v5002_v3  ;;  %s3783_s18 = sshll.u32 %s617_s3, 3  ;;  %v877_v15 = vld [vmem:[%s635_s24] sm:$0xff]  ;;  %v653_v19 = vld [vmem:[%s5184_s29 + $0x50] sm:$0xff]  ;;  %v654_v20 = vld [vmem:[%s5184_s29 + $0x58] sm:$0xff]  ;;  %s5307_s14 = sshll.u32 %s4984_s21, 7 }
  0x2f   : > { %s619_s27 = scalar_lea.vmem %s6705_s1, %s3783_s18  ;;  %v655_v21 = vld [vmem:[%s5184_s29 + $0x60] sm:$0xff]  ;;  %v656_v22 = vld [vmem:[%s5184_s29 + $0x68] sm:$0xff]  ;;  %4588 = vmatpush3.bf16.msra.mxu0 %v4587_v28  ;;  %s3810_s29 = sadd.s32 4294967288, %s5307_s14 }
  0x30   : > { %4177 = vmatmul.mubr.msk.f32.gmra.mrb[2].mxu0 %vm665_vm0, %v646_v9  ;;  %v876_v12 = vld [vmem:[%s619_s27] sm:$0xff]  ;;  %4589 = vmatprep.subr.bf16.mxu0 %v5002_v3  ;;  %v1028_v50 = vstv %s3810_s29  ;;  %s1035_s27 = sadd.s32 128, %s5307_s14  ;;  %s3881_s0 = sadd.s32 4294967294, %s5307_s14 }
  0x31   : > { %4179 = vmatprep.mubr.msk.f32.mxu0 %vm665_vm0, %v647_v11  ;;  %4202 = vmatmul.mubr.msk.f32.vlgmr.msra.gmra.mrb[2].mxu1 %vm665_vm0, %v876_v12  ;;  %v1029_v59 = vadd.s32 %v1028_v50, %v5315_v49  ;;  %v1036_v60 = vstv %s1035_s27  ;;  %s6769_s27 = sld [smem:[#allocation16_spill]]  ;;  %s596_s17 = sand.u32 1, %s4976_s19  }
  0x32   : > { %4573 = vmatpush3.bf16.msra.mxu1 %v4564_v2  ;;  %4208 = vmatprep.mubr.msk.f32.mxu1 %vm5003_vm1, %v5004_v10  ;;  %v1037_v2 = vadd.s32 %v1036_v60, %v5315_v49  ;;  %s597_s23 = scalar_lea.vmem [#allocation4], %s596_s17  ;;  %s6771_s29 = sld [smem:[#allocation17_spill]] }
  0x33   : > { %4574 = vmatprep.subr.bf16.mxu1 %v5002_v3  ;;  %4591 = vmatpush3.bf16.msra.mxu0 %v4590_v34  ;;  %vm1030_vm3 = vcmp.ge.s32.totalorder %v1029_v59, 0  ;;  %s3651_s14 = sshll.u32 %s597_s23, 4  ;;  %s3637_s16 = scalar_lea.sflag [#allocation5], %s596_s17  ;;  %s6648_s14 = int_to_ptr.vmem [resolvable:$true] %s3651_s14 }
  0x34   : > { %4180 = vmatmul.mubr.msk.f32.gmra.mrb[4].mxu0 %vm665_vm0, %v648_v13  ;;  %4592 = vmatprep.subr.bf16.mxu0 %v5002_v3  ;;  %vm1038_vm4 = vcmp.lt.s32.totalorder %v1037_v2, 256 }
  0x35   : > { %4182 = vmatprep.mubr.msk.f32.mxu0 %vm665_vm0, %v649_v14  ;;  %4209 = vmatmul.mubr.msk.f32.vlgmr.msra.gmra.mrb[4].mxu1 %vm665_vm0, %v877_v15  ;;  %v3853_v15 = vld [vmem:[%s6709_s5 + $0x80] sm:$0xff] }
  0x36   : > { %4227 = vmatprep.mubr.msk.f32.mxu1 %vm5003_vm1, %v5004_v10  ;;  %4576 = vmatpush3.bf16.msra.mxu1 %v4575_v26 }
  0x37   : > { %4577 = vmatprep.subr.bf16.mxu1 %v5002_v3  ;;  %4594 = vmatpush3.bf16.msra.mxu0 %v4593_v40 }
  0x38   : > { %4183 = vmatmul.mubr.msk.f32.gmra.mrb[6].mxu0 %vm665_vm0, %v650_v16  ;;  %4595 = vmatprep.subr.bf16.mxu0 %v5002_v3  ;;  %v3854_v16 = vld [vmem:[%s6709_s5 + $0x88] sm:$0xff] }
  0x39   : > { %4185 = vmatprep.mubr.msk.f32.mxu0 %vm665_vm0, %v651_v17 }
  0x3a   : > { %4579 = vmatpush3.bf16.msra.mxu1 %v4578_v32  ;;  %v4602_v32 = vpack.c.bf16 %v3856_v29, %v3855_v24 }
  0x3b   : > { %4580 = vmatprep.subr.bf16.mxu1 %v5002_v3  ;;  %4597 = vmatpush3.bf16.msra.mxu0 %v4596_v46 }
  0x3c   : > { %4186 = vmatmul.mubr.msk.f32.gmra.mrb[8].mxu0 %vm665_vm0, %v652_v18 }
  0x3d   : > { %4188 = vmatprep.mubr.msk.f32.mxu0 %vm665_vm0, %v653_v19 }
  0x3e   : > { %4582 = vmatpush3.bf16.msra.mxu1 %v4581_v38  ;;  %v3858_v38 = vld [vmem:[%s6709_s5 + $0xa8] sm:$0xff] }
  0x3f   : > { %4583 = vmatprep.subr.bf16.mxu1 %v5002_v3  ;;  %v4605_v41 = vpack.c.bf16 %v3858_v38, %v3857_v33 }
  0x40   : > { %4189 = vmatmul.mubr.msk.f32.gmra.mrb[10].mxu0 %vm665_vm0, %v654_v20 }
  0x41   : > { %4191 = vmatprep.mubr.msk.f32.mxu0 %vm665_vm0, %v655_v21 }
  0x42   : > { %4585 = vmatpush3.bf16.msra.mxu1 %v4584_v44 }
  0x43   : > { %4598 = vmatprep.subr.bf16.mxu1 %v5002_v3 }
  0x44   : > { %4192 = vmatmul.mubr.msk.f32.gmra.mrb[12].mxu0 %vm665_vm0, %v656_v22  ;;  %v4599_v22 = vpack.c.bf16 %v3854_v16, %v3853_v15 }
  0x45   : > { %4294 = vmatprep.mubr.msk.f32.mxu0 %vm5003_vm1, %v5004_v10 }
  0xff   : > { %v4196_v51 = vpop.f32.mrb[0].mxu1  ;;  %v4175_v52 = vpop.f32.mrb[0].mxu0 }
 0x100   : > { %v856_v53 = vadd.f32 %v4196_v51, %v5313_v48  ;;  %v850_v54 = vpop.f32.mrb[1].mxu1  ;;  %v786_v55 = vadd.f32 %v4175_v52, %v5313_v48  ;;  %v780_v56 = vpop.f32.mrb[1].mxu0  ;;  %v4608_v51 = vpack.c.bf16 %v3860_v47, %v3859_v42 }
 0x101   : > { %v851_v57 = vadd.f32 %v5313_v48, %v850_v54  ;;  %v781_v58 = vadd.f32 %v5313_v48, %v780_v56 }
 0x102   : > { %875 = vst.msk [vmem:[#allocation2 + $0x80] sm:$0xff] %vm859_vm2, %v856_v53  ;;  %861 = vst.msk [vmem:[#allocation2 + $0x10] sm:$0xff] %vm859_vm2, %v786_v55 }
 0x103   : > { %874 = vst.msk [vmem:[#allocation2 + $0x78] sm:$0xff] %vm859_vm2, %v851_v57  ;;  %860 = vst.msk [vmem:[#allocation2 + $0x8] sm:$0xff] %vm859_vm2, %v781_v58  ;;  %v4178_v61 = vpop.f32.mrb[2].mxu0 }
 0x104   : > { %v796_v62 = vadd.f32 %v4178_v61, %v5313_v48  ;;  %v790_v63 = vpop.f32.mrb[3].mxu0  ;;  %v947_v0 = vpop.f32.mrb[2].mxu1 }
 0x105   : > { %v791_v1 = vadd.f32 %v5313_v48, %v790_v63  ;;  %v948_v4 = vadd.f32 %v5313_v48, %v947_v0  ;;  %v4203_v5 = vpop.f32.mrb[3].mxu1 }
 0x106   : > { %863 = vst.msk [vmem:[#allocation2 + $0x20] sm:$0xff] %vm859_vm2, %v796_v62 }
 0x107   : > { %862 = vst.msk [vmem:[#allocation2 + $0x18] sm:$0xff] %vm859_vm2, %v791_v1  ;;  %v4181_v6 = vpop.f32.mrb[4].mxu0  ;;  %v1033_v7 = vsel %vm1030_vm3, %v948_v4, 0.0 }
 0x108   : > { %v806_v8 = vadd.f32 %v4181_v6, %v5313_v48  ;;  %v800_v9 = vpop.f32.mrb[5].mxu0  ;;  %1034 = vst.msk [vmem:[#allocation2] sm:$0xff] %vm859_vm2, %v1033_v7  ;;  %v1020_v11 = vpop.f32.mrb[4].mxu1 }
 0x109   : > { %v801_v12 = vadd.f32 %v5313_v48, %v800_v9  ;;  %v1021_v13 = vadd.f32 %v5313_v48, %v1020_v11  ;;  %v4210_v14 = vpop.f32.mrb[5].mxu1 }
 0x10a   : > { %865 = vst.msk [vmem:[#allocation2 + $0x30] sm:$0xff] %vm859_vm2, %v806_v8  ;;  %v5373_v34 = vld [vmem:[#allocation2 + $0xe] sm:$0xff] }
 0x10b   : > { %864 = vst.msk [vmem:[#allocation2 + $0x28] sm:$0xff] %vm859_vm2, %v801_v12  ;;  %v4184_v17 = vpop.f32.mrb[6].mxu0  ;;  %v1041_v18 = vsel %vm1038_vm4, %v1021_v13, 0.0  ;;  %v1044_v35 = vld [vmem:[#allocation2 + $0xd] sm:$0xff]  ;;  %v5518_v12 = vld [vmem:[#allocation2 + $0x7e] sm:$0xff] }
 0x10c   : > { %v816_v19 = vadd.f32 %v4184_v17, %v5313_v48  ;;  %v810_v20 = vpop.f32.mrb[7].mxu0  ;;  %1042 = vst.msk [vmem:[#allocation2 + $0x88] sm:$0xff] %vm859_vm2, %v1041_v18  ;;  %v1058_v13 = vld [vmem:[#allocation2 + $0x7d] sm:$0xff]  ;;  %v1497_v17 = vld [vmem:[#allocation2 + $0xf] sm:$0xff] }
 0x10d   : > { %v811_v21 = vadd.f32 %v5313_v48, %v810_v20 }
 0x10e   : > { %867 = vst.msk [vmem:[#allocation2 + $0x40] sm:$0xff] %vm859_vm2, %v816_v19  ;;  %v5393_v44 = vld [vmem:[#allocation2 + $0x16] sm:$0xff]  ;;  %v5409_v52 = vld [vmem:[#allocation2 + $0x1e] sm:$0xff] }
 0x10f   : > { %866 = vst.msk [vmem:[#allocation2 + $0x38] sm:$0xff] %vm859_vm2, %v811_v21  ;;  %v4187_v23 = vpop.f32.mrb[8].mxu0  ;;  %v5353_v25 = vld [vmem:[#allocation2 + $0x6] sm:$0xff]  ;;  %v1045_v45 = vld [vmem:[#allocation2 + $0x15] sm:$0xff]  ;;  %v1046_v53 = vld [vmem:[#allocation2 + $0x1d] sm:$0xff] }
 0x110   : > { %v1043_v26 = vld [vmem:[#allocation2 + $0x5] sm:$0xff]  ;;  %v826_v27 = vadd.f32 %v4187_v23, %v5313_v48  ;;  %v820_v28 = vpop.f32.mrb[9].mxu0  ;;  %4228 = vmatmul.mubr.msk.f32.vlgmr.msra.gmra.mrb[6].mxu1 %vm859_vm2, %v5353_v25  ;;  %v1498_v18 = vld [vmem:[#allocation2 + $0x17] sm:$0xff] }
 0x111   : > { %4295 = vmatmul.mubr.msk.f32.vlgmr.msra.gmra.mrb[14].mxu0 %vm859_vm2, %v1043_v26  ;;  %v821_v30 = vadd.f32 %v5313_v48, %v820_v28  ;;  %4600 = vmatpush3.bf16.msra.mxu1 %v4599_v22  ;;  %v1496_v16 = vld [vmem:[#allocation2 + $0x7] sm:$0xff]  ;;  %v1499_v19 = vld [vmem:[#allocation2 + $0x1f] sm:$0xff] }
 0x112   : > { %4230 = vmatprep.mubr.msk.f32.mxu1 %vm5003_vm1, %v5004_v10  ;;  %869 = vst.msk [vmem:[#allocation2 + $0x50] sm:$0xff] %vm859_vm2, %v826_v27  ;;  %4297 = vmatprep.mubr.msk.f32.mxu0 %vm5003_vm1, %v5004_v10  ;;  %v1047_v54 = vld [vmem:[#allocation2 + $0x25] sm:$0xff]  ;;  %v1048_v55 = vld [vmem:[#allocation2 + $0x2d] sm:$0xff] }
 0x113   : > { %868 = vst.msk [vmem:[#allocation2 + $0x48] sm:$0xff] %vm859_vm2, %v821_v30  ;;  %v4190_v31 = vpop.f32.mrb[10].mxu0  ;;  %4601 = vmatprep.subr.bf16.mxu1 %v5002_v3  ;;  %v5527_v14 = vld [vmem:[#allocation2 + $0x86] sm:$0xf]  ;;  %v1501_v21 = vld [vmem:[#allocation2 + $0x2f] sm:$0xff] }
 0x114   : > { %v836_v36 = vadd.f32 %v4190_v31, %v5313_v48  ;;  %v830_v37 = vpop.f32.mrb[11].mxu0  ;;  %4231 = vmatmul.mubr.msk.f32.gmra.mrb[8].mxu1 %vm859_vm2, %v5373_v34  ;;  %v1059_v15 = vld [vmem:[#allocation2 + $0x85] sm:$0xf] }
 0x115   : > { %4298 = vmatmul.mubr.msk.f32.gmra.mrb[16].mxu0 %vm859_vm2, %v1044_v35  ;;  %v831_v39 = vadd.f32 %v5313_v48, %v830_v37  ;;  %4233 = vmatprep.mubr.msk.f32.mxu1 %vm5003_vm1, %v5004_v10  ;;  %v1500_v20 = vld [vmem:[#allocation2 + $0x27] sm:$0xff] }
 0x116   : > { %871 = vst.msk [vmem:[#allocation2 + $0x60] sm:$0xff] %vm859_vm2, %v836_v36  ;;  %4300 = vmatprep.mubr.msk.f32.mxu0 %vm5003_vm1, %v5004_v10  ;;  %4603 = vmatpush3.bf16.msra.mxu1 %v4602_v32  ;;  %v5437_v56 = vld [vmem:[#allocation2 + $0x36] sm:$0xff]  ;;  %v5446_v58 = vld [vmem:[#allocation2 + $0x3e] sm:$0xff]  ;;  %v1512_v33 = vld [vmem:[#allocation2 + $0x87] sm:$0xf] }
 0x117   : > { %870 = vst.msk [vmem:[#allocation2 + $0x58] sm:$0xff] %vm859_vm2, %v831_v39  ;;  %v4193_v40 = vpop.f32.mrb[12].mxu0  ;;  %4604 = vmatprep.subr.bf16.mxu1 %v5002_v3  ;;  %v1049_v57 = vld [vmem:[#allocation2 + $0x35] sm:$0xff]  ;;  %v1050_v59 = vld [vmem:[#allocation2 + $0x3d] sm:$0xff] }
 0x118   : > { %v846_v43 = vadd.f32 %v4193_v40, %v5313_v48  ;;  %v840_v46 = vpop.f32.mrb[13].mxu0  ;;  %4234 = vmatmul.mubr.msk.f32.gmra.mrb[10].mxu1 %vm859_vm2, %v5393_v44  ;;  %v1502_v22 = vld [vmem:[#allocation2 + $0x37] sm:$0xff]  ;;  %v1503_v23 = vld [vmem:[#allocation2 + $0x3f] sm:$0xff] }
 0x119   : > { %4301 = vmatmul.mubr.msk.f32.gmra.mrb[18].mxu0 %vm859_vm2, %v1045_v45  ;;  %v841_v50 = vadd.f32 %v5313_v48, %v840_v46  ;;  %4236 = vmatprep.mubr.msk.f32.mxu1 %vm5003_vm1, %v5004_v10  ;;  %v5419_v48 = vld [vmem:[#allocation2 + $0x26] sm:$0xff] }
 0x11a   : > { %873 = vst.msk [vmem:[#allocation2 + $0x70] sm:$0xff] %vm859_vm2, %v846_v43  ;;  %4303 = vmatprep.mubr.msk.f32.mxu0 %vm5003_vm1, %v5004_v10  ;;  %4606 = vmatpush3.bf16.msra.mxu1 %v4605_v41  ;;  %v5455_v60 = vld [vmem:[#allocation2 + $0x46] sm:$0xff]  ;;  %v5464_v62 = vld [vmem:[#allocation2 + $0x4e] sm:$0xff] }
 0x11b   : > { %872 = vst.msk [vmem:[#allocation2 + $0x68] sm:$0xff] %vm859_vm2, %v841_v50  ;;  %4607 = vmatprep.subr.bf16.mxu1 %v5002_v3  ;;  %v5428_v3 = vld [vmem:[#allocation2 + $0x2e] sm:$0xff]  ;;  %v1051_v61 = vld [vmem:[#allocation2 + $0x45] sm:$0xff] }
 0x11c   : > { %4237 = vmatmul.mubr.msk.f32.gmra.mrb[12].mxu1 %vm859_vm2, %v5409_v52  ;;  %v1052_v63 = vld [vmem:[#allocation2 + $0x4d] sm:$0xff]  ;;  %v1511_v32 = vld [vmem:[#allocation2 + $0x7f] sm:$0xff] }
 0x11d   : > { %4304 = vmatmul.mubr.msk.f32.gmra.mrb[20].mxu0 %vm859_vm2, %v1046_v53  ;;  %4239 = vmatprep.mubr.msk.f32.mxu1 %vm5003_vm1, %v5004_v10  ;;  %v1504_v24 = vld [vmem:[#allocation2 + $0x47] sm:$0xff]  ;;  %v1505_v26 = vld [vmem:[#allocation2 + $0x4f] sm:$0xff] }
 0x11e   : > { %4306 = vmatprep.mubr.msk.f32.mxu0 %vm5003_vm1, %v5004_v10  ;;  %4609 = vmatpush3.bf16.msra.mxu1 %v4608_v51  ;;  %v5473_v0 = vld [vmem:[#allocation2 + $0x56] sm:$0xff]  ;;  %v5482_v2 = vld [vmem:[#allocation2 + $0x5e] sm:$0xff] }
 0x11f   : > { %v1053_v1 = vld [vmem:[#allocation2 + $0x55] sm:$0xff]  ;;  %v1054_v4 = vld [vmem:[#allocation2 + $0x5d] sm:$0xff] }
 0x120   : > { %4240 = vmatmul.mubr.msk.f32.gmra.mrb[14].mxu1 %vm859_vm2, %v5419_v48  ;;  %v1506_v27 = vld [vmem:[#allocation2 + $0x57] sm:$0xff]  ;;  %v1507_v28 = vld [vmem:[#allocation2 + $0x5f] sm:$0xff] }
 0x121   : > { %4307 = vmatmul.mubr.msk.f32.gmra.mrb[22].mxu0 %vm859_vm2, %v1047_v54  ;;  %4242 = vmatprep.mubr.msk.f32.mxu1 %vm5003_vm1, %v5004_v10  ;;  %v5509_v9 = vld [vmem:[#allocation2 + $0x76] sm:$0xff] }
 0x122   : > { %4309 = vmatprep.mubr.msk.f32.mxu0 %vm5003_vm1, %v5004_v10  ;;  %v5491_v5 = vld [vmem:[#allocation2 + $0x66] sm:$0xff]  ;;  %v5500_v7 = vld [vmem:[#allocation2 + $0x6e] sm:$0xff]  ;;  %v1510_v31 = vld [vmem:[#allocation2 + $0x77] sm:$0xff] }
 0x123   : > { %v1055_v6 = vld [vmem:[#allocation2 + $0x65] sm:$0xff]  ;;  %v1056_v8 = vld [vmem:[#allocation2 + $0x6d] sm:$0xff]  ;;  %v1057_v11 = vld [vmem:[#allocation2 + $0x75] sm:$0xff] }
 0x124   : > { %4243 = vmatmul.mubr.msk.f32.gmra.mrb[16].mxu1 %vm859_vm2, %v5428_v3  ;;  %v1508_v29 = vld [vmem:[#allocation2 + $0x67] sm:$0xff]  ;;  %v1509_v30 = vld [vmem:[#allocation2 + $0x6f] sm:$0xff] }
 0x125   : > { %4310 = vmatmul.mubr.msk.f32.gmra.mrb[24].mxu0 %vm859_vm2, %v1048_v55  ;;  %4245 = vmatprep.mubr.msk.f32.mxu1 %vm5003_vm1, %v5004_v10 }
 0x126   : > { %4312 = vmatprep.mubr.msk.f32.mxu0 %vm5003_vm1, %v5004_v10 }
 0x128   : > { %4246 = vmatmul.mubr.msk.f32.gmra.mrb[18].mxu1 %vm859_vm2, %v5437_v56 }
 0x129   : > { %4313 = vmatmul.mubr.msk.f32.gmra.mrb[26].mxu0 %vm859_vm2, %v1049_v57  ;;  %4248 = vmatprep.mubr.msk.f32.mxu1 %vm5003_vm1, %v5004_v10 }
 0x12a   : > { %4315 = vmatprep.mubr.msk.f32.mxu0 %vm5003_vm1, %v5004_v10 }
 0x12c   : > { %4249 = vmatmul.mubr.msk.f32.gmra.mrb[20].mxu1 %vm859_vm2, %v5446_v58 }
 0x12d   : > { %4316 = vmatmul.mubr.msk.f32.gmra.mrb[28].mxu0 %vm859_vm2, %v1050_v59  ;;  %4251 = vmatprep.mubr.msk.f32.mxu1 %vm5003_vm1, %v5004_v10 }
 0x12e   : > { %4318 = vmatprep.mubr.msk.f32.mxu0 %vm5003_vm1, %v5004_v10 }
 0x130   : > { %4252 = vmatmul.mubr.msk.f32.gmra.mrb[22].mxu1 %vm859_vm2, %v5455_v60 }
 0x131   : > { %4319 = vmatmul.mubr.msk.f32.gmra.mrb[30].mxu0 %vm859_vm2, %v1051_v61  ;;  %4254 = vmatprep.mubr.msk.f32.mxu1 %vm5003_vm1, %v5004_v10 }
 0x132   : > { %4321 = vmatprep.mubr.msk.f32.mxu0 %vm5003_vm1, %v5004_v10 }
 0x134   : > { %4255 = vmatmul.mubr.msk.f32.gmra.mrb[24].mxu1 %vm859_vm2, %v5464_v62 }
 0x135   : > { %4322 = vmatmul.mubr.msk.f32.gmra.mrb[32].mxu0 %vm859_vm2, %v1052_v63  ;;  %4257 = vmatprep.mubr.msk.f32.mxu1 %vm5003_vm1, %v5004_v10 }
 0x136   : > { %4324 = vmatprep.mubr.msk.f32.mxu0 %vm5003_vm1, %v5004_v10 }
 0x138   : > { %4258 = vmatmul.mubr.msk.f32.gmra.mrb[26].mxu1 %vm859_vm2, %v5473_v0 }
 0x139   : > { %4325 = vmatmul.mubr.msk.f32.gmra.mrb[34].mxu0 %vm859_vm2, %v1053_v1  ;;  %4260 = vmatprep.mubr.msk.f32.mxu1 %vm5003_vm1, %v5004_v10 }
 0x13a   : > { %4327 = vmatprep.mubr.msk.f32.mxu0 %vm5003_vm1, %v5004_v10 }
 0x13c   : > { %4261 = vmatmul.mubr.msk.f32.gmra.mrb[28].mxu1 %vm859_vm2, %v5482_v2 }
 0x13d   : > { %4328 = vmatmul.mubr.msk.f32.gmra.mrb[36].mxu0 %vm859_vm2, %v1054_v4  ;;  %4263 = vmatprep.mubr.msk.f32.mxu1 %vm5003_vm1, %v5004_v10 }
 0x13e   : > { %4330 = vmatprep.mubr.msk.f32.mxu0 %vm5003_vm1, %v5004_v10 }
 0x140   : > { %4264 = vmatmul.mubr.msk.f32.gmra.mrb[30].mxu1 %vm859_vm2, %v5491_v5 }
 0x141   : > { %4331 = vmatmul.mubr.msk.f32.gmra.mrb[38].mxu0 %vm859_vm2, %v1055_v6  ;;  %4266 = vmatprep.mubr.msk.f32.mxu1 %vm5003_vm1, %v5004_v10 }
 0x142   : > { %4333 = vmatprep.mubr.msk.f32.mxu0 %vm5003_vm1, %v5004_v10 }
 0x144   : > { %4267 = vmatmul.mubr.msk.f32.gmra.mrb[32].mxu1 %vm859_vm2, %v5500_v7 }
 0x145   : > { %4334 = vmatmul.mubr.msk.f32.gmra.mrb[40].mxu0 %vm859_vm2, %v1056_v8  ;;  %4269 = vmatprep.mubr.msk.f32.mxu1 %vm5003_vm1, %v5004_v10 }
 0x146   : > { %4336 = vmatprep.mubr.msk.f32.mxu0 %vm5003_vm1, %v5004_v10 }
 0x148   : > { %4270 = vmatmul.mubr.msk.f32.gmra.mrb[34].mxu1 %vm859_vm2, %v5509_v9 }
 0x149   : > { %4337 = vmatmul.mubr.msk.f32.gmra.mrb[42].mxu0 %vm859_vm2, %v1057_v11  ;;  %4272 = vmatprep.mubr.msk.f32.mxu1 %vm5003_vm1, %v5004_v10 }
 0x14a   : > { %4339 = vmatprep.mubr.msk.f32.mxu0 %vm5003_vm1, %v5004_v10 }
 0x14c   : > { %4273 = vmatmul.mubr.msk.f32.gmra.mrb[36].mxu1 %vm859_vm2, %v5518_v12 }
 0x14d   : > { %4340 = vmatmul.mubr.msk.f32.gmra.mrb[44].mxu0 %vm859_vm2, %v1058_v13  ;;  %4275 = vmatprep.mubr.msk.f32.mxu1 %vm5003_vm1, %v5004_v10 }
 0x14e   : > { %4342 = vmatprep.mubr.msk.f32.mxu0 %vm5003_vm1, %v5004_v10 }
 0x150   : > { %4276 = vmatmul.mubr.msk.f32.gmra.mrb[38].mxu1 %vm859_vm2, %v5527_v14 }
 0x151   : > { %4343 = vmatmul.mubr.msk.f32.gmra.mrb[46].mxu0 %vm859_vm2, %v1059_v15  ;;  %4361 = vmatprep.mubr.msk.f32.mxu1 %vm5003_vm1, %v5004_v10 }
 0x154   : > { %4362 = vmatmul.mubr.msk.f32.vlgmr.msra.gmra.mrb[40].mxu1 %vm859_vm2, %v1496_v16 }
 0x155   : > { %4364 = vmatprep.mubr.msk.f32.mxu1 %vm5003_vm1, %v5004_v10 }
 0x158   : > { %4365 = vmatmul.mubr.msk.f32.gmra.mrb[42].mxu1 %vm859_vm2, %v1497_v17 }
 0x159   : > { %4367 = vmatprep.mubr.msk.f32.mxu1 %vm5003_vm1, %v5004_v10 }
 0x15c   : > { %4368 = vmatmul.mubr.msk.f32.gmra.mrb[44].mxu1 %vm859_vm2, %v1498_v18 }
 0x15d   : > { %4370 = vmatprep.mubr.msk.f32.mxu1 %vm5003_vm1, %v5004_v10 }
 0x160   : > { %4371 = vmatmul.mubr.msk.f32.gmra.mrb[46].mxu1 %vm859_vm2, %v1499_v19 }
 0x161   : > { %4373 = vmatprep.mubr.msk.f32.mxu1 %vm5003_vm1, %v5004_v10 }
 0x164   : > { %4374 = vmatmul.mubr.msk.f32.gmra.mrb[48].mxu1 %vm859_vm2, %v1500_v20 }
 0x165   : > { %4376 = vmatprep.mubr.msk.f32.mxu1 %vm5003_vm1, %v5004_v10 }
 0x168   : > { %4377 = vmatmul.mubr.msk.f32.gmra.mrb[50].mxu1 %vm859_vm2, %v1501_v21 }
 0x169   : > { %4379 = vmatprep.mubr.msk.f32.mxu1 %vm5003_vm1, %v5004_v10 }
 0x16c   : > { %4380 = vmatmul.mubr.msk.f32.gmra.mrb[52].mxu1 %vm859_vm2, %v1502_v22 }
 0x16d   : > { %4382 = vmatprep.mubr.msk.f32.mxu1 %vm5003_vm1, %v5004_v10 }
 0x170   : > { %4383 = vmatmul.mubr.msk.f32.gmra.mrb[54].mxu1 %vm859_vm2, %v1503_v23 }
 0x171   : > { %4385 = vmatprep.mubr.msk.f32.mxu1 %vm5003_vm1, %v5004_v10 }
 0x174   : > { %4386 = vmatmul.mubr.msk.f32.gmra.mrb[56].mxu1 %vm859_vm2, %v1504_v24 }
 0x175   : > { %4388 = vmatprep.mubr.msk.f32.mxu1 %vm5003_vm1, %v5004_v10 }
 0x178   : > { %4389 = vmatmul.mubr.msk.f32.gmra.mrb[58].mxu1 %vm859_vm2, %v1505_v26 }
 0x179   : > { %4391 = vmatprep.mubr.msk.f32.mxu1 %vm5003_vm1, %v5004_v10 }
 0x17c   : > { %4392 = vmatmul.mubr.msk.f32.gmra.mrb[60].mxu1 %vm859_vm2, %v1506_v27 }
 0x17d   : > { %4394 = vmatprep.mubr.msk.f32.mxu1 %vm5003_vm1, %v5004_v10 }
 0x180   : > { %4395 = vmatmul.mubr.msk.f32.gmra.mrb[62].mxu1 %vm859_vm2, %v1507_v28 }
 0x181   : > { %4397 = vmatprep.mubr.msk.f32.mxu1 %vm5003_vm1, %v5004_v10 }
 0x184   : > { %4398 = vmatmul.mubr.msk.f32.gmra.mrb[64].mxu1 %vm859_vm2, %v1508_v29 }
 0x185   : > { %4400 = vmatprep.mubr.msk.f32.mxu1 %vm5003_vm1, %v5004_v10 }
 0x188   : > { %4401 = vmatmul.mubr.msk.f32.gmra.mrb[66].mxu1 %vm859_vm2, %v1509_v30 }
 0x189   : > { %4403 = vmatprep.mubr.msk.f32.mxu1 %vm5003_vm1, %v5004_v10 }
 0x18c   : > { %4404 = vmatmul.mubr.msk.f32.gmra.mrb[68].mxu1 %vm859_vm2, %v1510_v31 }
 0x18d   : > { %4406 = vmatprep.mubr.msk.f32.mxu1 %vm5003_vm1, %v5004_v10 }
 0x190   : > { %4407 = vmatmul.mubr.msk.f32.gmra.mrb[70].mxu1 %vm859_vm2, %v1511_v32 }
 0x191   : > { %4409 = vmatprep.mubr.msk.f32.mxu1 %vm5003_vm1, %v5004_v10 }
 0x194   : > { %4410 = vmatmul.mubr.msk.f32.gmra.mrb[72].mxu1 %vm859_vm2, %v1512_v33 }
 0x1e3   : > { %v1211_v35 = vpop.f32.mrb[6].mxu1 }
 0x1e4   : > { %v1412_v36 = vpop.f32.mrb[14].mxu0  ;;  %v4229_v38 = vpop.f32.mrb[7].mxu1 }
 0x1e5   : > { %v5583_v37 = vadd.f32 %v1412_v36, %v1211_v35  ;;  %v4296_v39 = vpop.f32.mrb[15].mxu0 }
 0x1e7   : > { %v1216_v40 = vpop.f32.mrb[8].mxu1 }
 0x1e8   : > { %v1417_v41 = vpop.f32.mrb[16].mxu0  ;;  %v4232_v43 = vpop.f32.mrb[9].mxu1 }
 0x1e9   : > { %v5585_v42 = vadd.f32 %v1417_v41, %v1216_v40  ;;  %v4299_v45 = vpop.f32.mrb[17].mxu0 }
 0x1eb   : > { %v1221_v46 = vpop.f32.mrb[10].mxu1 }
 0x1ec   : > { %v1422_v47 = vpop.f32.mrb[18].mxu0  ;;  %v4235_v10 = vpop.f32.mrb[11].mxu1 }
 0x1ed   : > { %v5587_v50 = vadd.f32 %v1422_v47, %v1221_v46  ;;  %v4302_v51 = vpop.f32.mrb[19].mxu0 }
 0x1ef   : > { %v1226_v53 = vpop.f32.mrb[12].mxu1 }
 0x1f0   : > { %v1427_v54 = vpop.f32.mrb[20].mxu0  ;;  %v4238_v57 = vpop.f32.mrb[13].mxu1 }
 0x1f1   : > { %v5589_v55 = vadd.f32 %v1427_v54, %v1226_v53  ;;  %v4305_v59 = vpop.f32.mrb[21].mxu0 }
 0x1f3   : > { %v1231_v61 = vpop.f32.mrb[14].mxu1 }
 0x1f4   : > { %v1432_v63 = vpop.f32.mrb[22].mxu0  ;;  %v4241_v4 = vpop.f32.mrb[15].mxu1 }
 0x1f5   : > { %v5591_v1 = vadd.f32 %v1432_v63, %v1231_v61  ;;  %v4308_v6 = vpop.f32.mrb[23].mxu0 }
 0x1f7   : > { %v1236_v8 = vpop.f32.mrb[16].mxu1 }
 0x1f8   : > { %v1437_v11 = vpop.f32.mrb[24].mxu0  ;;  %v4244_v15 = vpop.f32.mrb[17].mxu1 }
 0x1f9   : > { %v5593_v13 = vadd.f32 %v1437_v11, %v1236_v8  ;;  %v4311_v16 = vpop.f32.mrb[25].mxu0 }
 0x1fb   : > { %v1241_v17 = vpop.f32.mrb[18].mxu1 }
 0x1fc   : > { %v1442_v18 = vpop.f32.mrb[26].mxu0  ;;  %v4247_v20 = vpop.f32.mrb[19].mxu1 }
 0x1fd   : > { %v5595_v19 = vadd.f32 %v1442_v18, %v1241_v17  ;;  %v4314_v21 = vpop.f32.mrb[27].mxu0 }
 0x1ff   : > { %v1246_v22 = vpop.f32.mrb[20].mxu1 }
 0x200   : > { %v1447_v23 = vpop.f32.mrb[28].mxu0  ;;  %v4250_v26 = vpop.f32.mrb[21].mxu1 }
 0x201   : > { %v5597_v24 = vadd.f32 %v1447_v23, %v1246_v22  ;;  %v4317_v27 = vpop.f32.mrb[29].mxu0 }
 0x203   : > { %v1251_v28 = vpop.f32.mrb[22].mxu1 }
 0x204   : > { %v1452_v29 = vpop.f32.mrb[30].mxu0  ;;  %v4253_v31 = vpop.f32.mrb[23].mxu1 }
 0x205   : > { %v5599_v30 = vadd.f32 %v1452_v29, %v1251_v28  ;;  %v4320_v32 = vpop.f32.mrb[31].mxu0 }
 0x207   : > { %v1256_v33 = vpop.f32.mrb[24].mxu1 }
 0x208   : > { %v1457_v35 = vpop.f32.mrb[32].mxu0  ;;  %v4256_v38 = vpop.f32.mrb[25].mxu1 }
 0x209   : > { %v5601_v36 = vadd.f32 %v1457_v35, %v1256_v33  ;;  %v4323_v39 = vpop.f32.mrb[33].mxu0 }
 0x20b   : > { %v1261_v40 = vpop.f32.mrb[26].mxu1 }
 0x20c   : > { %v1462_v41 = vpop.f32.mrb[34].mxu0  ;;  %v4259_v45 = vpop.f32.mrb[27].mxu1 }
 0x20d   : > { %v5603_v43 = vadd.f32 %v1462_v41, %v1261_v40  ;;  %v4326_v46 = vpop.f32.mrb[35].mxu0  ;;  %v5620_v40 = vld [vmem:[%s6710_s6] ss:$0 sm:$0xff] }
 0x20f   : > { %v1266_v47 = vpop.f32.mrb[28].mxu1 }
 0x210   : > { %v1467_v10 = vpop.f32.mrb[36].mxu0  ;;  %v4262_v53 = vpop.f32.mrb[29].mxu1 }
 0x211   : > { %v5605_v51 = vadd.f32 %v1467_v10, %v1266_v47  ;;  %v4329_v54 = vpop.f32.mrb[37].mxu0 }
 0x213   : > { %v1271_v57 = vpop.f32.mrb[30].mxu1 }
 0x214   : > { %v1472_v59 = vpop.f32.mrb[38].mxu0  ;;  %v4265_v63 = vpop.f32.mrb[31].mxu1 }
 0x215   : > { %v5607_v61 = vadd.f32 %v1472_v59, %v1271_v57  ;;  %v4332_v4 = vpop.f32.mrb[39].mxu0 }
 0x217   : > { %v1276_v6 = vpop.f32.mrb[32].mxu1 }
 0x218   : > { %v1477_v8 = vpop.f32.mrb[40].mxu0  ;;  %v4268_v15 = vpop.f32.mrb[33].mxu1 }
 0x219   : > { %v5609_v11 = vadd.f32 %v1477_v8, %v1276_v6  ;;  %v4335_v16 = vpop.f32.mrb[41].mxu0 }
 0x21b   : > { %v1281_v17 = vpop.f32.mrb[34].mxu1 }
 0x21c   : > { %v1482_v18 = vpop.f32.mrb[42].mxu0  ;;  %v4271_v21 = vpop.f32.mrb[35].mxu1 }
 0x21d   : > { %v5611_v20 = vadd.f32 %v1482_v18, %v1281_v17  ;;  %v4338_v22 = vpop.f32.mrb[43].mxu0 }
 0x21f   : > { %v1286_v23 = vpop.f32.mrb[36].mxu1 }
 0x220   : > { %v1487_v26 = vpop.f32.mrb[44].mxu0  ;;  %v4274_v28 = vpop.f32.mrb[37].mxu1 }
 0x221   : > { %v5613_v27 = vadd.f32 %v1487_v26, %v1286_v23  ;;  %v4341_v29 = vpop.f32.mrb[45].mxu0 }
 0x223   : > { %v1291_v31 = vpop.f32.mrb[38].mxu1 }
 0x224   : > { %v1492_v32 = vpop.f32.mrb[46].mxu0  ;;  %v4277_v35 = vpop.f32.mrb[39].mxu1 }
 0x225   : > { %v5615_v33 = vadd.f32 %v1492_v32, %v1291_v31  ;;  %v4344_v38 = vpop.f32.mrb[47].mxu0 }
 0x227   : > { %v1639_v39 = vpop.f32.mrb[40].mxu1 }
 0x228   : > { %v1723_v41 = vadd.f32 %v1639_v39, %v5583_v37  ;;  %v4363_v45 = vpop.f32.mrb[41].mxu1 }
 0x22a   : > { %v1747_v46 = vadd.f32 %v5620_v40, %v1723_v41 }
 0x22b   : > { %v1644_v47 = vpop.f32.mrb[42].mxu1 }
 0x22c   : > { %v1724_v10 = vadd.f32 %v1644_v47, %v5585_v42  ;;  %v4366_v53 = vpop.f32.mrb[43].mxu1  ;;  %v5626_v54 = vadd.f32 %v1747_v46, %v5353_v25 }
 0x22e   : > { %v1748_v57 = vadd.f32 %v5620_v40, %v1724_v10  ;;  %v1781_v59 = vsel %vm859_vm2, %v5626_v54, 0.0  ;;  %v1850_v63 = vmul.f32 %v5626_v54, %v5626_v54 }
 0x22f   : > { %v1649_v4 = vpop.f32.mrb[44].mxu1  ;;  %1782 = vadd.xlane.f32.xlu0 %v1781_v59 }
 0x230   : > { %v5634_v37 = vadd.f32 %v1748_v57, %v5373_v34  ;;  %v1725_v6 = vadd.f32 %v1649_v4, %v5587_v50  ;;  %v4369_v42 = vpop.f32.mrb[45].mxu1  ;;  %v1867_v8 = vsel %vm859_vm2, %v1850_v63, 0.0 }
 0x231   : > { %1868 = vadd.xlane.f32.xlu1 %v1867_v8 }
 0x232   : > { %v1749_v25 = vadd.f32 %v5620_v40, %v1725_v6  ;;  %v1784_v15 = vsel %vm859_vm2, %v5634_v37, 0.0  ;;  %v1851_v16 = vmul.f32 %v5634_v37, %v5634_v37 }
 0x233   : > { %v1654_v17 = vpop.f32.mrb[46].mxu1  ;;  %1785 = vadd.xlane.f32.xlu0 %v1784_v15 }
 0x234   : > { %v5644_v18 = vadd.f32 %v1749_v25, %v5393_v44  ;;  %v1726_v34 = vadd.f32 %v1654_v17, %v5589_v55  ;;  %v4372_v50 = vpop.f32.mrb[47].mxu1  ;;  %v1870_v22 = vsel %vm859_vm2, %v1851_v16, 0.0 }
 0x236   : > { %v1750_v21 = vadd.f32 %v5620_v40, %v1726_v34  ;;  %v1787_v23 = vsel %vm859_vm2, %v5644_v18, 0.0  ;;  %v1852_v26 = vmul.f32 %v5644_v18, %v5644_v18 }
 0x237   : > { %v1659_v28 = vpop.f32.mrb[48].mxu1  ;;  %1871 = vadd.xlane.f32.xlu0 %v1870_v22  ;;  %1788 = vadd.xlane.f32.xlu1 %v1787_v23 }
 0x238   : > { %v5654_v29 = vadd.f32 %v1750_v21, %v5409_v52  ;;  %v1727_v44 = vadd.f32 %v1659_v28, %v5591_v1  ;;  %v4375_v55 = vpop.f32.mrb[49].mxu1  ;;  %v1873_v32 = vsel %vm859_vm2, %v1852_v26, 0.0 }
 0x23a   : > { %v1751_v31 = vadd.f32 %v5620_v40, %v1727_v44  ;;  %v1790_v35 = vsel %vm859_vm2, %v5654_v29, 0.0  ;;  %v1853_v38 = vmul.f32 %v5654_v29, %v5654_v29 }
 0x23b   : > { %v1664_v39 = vpop.f32.mrb[50].mxu1  ;;  %1874 = vadd.xlane.f32.xlu1 %v1873_v32  ;;  %1791 = vadd.xlane.f32.xlu0 %v1790_v35 }
 0x23c   : > { %v5664_v41 = vadd.f32 %v1751_v31, %v5419_v48  ;;  %v1728_v52 = vadd.f32 %v1664_v39, %v5593_v13  ;;  %v4378_v1 = vpop.f32.mrb[51].mxu1  ;;  %v1876_v46 = vsel %vm859_vm2, %v1853_v38, 0.0 }
 0x23e   : > { %v1752_v45 = vadd.f32 %v5620_v40, %v1728_v52  ;;  %v1793_v47 = vsel %vm859_vm2, %v5664_v41, 0.0  ;;  %v1854_v10 = vmul.f32 %v5664_v41, %v5664_v41 }
 0x23f   : > { %v1669_v53 = vpop.f32.mrb[52].mxu1  ;;  %1877 = vadd.xlane.f32.xlu0 %v1876_v46  ;;  %1794 = vadd.xlane.f32.xlu1 %v1793_v47 }
 0x240   : > { %v5674_v57 = vadd.f32 %v1752_v45, %v5428_v3  ;;  %v1729_v48 = vadd.f32 %v1669_v53, %v5595_v19  ;;  %v4381_v13 = vpop.f32.mrb[53].mxu1  ;;  %v1879_v63 = vsel %vm859_vm2, %v1854_v10, 0.0 }
 0x242   : > { %v1753_v59 = vadd.f32 %v5620_v40, %v1729_v48  ;;  %v1796_v4 = vsel %vm859_vm2, %v5674_v57, 0.0  ;;  %v1855_v6 = vmul.f32 %v5674_v57, %v5674_v57 }
 0x243   : > { %v1674_v42 = vpop.f32.mrb[54].mxu1  ;;  %1880 = vadd.xlane.f32.xlu1 %v1879_v63  ;;  %1797 = vadd.xlane.f32.xlu0 %v1796_v4 }
 0x244   : > { %v5684_v8 = vadd.f32 %v1753_v59, %v5437_v56  ;;  %v1730_v3 = vadd.f32 %v1674_v42, %v5597_v24  ;;  %v4384_v19 = vpop.f32.mrb[55].mxu1  ;;  %v1882_v15 = vsel %vm859_vm2, %v1855_v6, 0.0 }
 0x246   : > { %v1754_v25 = vadd.f32 %v5620_v40, %v1730_v3  ;;  %v1799_v16 = vsel %vm859_vm2, %v5684_v8, 0.0  ;;  %v1856_v17 = vmul.f32 %v5684_v8, %v5684_v8 }
 0x247   : > { %v1679_v34 = vpop.f32.mrb[56].mxu1  ;;  %1883 = vadd.xlane.f32.xlu0 %v1882_v15  ;;  %1800 = vadd.xlane.f32.xlu1 %v1799_v16 }
 0x248   : > { %v5694_v50 = vadd.f32 %v1754_v25, %v5446_v58  ;;  %v1731_v56 = vadd.f32 %v1679_v34, %v5599_v30  ;;  %v4387_v24 = vpop.f32.mrb[57].mxu1  ;;  %v1885_v22 = vsel %vm859_vm2, %v1856_v17, 0.0 }
 0x24a   : > { %v1755_v21 = vadd.f32 %v5620_v40, %v1731_v56  ;;  %v1802_v23 = vsel %vm859_vm2, %v5694_v50, 0.0  ;;  %v1857_v26 = vmul.f32 %v5694_v50, %v5694_v50 }
 0x24b   : > { %v1684_v28 = vpop.f32.mrb[58].mxu1  ;;  %1886 = vadd.xlane.f32.xlu1 %v1885_v22  ;;  %1803 = vadd.xlane.f32.xlu0 %v1802_v23 }
 0x24c   : > { %v5704_v44 = vadd.f32 %v1755_v21, %v5455_v60  ;;  %v1732_v58 = vadd.f32 %v1684_v28, %v5601_v36  ;;  %v4390_v30 = vpop.f32.mrb[59].mxu1  ;;  %v1888_v31 = vsel %vm859_vm2, %v1857_v26, 0.0 }
 0x24e   : > { %v1756_v55 = vadd.f32 %v5620_v40, %v1732_v58  ;;  %v1805_v32 = vsel %vm859_vm2, %v5704_v44, 0.0  ;;  %v1858_v35 = vmul.f32 %v5704_v44, %v5704_v44 }
 0x24f   : > { %v1689_v38 = vpop.f32.mrb[60].mxu1  ;;  %1889 = vadd.xlane.f32.xlu0 %v1888_v31  ;;  %1806 = vadd.xlane.f32.xlu1 %v1805_v32 }
 0x250   : > { %v5714_v39 = vadd.f32 %v1756_v55, %v5464_v62  ;;  %v1733_v60 = vadd.f32 %v1689_v38, %v5603_v43  ;;  %v4393_v36 = vpop.f32.mrb[61].mxu1  ;;  %v1891_v1 = vsel %vm859_vm2, %v1858_v35, 0.0 }
 0x251   : > { %v3882_v36 = vld [vmem:[%s6713_s9 + $0x40] sm:$0xff] }
 0x252   : > { %v1757_v52 = vadd.f32 %v5620_v40, %v1733_v60  ;;  %v1808_v45 = vsel %vm859_vm2, %v5714_v39, 0.0  ;;  %v1859_v46 = vmul.f32 %v5714_v39, %v5714_v39 }
 0x253   : > { %v1694_v47 = vpop.f32.mrb[62].mxu1  ;;  %1892 = vadd.xlane.f32.xlu1 %v1891_v1  ;;  %1809 = vadd.xlane.f32.xlu0 %v1808_v45 }
 0x254   : > { %v5724_v10 = vadd.f32 %v1757_v52, %v5473_v0  ;;  %v1734_v62 = vadd.f32 %v1694_v47, %v5605_v51  ;;  %v4396_v43 = vpop.f32.mrb[63].mxu1  ;;  %v1894_v48 = vsel %vm859_vm2, %v1859_v46, 0.0  ;;  %v3883_v52 = vld [vmem:[%s6713_s9 + $0x48] sm:$0xff] }
 0x255   : > { %v4610_v1 = vpack.c.bf16 %v3883_v52, %v3882_v36 }
 0x256   : > { %v1758_v53 = vadd.f32 %v5620_v40, %v1734_v62  ;;  %v1811_v13 = vsel %vm859_vm2, %v5724_v10, 0.0  ;;  %v1860_v59 = vmul.f32 %v5724_v10, %v5724_v10  ;;  %v3884_v62 = vld [vmem:[%s6713_s9 + $0x50] sm:$0xff] }
 0x257   : > { %v1699_v63 = vpop.f32.mrb[64].mxu1  ;;  %1895 = vadd.xlane.f32.xlu0 %v1894_v48  ;;  %1812 = vadd.xlane.f32.xlu1 %v1811_v13  ;;  %v3886_v13 = vld [vmem:[%s6713_s9 + $0x60] sm:$0xff] }
 0x258   : > { %v5734_v4 = vadd.f32 %v1758_v53, %v5482_v2  ;;  %v1735_v0 = vadd.f32 %v1699_v63, %v5607_v61  ;;  %v4399_v51 = vpop.f32.mrb[65].mxu1  ;;  %v1897_v42 = vsel %vm859_vm2, %v1860_v59, 0.0  ;;  %4611 = vmatprep.subr.bf16.mxu0 %v4610_v1  ;;  %v3887_v59 = vld [vmem:[%s6713_s9 + $0x68] sm:$0xff] }
 0x259   : > { %4613 = vmatpush3.bf16.msra.mxu0 %v4610_v1  ;;  %v3888_v51 = vld [vmem:[%s6713_s9 + $0x70] sm:$0xff] }
 0x25a   : > { %v1759_v6 = vadd.f32 %v5620_v40, %v1735_v0  ;;  %v1814_v3 = vsel %vm859_vm2, %v5734_v4, 0.0  ;;  %v1861_v19 = vmul.f32 %v5734_v4, %v5734_v4  ;;  %v4618_v0 = vpack.c.bf16 %v3887_v59, %v3886_v13  ;;  %v5847_v13 = vld [vmem:[%s6712_s8] ss:$0 sm:$0xff] }
 0x25b   : > { %v1704_v25 = vpop.f32.mrb[66].mxu1  ;;  %1898 = vadd.xlane.f32.xlu1 %v1897_v42  ;;  %1815 = vadd.xlane.f32.xlu0 %v1814_v3  ;;  %v2340_v3 = vld [vmem:[%s6713_s9] sm:$0xff] }
 0x25c   : > { %v5744_v15 = vadd.f32 %v1759_v6, %v5491_v5  ;;  %v1736_v2 = vadd.f32 %v1704_v25, %v5609_v11  ;;  %v4402_v61 = vpop.f32.mrb[67].mxu1  ;;  %v1900_v17 = vsel %vm859_vm2, %v1861_v19, 0.0  ;;  %v3889_v6 = vld [vmem:[%s6713_s9 + $0x78] sm:$0xff]  ;;  %v2341_v19 = vld [vmem:[%s6713_s9 + $0x8] sm:$0xff] }
 0x25d   : > { %v4622_v42 = vpack.c.bf16 %v3889_v6, %v3888_v51  ;;  %v5822_v25 = vpack.c.bf16 %v2341_v19, %v2340_v3  ;;  %v2170_v6 = vadd.s32 8, %v5315_v49 }
 0x25e   : > { %v1760_v16 = vadd.f32 %v5620_v40, %v1736_v2  ;;  %v1817_v34 = vsel %vm859_vm2, %v5744_v15, 0.0  ;;  %v1862_v56 = vmul.f32 %v5744_v15, %v5744_v15 }
 0x25f   : > { %v1709_v24 = vpop.f32.mrb[68].mxu1  ;;  %1901 = vadd.xlane.f32.xlu0 %v1900_v17  ;;  %1818 = vadd.xlane.f32.xlu1 %v1817_v34 }
 0x260   : > { %v5754_v21 = vadd.f32 %v1760_v16, %v5500_v7  ;;  %v1737_v5 = vadd.f32 %v1709_v24, %v5611_v20  ;;  %v4405_v11 = vpop.f32.mrb[69].mxu1  ;;  %v1903_v23 = vsel %vm859_vm2, %v1862_v56, 0.0 }
 0x262   : > { %v1761_v22 = vadd.f32 %v5620_v40, %v1737_v5  ;;  %v1820_v26 = vsel %vm859_vm2, %v5754_v21, 0.0  ;;  %v1863_v28 = vmul.f32 %v5754_v21, %v5754_v21 }
 0x263   : > { %v1714_v58 = vpop.f32.mrb[70].mxu1  ;;  %1904 = vadd.xlane.f32.xlu1 %v1903_v23  ;;  %1821 = vadd.xlane.f32.xlu0 %v1820_v26 }
 0x264   : > { %v5764_v30 = vadd.f32 %v1761_v22, %v5509_v9  ;;  %v1738_v7 = vadd.f32 %v1714_v58, %v5613_v27  ;;  %v4408_v20 = vpop.f32.mrb[71].mxu1  ;;  %v1906_v31 = vsel %vm859_vm2, %v1863_v28, 0.0 }
 0x266   : > { %v1762_v55 = vadd.f32 %v5620_v40, %v1738_v7  ;;  %v1823_v32 = vsel %vm859_vm2, %v5764_v30, 0.0  ;;  %v1864_v35 = vmul.f32 %v5764_v30, %v5764_v30 }
 0x267   : > { %v1719_v38 = vpop.f32.mrb[72].mxu1  ;;  %1907 = vadd.xlane.f32.xlu0 %v1906_v31  ;;  %1824 = vadd.xlane.f32.xlu1 %v1823_v32 }
 0x268   : > { %v5774_v60 = vadd.f32 %v1762_v55, %v5518_v12  ;;  %v1739_v9 = vadd.f32 %v1719_v38, %v5615_v33  ;;  %v4411_v27 = vpop.f32.mrb[73].mxu1  ;;  %v1909_v46 = vsel %vm859_vm2, %v1864_v35, 0.0 }
 0x26a   : > { %v1763_v45 = vadd.f32 %v5620_v40, %v1739_v9  ;;  %v1826_v12 = vsel %vm859_vm2, %v5774_v60, 0.0  ;;  %v1865_v33 = vmul.f32 %v5774_v60, %v5774_v60  ;;  %v3885_v40 = vld [vmem:[%s6713_s9 + $0x58] sm:$0xff] }
 0x26b   : > { %1910 = vadd.xlane.f32.xlu1 %v1909_v46  ;;  %1827 = vadd.xlane.f32.xlu0 %v1826_v12  ;;  %v4614_v43 = vpack.c.bf16 %v3885_v40, %v3884_v62  ;;  %v5840_v62 = vld [vmem:[%s6711_s7] ss:$0 sm:$0xff] }
 0x26c   : > { %v5790_v47 = vadd.f32 %v1763_v45, %v5527_v14  ;;  %v1912_v53 = vsel %vm859_vm2, %v1865_v33, 0.0 }
 0x26d   : > { %4615 = vmatprep.subr.bf16.mxu0 %v4614_v43 }
 0x26e   : > { %v1830_v48 = vsel %vm1829_vm5, %v5790_v47, 0.0  ;;  %v1866_v14 = vmul.f32 %v5790_v47, %v5790_v47  ;;  %4617 = vmatpush3.bf16.msra.mxu0 %v4614_v43  ;;  %v5842_v43 = vstv %s3881_s0  ;;  %s3966_s0 = sshll.u32 %s4988_s22, 1 }
 0x26f   : > { %1913 = vadd.xlane.f32.xlu0 %v1912_v53  ;;  %1831 = vadd.xlane.f32.xlu1 %v1830_v48  ;;  %v5857_v3 = vadd.s32 %v5842_v43, %v5315_v49  ;;  %s3647_s24 = sadd.s32 %s4984_s21, %s3966_s0  ;;  %s5005_s21 = smov [#allocation4]  }
 0x270   : > { %v1915_v63 = vsel %vm1829_vm5, %v1866_v14, 0.0  ;;  %4619 = vmatprep.subr.bf16.mxu0 %v4618_v0  ;;  %s3967_s26 = sshll.u32 %s3647_s24, 4  ;;  %s4910_s22 = sshll.u32 %s5005_s21, 4  ;;  %s4911_s22 = int_to_ptr.vmem [resolvable:$false] %s4910_s22 }
 0x271   : > { %vm2205_vm6 = vcmp.ge.s32.totalorder %v5857_v3, 0  ;;  %vm2222_vm7 = vcmp.lt.s32.totalorder %v5857_v3, 256  ;;  %s6653_s30 = scalar_lea.hbm %s6771_s29, %s3967_s26  ;;  %s4912_s0 = scalar_lea.vmem %s4911_s22, 32 }
 0x272   : > { %4621 = vmatpush3.bf16.msra.mxu0 %v4618_v0  ;;  %vm5942_vm12 = vmand %vm2205_vm6, %vm2222_vm7  ;;  %p4913_p7 = scmp.lt.s32.totalorder %s6648_s14, %s4911_s22 }
 0x273   : > { %1916 = vadd.xlane.f32.xlu1 %v1915_v63  ;;  %4623 = vmatprep.subr.bf16.mxu0 %v4622_v42 }
 0x276   : > { %4625 = vmatpush3.bf16.msra.mxu0 %v4622_v42 }
 0x277   : > { %4627 = vmatprep.subr.bf16.mxu0 %v5822_v25 }
 0x2bc   : > { %v1783_v2 = vpop.xlane.xlu0 %1782 }
 0x2bd   : > { %v1833_v61 = vmul.f32 0.015625, %v1783_v2 }
 0x2be   : > { %v1869_v16 = vpop.xlane.xlu1 %1868 }
 0x2bf   : > { %v1935_v17 = vmul.f32 %v1833_v61, %v1833_v61  ;;  %v1918_v34 = vmul.f32 0.015625, %v1869_v16  ;;  %v1969_v12 = vsub.f32 %v5626_v54, %v1833_v61  ;;  %v2171_v61 = vadd.s32 16, %v5315_v49 }
 0x2c0   : > { %v1786_v56 = vpop.xlane.xlu0 %1785 }
 0x2c1   : > { %v1952_v24 = vsub.f32 %v1918_v34, %v1935_v17  ;;  %v1834_v5 = vmul.f32 0.015625, %v1786_v56 }
 0x2c3   : > { %v1986_v11 = vadd.f32 1e-05, %v1952_v24  ;;  %v1936_v26 = vmul.f32 %v1834_v5, %v1834_v5  ;;  %v1970_v2 = vsub.f32 %v5634_v37, %v1834_v5  ;;  %v5872_v37 = vadd.s32 %v5842_v43, %v2170_v6 }
 0x2c4   : > { %v1872_v22 = vpop.xlane.xlu0 %1871  ;;  %v1789_v23 = vpop.xlane.xlu1 %1788 }
 0x2c5   : > { %4774 = vrsqrt.f32 %v1986_v11  ;;  %v1919_v28 = vmul.f32 0.015625, %v1872_v22  ;;  %v5825_v58 = vmul.f32 0.015625, %v1789_v23  ;;  %vm2206_vm8 = vcmp.ge.s32.totalorder %v5872_v37, 0 }
 0x2c6   : > { %vm2223_vm9 = vcmp.lt.s32.totalorder %v5872_v37, 256 }
 0x2c7   : > { %v1953_v7 = vsub.f32 %v1919_v28, %v1936_v26  ;;  %v1937_v32 = vmul.f32 %v5825_v58, %v5825_v58  ;;  %v2172_v28 = vadd.s32 24, %v5315_v49  ;;  %vm5978_vm15 = vmand %vm2206_vm8, %vm2223_vm9 }
 0x2c8   : > { %v1875_v20 = vpop.xlane.xlu1 %1874  ;;  %v1792_v55 = vpop.xlane.xlu0 %1791 }
 0x2c9   : > { %v1987_v31 = vadd.f32 1e-05, %v1953_v7  ;;  %v1920_v35 = vmul.f32 0.015625, %v1875_v20  ;;  %v5829_v38 = vmul.f32 0.015625, %v1792_v55  ;;  %v2173_v7 = vadd.s32 32, %v5315_v49 }
 0x2ca   : > { %v1971_v55 = vsub.f32 %v5644_v18, %v5825_v58  ;;  %v5890_v58 = vadd.s32 %v5842_v43, %v2172_v28 }
 0x2cb   : > { %4776 = vrsqrt.f32 %v1987_v31  ;;  %v1954_v9 = vsub.f32 %v1920_v35, %v1937_v32  ;;  %v1938_v1 = vmul.f32 %v5829_v38, %v5829_v38  ;;  %v5878_v31 = vadd.s32 %v5842_v43, %v2171_v61 }
 0x2cc   : > { %v1878_v27 = vpop.xlane.xlu0 %1877  ;;  %v1795_v36 = vpop.xlane.xlu1 %1794  ;;  %vm2208_vm13 = vcmp.ge.s32.totalorder %v5890_v58, 0  ;;  %vm2225_vm14 = vcmp.lt.s32.totalorder %v5890_v58, 256 }
 0x2cd   : > { %v1988_v52 = vadd.f32 1e-05, %v1954_v9  ;;  %v1921_v45 = vmul.f32 0.015625, %v1878_v27  ;;  %v5834_v46 = vmul.f32 0.015625, %v1795_v36  ;;  %vm2207_vm10 = vcmp.ge.s32.totalorder %v5878_v31, 0  ;;  %vm6043_vm7 = vmand %vm2208_vm13, %vm2225_vm14 }
 0x2ce   : > { %vm2224_vm11 = vcmp.lt.s32.totalorder %v5878_v31, 256 }
 0x2cf   : > { %v4775_v33 = vpop.eup %4774  ;;  %4778 = vrsqrt.f32 %v1988_v52  ;;  %v1955_v40 = vsub.f32 %v1921_v45, %v1938_v1  ;;  %v1939_v54 = vmul.f32 %v5834_v46, %v5834_v46  ;;  %vm6010_vm3 = vmand %vm2207_vm10, %vm2224_vm11 }
 0x2d0   : > { %v2020_v53 = vmul.f32 %v4775_v33, %v1969_v12  ;;  %v1881_v48 = vpop.xlane.xlu1 %1880  ;;  %v1798_v14 = vpop.xlane.xlu0 %1797  ;;  %v5893_v12 = vadd.s32 %v5842_v43, %v2173_v7  ;;  %v2174_v33 = vadd.s32 40, %v5315_v49 }
 0x2d1   : > { %v1989_v59 = vadd.f32 1e-05, %v1955_v40  ;;  %v1922_v63 = vmul.f32 0.015625, %v1881_v48  ;;  %v5851_v0 = vmul.f32 0.015625, %v1798_v14  ;;  %v2175_v40 = vadd.s32 48, %v5315_v49 }
 0x2d2   : > { %v2044_v51 = vmul.f32 %v5840_v62, %v2020_v53  ;;  %vm2209_vm0 = vcmp.ge.s32.totalorder %v5893_v12, 0  ;;  %vm2226_vm1 = vcmp.lt.s32.totalorder %v5893_v12, 256 }
 0x2d3   : > { %4780 = vrsqrt.f32 %v1989_v59  ;;  %v1956_v42 = vsub.f32 %v1922_v63, %v1939_v54  ;;  %v1940_v24 = vmul.f32 %v5851_v0, %v5851_v0  ;;  %v1972_v59 = vsub.f32 %v5654_v29, %v5829_v38  ;;  %vm6076_vm10 = vmand %vm2209_vm0, %vm2226_vm1 }
 0x2d4   : > { %v5860_v19 = vadd.f32 %v5847_v13, %v2044_v51  ;;  %v1884_v16 = vpop.xlane.xlu0 %1883  ;;  %v1801_v17 = vpop.xlane.xlu1 %1800  ;;  %v2176_v54 = vadd.s32 56, %v5315_v49  ;;  %v5913_v29 = vadd.s32 %v5842_v43, %v2174_v33  ;;  %v5916_v38 = vadd.s32 %v5842_v43, %v2175_v40 }
 0x2d5   : > { %v4777_v34 = vpop.eup %4776  ;;  %v1990_v56 = vadd.f32 1e-05, %v1956_v42  ;;  %v1923_v11 = vmul.f32 0.015625, %v1884_v16  ;;  %v5866_v22 = vmul.f32 0.015625, %v1801_v17 }
 0x2d6   : > { %v2102_v23 = vmul.f32 0.70710677, %v5860_v19  ;;  %v2021_v26 = vmul.f32 %v4777_v34, %v1970_v2  ;;  %v5923_v28 = vadd.s32 %v5842_v43, %v2176_v54  ;;  %vm2210_vm4 = vcmp.ge.s32.totalorder %v5913_v29, 0 }
 0x2d7   : > { %4782 = vrsqrt.f32 %v1990_v56  ;;  %v1957_v5 = vsub.f32 %v1923_v11, %v1940_v24  ;;  %v1941_v36 = vmul.f32 %v5866_v22, %v5866_v22  ;;  %v2177_v56 = vadd.s32 64, %v5315_v49 }
 0x2d8   : > { %4784 = verf.f32 %v2102_v23  ;;  %v2045_v20 = vmul.f32 %v5840_v62, %v2021_v26  ;;  %v1887_v32 = vpop.xlane.xlu1 %1886  ;;  %v1804_v35 = vpop.xlane.xlu0 %1803  ;;  %v1973_v26 = vsub.f32 %v5664_v41, %v5834_v46  ;;  %v2085_v46 = vmul.f32 0.5, %v5860_v19 }
 0x2d9   : > { %v4779_v9 = vpop.eup %4778  ;;  %v1991_v27 = vadd.f32 1e-05, %v1957_v5  ;;  %v1924_v52 = vmul.f32 0.015625, %v1887_v32  ;;  %v5884_v1 = vmul.f32 0.015625, %v1804_v35  ;;  %v5933_v41 = vadd.s32 %v5842_v43, %v2177_v56 }
 0x2da   : > { %v5887_v45 = vadd.f32 %v5847_v13, %v2045_v20  ;;  %v2022_v18 = vmul.f32 %v4779_v9, %v1971_v55  ;;  %v1974_v19 = vsub.f32 %v5674_v57, %v5851_v0  ;;  %v1975_v0 = vsub.f32 %v5684_v8, %v5866_v22 }
 0x2db   : > { %4786 = vrsqrt.f32 %v1991_v27  ;;  %v1958_v53 = vsub.f32 %v1924_v52, %v1941_v36  ;;  %v1942_v2 = vmul.f32 %v5884_v1, %v5884_v1  ;;  %v1976_v37 = vsub.f32 %v5694_v50, %v5884_v1  ;;  %v2343_v50 = vld [vmem:[%s6713_s9 + $0x18] sm:$0xff] }
 0x2dc   : > { %v2103_v48 = vmul.f32 0.70710677, %v5887_v45  ;;  %v2046_v14 = vmul.f32 %v5840_v62, %v2022_v18  ;;  %v1890_v63 = vpop.xlane.xlu0 %1889  ;;  %v1807_v51 = vpop.xlane.xlu1 %1806  ;;  %vm2227_vm6 = vcmp.lt.s32.totalorder %v5913_v29, 256  ;;  %vm2211_vm8 = vcmp.ge.s32.totalorder %v5916_v38, 0 }
 0x2dd   : > { %v4781_v6 = vpop.eup %4780  ;;  %v1992_v42 = vadd.f32 1e-05, %v1958_v53  ;;  %v1925_v61 = vmul.f32 0.015625, %v1890_v63  ;;  %v5904_v16 = vmul.f32 0.015625, %v1807_v51  ;;  %vm2228_vm9 = vcmp.lt.s32.totalorder %v5916_v38, 256  ;;  %vm6102_vm13 = vmand %vm2210_vm4, %vm2227_vm6 }
 0x2de   : > { %4788 = verf.f32 %v2103_v48  ;;  %v5907_v17 = vadd.f32 %v5847_v13, %v2046_v14  ;;  %v2023_v34 = vmul.f32 %v4781_v6, %v1972_v59  ;;  %vm2212_vm11 = vcmp.ge.s32.totalorder %v5923_v28, 0  ;;  %vm6130_vm0 = vmand %vm2211_vm8, %vm2228_vm9 }
 0x2df   : > { %4790 = vrsqrt.f32 %v1992_v42  ;;  %v1959_v24 = vsub.f32 %v1925_v61, %v1942_v2  ;;  %v1943_v32 = vmul.f32 %v5904_v16, %v5904_v16  ;;  %vm2213_vm14 = vcmp.ge.s32.totalorder %v5933_v41, 0 }
 0x2e0   : > { %v2104_v11 = vmul.f32 0.70710677, %v5907_v17  ;;  %v2047_v23 = vmul.f32 %v5840_v62, %v2023_v34  ;;  %v1893_v7 = vpop.xlane.xlu1 %1892  ;;  %v1810_v5 = vpop.xlane.xlu0 %1809  ;;  %v5958_v34 = vadd.s32 72, %v5315_v49 }
 0x2e1   : > { %v4783_v20 = vpop.eup %4782  ;;  %v1993_v55 = vadd.f32 1e-05, %v1959_v24  ;;  %v1926_v35 = vmul.f32 0.015625, %v1893_v7  ;;  %v5927_v9 = vmul.f32 0.015625, %v1810_v5 }
 0x2e2   : > { %v4785_v27 = vpop.eup %4784  ;;  %4792 = verf.f32 %v2104_v11  ;;  %v5930_v36 = vadd.f32 %v5847_v13, %v2047_v23  ;;  %v2024_v52 = vmul.f32 %v4783_v20, %v1973_v26  ;;  %v2086_v11 = vmul.f32 0.5, %v5887_v45 }
 0x2e3   : > { %v2136_v18 = vadd.f32 1.0, %v4785_v27  ;;  %4794 = vrsqrt.f32 %v1993_v55  ;;  %v1960_v33 = vsub.f32 %v1926_v35, %v1943_v32  ;;  %v1944_v14 = vmul.f32 %v5927_v9, %v5927_v9 }
 0x2e4   : > { %v2105_v53 = vmul.f32 0.70710677, %v5930_v36  ;;  %v2048_v48 = vmul.f32 %v5840_v62, %v2024_v52  ;;  %v1896_v59 = vpop.xlane.xlu0 %1895  ;;  %v1813_v54 = vpop.xlane.xlu1 %1812 }
 0x2e5   : > { %v4787_v63 = vpop.eup %4786  ;;  %v2153_v51 = vmul.f32 %v2136_v18, %v2085_v46  ;;  %v1994_v6 = vadd.f32 1e-05, %v1960_v33  ;;  %v1927_v3 = vmul.f32 0.015625, %v1896_v59  ;;  %v5952_v42 = vmul.f32 0.015625, %v1813_v54 }
 0x2e6   : > { %4796 = verf.f32 %v2105_v53  ;;  %v5955_v2 = vadd.f32 %v5847_v13, %v2048_v48  ;;  %v2025_v61 = vmul.f32 %v4787_v63, %v1974_v19  ;;  %v5986_v46 = vadd.s32 80, %v5315_v49  ;;  %v2342_v63 = vld [vmem:[%s6713_s9 + $0x10] sm:$0xff] }
 0x2e7   : > { %v2290_v57 = vsel %vm5942_vm12, %v2153_v51, 0.0  ;;  %4798 = vrsqrt.f32 %v1994_v6  ;;  %v1961_v56 = vsub.f32 %v1927_v3, %v1944_v14  ;;  %v1945_v7 = vmul.f32 %v5952_v42, %v5952_v42 }
 0x2e8   : > { %v4789_v24 = vpop.eup %4788  ;;  %2307 = vst.msk [vmem:[#allocation3] sm:$0xff] %vm859_vm2, %v2290_v57  ;;  %v2106_v23 = vmul.f32 0.70710677, %v5955_v2  ;;  %v2049_v26 = vmul.f32 %v5840_v62, %v2025_v61  ;;  %v1899_v5 = vpop.xlane.xlu1 %1898  ;;  %v2087_v53 = vmul.f32 0.5, %v5907_v17  ;;  %v2089_v61 = vmul.f32 0.5, %v5955_v2 }
 0x2e9   : > { %v1816_v20 = vpop.xlane.xlu0 %1815  ;;  %v4791_v55 = vpop.eup %4790  ;;  %v2137_v32 = vadd.f32 1.0, %v4789_v24  ;;  %v1995_v35 = vadd.f32 1e-05, %v1961_v56  ;;  %v1928_v8 = vmul.f32 0.015625, %v1899_v5  ;;  %vm2229_vm12 = vcmp.lt.s32.totalorder %v5923_v28, 256 }
 0x2ea   : > { %v5972_v22 = vmul.f32 0.015625, %v1816_v20  ;;  %4800 = verf.f32 %v2106_v23  ;;  %v5983_v27 = vadd.f32 %v5847_v13, %v2049_v26  ;;  %v2026_v52 = vmul.f32 %v4791_v55, %v1975_v0  ;;  %vm6162_vm1 = vmand %vm2212_vm11, %vm2229_vm12 }
 0x2eb   : > { %v2154_v18 = vmul.f32 %v2137_v32, %v2086_v11  ;;  %4802 = vrsqrt.f32 %v1995_v35  ;;  %v1962_v33 = vsub.f32 %v1928_v8, %v1945_v7  ;;  %v6021_v23 = vpack.c.bf16 %v2343_v50, %v2342_v63  ;;  %v2344_v35 = vld [vmem:[%s6713_s9 + $0x20] sm:$0xff]  ;;  %v2345_v8 = vld [vmem:[%s6713_s9 + $0x28] sm:$0xff] }
 0x2ec   : > { %v4793_v40 = vpop.eup %4792  ;;  %v2107_v48 = vmul.f32 0.70710677, %v5983_v27  ;;  %v2050_v19 = vmul.f32 %v5840_v62, %v2026_v52  ;;  %v1946_v14 = vmul.f32 %v5972_v22, %v5972_v22  ;;  %v1819_v54 = vpop.xlane.xlu1 %1818  ;;  %v2088_v26 = vmul.f32 0.5, %v5930_v36 }
 0x2ed   : > { %v1902_v59 = vpop.xlane.xlu0 %1901  ;;  %v4795_v1 = vpop.eup %4794  ;;  %v2291_v17 = vsel %vm5978_vm15, %v2154_v18, 0.0  ;;  %v2138_v51 = vadd.f32 1.0, %v4793_v40  ;;  %v1996_v6 = vadd.f32 1e-05, %v1962_v33  ;;  %v6017_v56 = vmul.f32 0.015625, %v1819_v54 }
 0x2ee   : > { %v1929_v3 = vmul.f32 0.015625, %v1902_v59  ;;  %2308 = vst.msk [vmem:[#allocation3 + $0x8] sm:$0xff] %vm859_vm2, %v2291_v17  ;;  %4804 = verf.f32 %v2107_v48  ;;  %v6015_v57 = vadd.f32 %v5847_v13, %v2050_v19  ;;  %v2027_v0 = vmul.f32 %v4795_v1, %v1976_v37  ;;  %v2347_v48 = vld [vmem:[%s6713_s9 + $0x38] sm:$0xff] }
 0x2ef   : > { %v2155_v24 = vmul.f32 %v2138_v51, %v2087_v53  ;;  %4806 = vrsqrt.f32 %v1996_v6  ;;  %v1977_v20 = vsub.f32 %v5704_v44, %v5904_v16  ;;  %v1947_v37 = vmul.f32 %v6017_v56, %v6017_v56  ;;  %v2346_v53 = vld [vmem:[%s6713_s9 + $0x30] sm:$0xff] }
 0x2f0   : > { %v1963_v11 = vsub.f32 %v1929_v3, %v1946_v14  ;;  %v4797_v31 = vpop.eup %4796  ;;  %v2108_v7 = vmul.f32 0.70710677, %v6015_v57  ;;  %v2051_v5 = vmul.f32 %v5840_v62, %v2027_v0  ;;  %v1905_v55 = vpop.xlane.xlu1 %1904  ;;  %v6060_v14 = vpack.c.bf16 %v2345_v8, %v2344_v35 }
 0x2f1   : > { %v1822_v32 = vpop.xlane.xlu0 %1821  ;;  %v4799_v45 = vpop.eup %4798  ;;  %v2292_v36 = vsel %vm6010_vm3, %v2155_v24, 0.0  ;;  %v2139_v52 = vadd.f32 1.0, %v4797_v31  ;;  %v1930_v40 = vmul.f32 0.015625, %v1905_v55  ;;  %v1978_v50 = vsub.f32 %v5714_v39, %v5927_v9 }
 0x2f2   : > { %v1997_v18 = vadd.f32 1e-05, %v1963_v11  ;;  %2309 = vst.msk [vmem:[#allocation3 + $0x10] sm:$0xff] %vm859_vm2, %v2292_v36  ;;  %4808 = verf.f32 %v2108_v7  ;;  %v6048_v16 = vadd.f32 %v5847_v13, %v2051_v5  ;;  %v2028_v33 = vmul.f32 %v4799_v45, %v1977_v20 }
 0x2f3   : > { %v2156_v19 = vmul.f32 %v2139_v52, %v2088_v26  ;;  %v6058_v58 = vmul.f32 0.015625, %v1822_v32  ;;  %v1964_v1 = vsub.f32 %v1930_v40, %v1947_v37  ;;  %v6069_v11 = vpack.c.bf16 %v2347_v48, %v2346_v53 }
 0x2f4   : > { %4810 = vrsqrt.f32 %v1997_v18  ;;  %v4801_v59 = vpop.eup %4800  ;;  %v2109_v54 = vmul.f32 0.70710677, %v6048_v16  ;;  %v2052_v63 = vmul.f32 %v5840_v62, %v2028_v33  ;;  %v1825_v51 = vpop.xlane.xlu1 %1824  ;;  %v1979_v35 = vsub.f32 %v5724_v10, %v5952_v42 }
 0x2f5   : > { %v1908_v17 = vpop.xlane.xlu0 %1907  ;;  %v4803_v6 = vpop.eup %4802  ;;  %v2293_v3 = vsel %vm6043_vm7, %v2156_v19, 0.0  ;;  %v2140_v0 = vadd.f32 1.0, %v4801_v59  ;;  %v2348_v24 = vld [vmem:[#allocation3 + $0x2] sm:$0xff]  ;;  %v1998_v2 = vadd.f32 1e-05, %v1964_v1  ;;  %v1948_v12 = vmul.f32 %v6058_v58, %v6058_v58 }
 0x2f6   : > { %2310 = vst.msk [vmem:[#allocation3 + $0x18] sm:$0xff] %vm859_vm2, %v2293_v3  ;;  %4812 = verf.f32 %v2109_v54  ;;  %v6081_v9 = vadd.f32 %v5847_v13, %v2052_v63  ;;  %v2029_v31 = vmul.f32 %v4803_v6, %v1978_v50  ;;  %4428 = vmatprep.mubr.msk.f32.mxu0 %vm859_vm2, %v2348_v24  ;;  %v1931_v7 = vmul.f32 0.015625, %v1908_v17 }
 0x2f7   : > { %v2157_v26 = vmul.f32 %v2140_v0, %v2089_v61  ;;  %v6088_v5 = vmul.f32 0.015625, %v1825_v51  ;;  %4814 = vrsqrt.f32 %v1998_v2  ;;  %v2090_v18 = vmul.f32 0.5, %v5983_v27 }
 0x2f8   : > { %v4805_v20 = vpop.eup %4804  ;;  %v2110_v55 = vmul.f32 0.70710677, %v6081_v9  ;;  %v2053_v32 = vmul.f32 %v5840_v62, %v2029_v31  ;;  %v1911_v8 = vpop.xlane.xlu1 %1910  ;;  %v1965_v44 = vsub.f32 %v1931_v7, %v1948_v12  ;;  %vm2230_vm15 = vcmp.lt.s32.totalorder %v5933_v41, 256 }
 0x2f9   : > { %v1828_v45 = vpop.xlane.xlu0 %1827  ;;  %v4807_v36 = vpop.eup %4806  ;;  %v2294_v52 = vsel %vm6076_vm10, %v2157_v26, 0.0  ;;  %v2141_v37 = vadd.f32 1.0, %v4805_v20  ;;  %v2349_v33 = vld [vmem:[#allocation3 + $0xa] sm:$0xff]  ;;  %v1949_v27 = vmul.f32 %v6088_v5, %v6088_v5  ;;  %v1932_v48 = vmul.f32 0.015625, %v1911_v8  ;;  %vm6192_vm3 = vmand %vm2213_vm14, %vm2230_vm15 }
 0x2fa   : > { %2311 = vst.msk [vmem:[#allocation3 + $0x20] sm:$0xff] %vm859_vm2, %v2294_v52  ;;  %4816 = verf.f32 %v2110_v55  ;;  %v6107_v42 = vadd.f32 %v5847_v13, %v2053_v32  ;;  %v2030_v40 = vmul.f32 %v4807_v36, %v1979_v35  ;;  %4429 = vmatmul.mubr.msk.f32.vlgmr.msra.gmra.mrb[48].mxu0 %vm859_vm2, %v2349_v33  ;;  %v1999_v29 = vadd.f32 1e-05, %v1965_v44 }
 0x2fb   : > { %v2158_v53 = vmul.f32 %v2141_v37, %v2090_v18  ;;  %v6114_v19 = vmul.f32 0.015625, %v1828_v45  ;;  %4629 = vmatpush3.bf16.msra.mxu0 %v5822_v25  ;;  %v2091_v54 = vmul.f32 0.5, %v6015_v57  ;;  %v1980_v1 = vsub.f32 %v5734_v4, %v5972_v22 }
 0x2fc   : > { %v4809_v59 = vpop.eup %4808  ;;  %v2111_v63 = vmul.f32 0.70710677, %v6107_v42  ;;  %v2054_v50 = vmul.f32 %v5840_v62, %v2030_v40  ;;  %v1832_v51 = vpop.xlane.xlu1 %1831  ;;  %4631 = vmatprep.subr.bf16.mxu0 %v6021_v23  ;;  %4818 = vrsqrt.f32 %v1999_v29  ;;  %v1966_v25 = vsub.f32 %v1932_v48, %v1949_v27 }
 0x2fd   : > { %v1914_v17 = vpop.xlane.xlu0 %1913  ;;  %v2295_v3 = vsel %vm6102_vm13, %v2158_v53, 0.0  ;;  %v2142_v61 = vadd.f32 1.0, %v4809_v59  ;;  %v2350_v0 = vld [vmem:[#allocation3 + $0x12] sm:$0xff]  ;;  %v1981_v24 = vsub.f32 %v5744_v15, %v6017_v56  ;;  %v1950_v2 = vmul.f32 %v6114_v19, %v6114_v19 }
 0x2fe   : > { %v4811_v6 = vpop.eup %4810  ;;  %2312 = vst.msk [vmem:[#allocation3 + $0x28] sm:$0xff] %vm859_vm2, %v2295_v3  ;;  %4820 = verf.f32 %v2111_v63  ;;  %v6135_v22 = vadd.f32 %v5847_v13, %v2054_v50  ;;  %4431 = vmatprep.mubr.msk.f32.mxu0 %vm859_vm2, %v2350_v0  ;;  %v2000_v31 = vadd.f32 1e-05, %v1966_v25  ;;  %v1933_v38 = vmul.f32 0.015625, %v1914_v17 }
 0x2ff   : > { %v2031_v57 = vmul.f32 %v4811_v6, %v1980_v1  ;;  %v2159_v39 = vmul.f32 %v2142_v61, %v2091_v54  ;;  %4633 = vmatpush3.bf16.msra.mxu0 %v6021_v23  ;;  %v2092_v12 = vmul.f32 0.5, %v6048_v16  ;;  %v6146_v55 = vmul.f32 0.015625, %v1832_v51  ;;  %v3922_v23 = vld [vmem:[%s6713_s9 + $0x80] sm:$0xff]  ;;  %v3923_v16 = vld [vmem:[%s6713_s9 + $0x88] sm:$0xff] }
 0x300   : > { %v4813_v26 = vpop.eup %4812  ;;  %v2112_v7 = vmul.f32 0.70710677, %v6135_v22  ;;  %v1917_v15 = vpop.xlane.xlu1 %1916  ;;  %4635 = vmatprep.subr.bf16.mxu0 %v6060_v14  ;;  %4822 = vrsqrt.f32 %v2000_v31  ;;  %v1967_v35 = vsub.f32 %v1933_v38, %v1950_v2  ;;  %v2197_v52 = vadd.s32 %v5842_v43, %v5958_v34 }
 0x301   : > { %v2055_v20 = vmul.f32 %v5840_v62, %v2031_v57  ;;  %v2296_v56 = vsel %vm6130_vm0, %v2159_v39, 0.0  ;;  %v2143_v32 = vadd.f32 1.0, %v4813_v26  ;;  %v2351_v8 = vld [vmem:[#allocation3 + $0x1a] sm:$0xff]  ;;  %v4815_v45 = vpop.eup %4814  ;;  %v6170_v18 = vadd.s32 %v5842_v43, %v5986_v46 }
 0x302   : > { %2313 = vst.msk [vmem:[#allocation3 + $0x30] sm:$0xff] %vm859_vm2, %v2296_v56  ;;  %4824 = verf.f32 %v2112_v7  ;;  %4432 = vmatmul.mubr.msk.f32.gmra.mrb[50].mxu0 %vm859_vm2, %v2351_v8  ;;  %v2032_v33 = vmul.f32 %v4815_v45, %v1981_v24  ;;  %v2001_v28 = vadd.f32 1e-05, %v1967_v35  ;;  %v1934_v10 = vmul.f32 0.015625, %v1917_v15 }
 0x303   : > { %v6173_v37 = vadd.f32 %v5847_v13, %v2055_v20  ;;  %v2160_v44 = vmul.f32 %v2143_v32, %v2092_v12  ;;  %4637 = vmatpush3.bf16.msra.mxu0 %v6060_v14  ;;  %v2093_v27 = vmul.f32 0.5, %v6081_v9  ;;  %v1951_v46 = vmul.f32 %v6146_v55, %v6146_v55 }
 0x304   : > { %v4817_v40 = vpop.eup %4816  ;;  %4639 = vmatprep.subr.bf16.mxu0 %v6069_v11  ;;  %v6182_v53 = vpack.c.bf16 %v3923_v16, %v3922_v23  ;;  %v2056_v59 = vmul.f32 %v5840_v62, %v2032_v33  ;;  %4826 = vrsqrt.f32 %v2001_v28  ;;  %vm2214_vm4 = vcmp.ge.s32.totalorder %v2197_v52, 0 }
 0x305   : > { %v2113_v34 = vmul.f32 0.70710677, %v6173_v37  ;;  %v2297_v29 = vsel %vm6162_vm1, %v2160_v44, 0.0  ;;  %v2144_v48 = vadd.f32 1.0, %v4817_v40  ;;  %v2352_v14 = vld [vmem:[#allocation3 + $0x22] sm:$0xff]  ;;  %v1982_v54 = vsub.f32 %v5754_v21, %v6058_v58 }
 0x306   : > { %2314 = vst.msk [vmem:[#allocation3 + $0x38] sm:$0xff] %vm859_vm2, %v2297_v29  ;;  %v1968_v63 = vsub.f32 %v1934_v10, %v1951_v46  ;;  %4434 = vmatprep.mubr.msk.f32.mxu0 %vm859_vm2, %v2352_v14  ;;  %v4819_v50 = vpop.eup %4818  ;;  %vm2231_vm6 = vcmp.lt.s32.totalorder %v2197_v52, 256  ;;  %v2180_v17 = vadd.s32 88, %v5315_v49  ;;  %v6201_v51 = vadd.f32 %v5847_v13, %v2056_v59  ;;  %v3928_v44 = vld [vmem:[%s6713_s9 + $0xb0] sm:$0xff] }
 0x307   : > { %4828 = verf.f32 %v2113_v34  ;;  %v2161_v1 = vmul.f32 %v2144_v48, %v2093_v27  ;;  %4641 = vmatpush3.bf16.msra.mxu0 %v6069_v11  ;;  %vm2215_vm7 = vcmp.ge.s32.totalorder %v6170_v18, 0  ;;  %v2033_v6 = vmul.f32 %v4819_v50, %v1982_v54  ;;  %vm6213_vm8 = vmand %vm2214_vm4, %vm2231_vm6 }
 0x308   : > { %v4821_v41 = vpop.eup %4820  ;;  %v2002_v3 = vadd.f32 1e-05, %v1968_v63  ;;  %4643 = vmatprep.subr.bf16.mxu0 %v6182_v53  ;;  %v2094_v58 = vmul.f32 0.5, %v6107_v42  ;;  %v2114_v25 = vmul.f32 0.70710677, %v6201_v51  ;;  %vm2232_vm9 = vcmp.lt.s32.totalorder %v6170_v18, 256 }
 0x309   : > { %v2298_v21 = vsel %vm6192_vm3, %v2161_v1, 0.0  ;;  %v2145_v61 = vadd.f32 1.0, %v4821_v41  ;;  %v2353_v0 = vld [vmem:[#allocation3 + $0x2a] sm:$0xff]  ;;  %v2057_v4 = vmul.f32 %v5840_v62, %v2033_v6  ;;  %v1983_v57 = vsub.f32 %v5764_v30, %v6088_v5  ;;  %vm6235_vm10 = vmand %vm2215_vm7, %vm2232_vm9 }
 0x30a   : > { %2315 = vst.msk [vmem:[#allocation3 + $0x40] sm:$0xff] %vm859_vm2, %v2298_v21  ;;  %4830 = vrsqrt.f32 %v2002_v3  ;;  %4435 = vmatmul.mubr.msk.f32.gmra.mrb[52].mxu0 %vm859_vm2, %v2353_v0  ;;  %v4823_v42 = vpop.eup %4822  ;;  %v2199_v39 = vadd.s32 %v5842_v43, %v2180_v17  ;;  %v2181_v31 = vadd.s32 96, %v5315_v49  ;;  %v2095_v30 = vmul.f32 0.5, %v6135_v22 }
 0x30b   : > { %v2162_v24 = vmul.f32 %v2145_v61, %v2094_v58  ;;  %4832 = verf.f32 %v2114_v25  ;;  %v6225_v38 = vadd.f32 %v5847_v13, %v2057_v4  ;;  %v2034_v26 = vmul.f32 %v4823_v42, %v1983_v57 }
 0x30c   : > { %v4825_v2 = vpop.eup %4824  ;;  %v1984_v32 = vsub.f32 %v5774_v60, %v6114_v19  ;;  %vm2216_vm11 = vcmp.ge.s32.totalorder %v2199_v39, 0  ;;  %vm2233_vm12 = vcmp.lt.s32.totalorder %v2199_v39, 256  ;;  %v2200_v8 = vadd.s32 %v5842_v43, %v2181_v31 }
 0x30d   : > { %v2299_v12 = vsel %vm6213_vm8, %v2162_v24, 0.0  ;;  %v2146_v5 = vadd.f32 1.0, %v4825_v2  ;;  %v2354_v7 = vld [vmem:[#allocation3 + $0x32] sm:$0xff]  ;;  %v2115_v15 = vmul.f32 0.70710677, %v6225_v38  ;;  %v2058_v56 = vmul.f32 %v5840_v62, %v2034_v26  ;;  %vm6251_vm13 = vmand %vm2216_vm11, %vm2233_vm12 }
 0x30e   : > { %2316 = vst.msk [vmem:[#allocation3 + $0x48] sm:$0xff] %vm859_vm2, %v2299_v12  ;;  %4437 = vmatprep.mubr.msk.f32.mxu0 %vm859_vm2, %v2354_v7  ;;  %v4827_v22 = vpop.eup %4826  ;;  %v2096_v52 = vmul.f32 0.5, %v6173_v37  ;;  %v2182_v60 = vadd.s32 104, %v5315_v49  ;;  %vm2217_vm14 = vcmp.ge.s32.totalorder %v2200_v8, 0  ;;  %v1985_v37 = vsub.f32 %v5790_v47, %v6146_v55 }
 0x30f   : > { %v2163_v35 = vmul.f32 %v2146_v5, %v2095_v30  ;;  %4834 = verf.f32 %v2115_v15  ;;  %v2082_v16 = vadd.f32 %v5847_v13, %v2058_v56  ;;  %v2035_v45 = vmul.f32 %v4827_v22, %v1984_v32 }
 0x310   : > { %vm2234_vm15 = vcmp.lt.s32.totalorder %v2200_v8, 256  ;;  %v2183_v27 = vadd.s32 112, %v5315_v49  ;;  %v2201_v48 = vadd.s32 %v5842_v43, %v2182_v60  ;;  %v2097_v9 = vmul.f32 0.5, %v6201_v51  ;;  %v3925_v8 = vld [vmem:[%s6713_s9 + $0x98] sm:$0xff] }
 0x311   : > { %v4829_v23 = vpop.eup %4828  ;;  %v2300_v36 = vsel %vm6235_vm10, %v2163_v35, 0.0  ;;  %v2355_v19 = vld [vmem:[#allocation3 + $0x3a] sm:$0xff]  ;;  %v2116_v33 = vmul.f32 0.70710677, %v2082_v16  ;;  %v2059_v28 = vmul.f32 %v5840_v62, %v2035_v45  ;;  %vm2251_vm0 = vmand %vm2217_vm14, %vm2234_vm15  ;;  %v2184_v1 = vadd.s32 120, %v5315_v49  ;;  %v2325_v45 = vld [vmem:[#allocation3 + $0x8] sm:$0xff] }
 0x312   : > { %v2147_v18 = vadd.f32 1.0, %v4829_v23  ;;  %2317 = vst.msk [vmem:[#allocation3 + $0x50] sm:$0xff] %vm859_vm2, %v2300_v36  ;;  %4438 = vmatmul.mubr.msk.f32.gmra.mrb[54].mxu0 %vm859_vm2, %v2355_v19  ;;  %v2202_v50 = vadd.s32 %v5842_v43, %v2183_v27  ;;  %vm2218_vm1 = vcmp.ge.s32.totalorder %v2201_v48, 0  ;;  %vm2235_vm3 = vcmp.lt.s32.totalorder %v2201_v48, 256  ;;  %v3924_v35 = vld [vmem:[%s6713_s9 + $0x90] sm:$0xff]  ;;  %v3926_v36 = vld [vmem:[%s6713_s9 + $0xa0] sm:$0xff] }
 0x313   : > { %4836 = verf.f32 %v2116_v33  ;;  %v2083_v34 = vadd.f32 %v5847_v13, %v2059_v28  ;;  %v2098_v3 = vmul.f32 0.5, %v6225_v38  ;;  %vm2252_vm4 = vmand %vm2218_vm1, %vm2235_vm3  ;;  %v2203_v61 = vadd.s32 %v5842_v43, %v2184_v1  ;;  %v2324_v23 = vld [vmem:[#allocation3] sm:$0xff]  ;;  %v2327_v19 = vld [vmem:[#allocation3 + $0x18] sm:$0xff] }
 0x314   : > { %v2164_v10 = vmul.f32 %v2147_v18, %v2096_v52  ;;  %v4831_v40 = vpop.eup %4830  ;;  %vm2219_vm6 = vcmp.ge.s32.totalorder %v2202_v50, 0  ;;  %vm2236_vm7 = vcmp.lt.s32.totalorder %v2202_v50, 256  ;;  %v2185_v0 = vadd.s32 128, %v5315_v49  ;;  %v3927_v52 = vld [vmem:[%s6713_s9 + $0xa8] sm:$0xff]  ;;  %v2326_v18 = vld [vmem:[#allocation3 + $0x10] sm:$0xff]  ;;  %v3929_v33 = vld [vmem:[%s6713_s9 + $0xb8] sm:$0xff] }
 0x315   : > { %v4833_v46 = vpop.eup %4832  ;;  %v2036_v59 = vmul.f32 %v4831_v40, %v1985_v37  ;;  %v2356_v14 = vld [vmem:[#allocation3 + $0x42] sm:$0xff]  ;;  %v2117_v55 = vmul.f32 0.70710677, %v2083_v34  ;;  %v2099_v4 = vmul.f32 0.5, %v2082_v16  ;;  %vm2253_vm8 = vmand %vm2219_vm6, %vm2236_vm7  ;;  %vm2220_vm9 = vcmp.ge.s32.totalorder %v2203_v61, 0  ;;  %v2330_v37 = vld [vmem:[#allocation3 + $0x30] sm:$0xff] }
 0x316   : > { %v2301_v29 = vsel %vm6251_vm13, %v2164_v10, 0.0  ;;  %v2148_v47 = vadd.f32 1.0, %v4833_v46  ;;  %4440 = vmatprep.mubr.msk.f32.mxu0 %vm859_vm2, %v2356_v14  ;;  %vm2237_vm10 = vcmp.lt.s32.totalorder %v2203_v61, 256  ;;  %v2204_v39 = vadd.s32 %v5842_v43, %v2185_v0  ;;  %v2328_v28 = vld [vmem:[#allocation3 + $0x20] sm:$0xff]  ;;  %v2329_v10 = vld [vmem:[#allocation3 + $0x28] sm:$0xff]  ;;  %v2331_v40 = vld [vmem:[#allocation3 + $0x38] sm:$0xff] }
 0x317   : > { %2318 = vst.msk [vmem:[#allocation3 + $0x58] sm:$0xff] %vm859_vm2, %v2301_v29  ;;  %v2060_v54 = vmul.f32 %v5840_v62, %v2036_v59  ;;  %4838 = verf.f32 %v2117_v55  ;;  %v2100_v38 = vmul.f32 0.5, %v2083_v34  ;;  %vm2254_vm11 = vmand %vm2220_vm9, %vm2237_vm10  ;;  %v4646_v16 = vpack.c.bf16 %v3925_v8, %v3924_v35  ;;  %v2332_v27 = vld [vmem:[#allocation3 + $0x40] sm:$0xff]  ;;  %v2333_v34 = vld [vmem:[#allocation3 + $0x48] sm:$0xff] }
 0x318   : > { %v2165_v63 = vmul.f32 %v2148_v47, %v2097_v9  ;;  %vm2221_vm12 = vcmp.ge.s32.totalorder %v2204_v39, 0  ;;  %vm2238_vm13 = vcmp.lt.s32.totalorder %v2204_v39, 256  ;;  %v4650_v60 = vpack.c.bf16 %v3927_v52, %v3926_v36  ;;  %v2759_v47 = vld [vmem:[#allocation3 + $0x4] sm:$0xff]  ;;  %v2760_v55 = vld [vmem:[#allocation3 + $0xc] sm:$0xff]  ;;  %v3400_v0 = vld [vmem:[%s6717_s13 + $0x8] sm:$0xff] }
 0x319   : > { %v2084_v17 = vadd.f32 %v5847_v13, %v2060_v54  ;;  %v2357_v41 = vld [vmem:[#allocation3 + $0x4a] sm:$0xff]  ;;  %v4835_v51 = vpop.eup %4834  ;;  %vm2255_vm14 = vmand %vm2221_vm12, %vm2238_vm13  ;;  %v2761_v54 = vld [vmem:[#allocation3 + $0x14] sm:$0xff] }
 0x31a   : > { %v2302_v6 = vsel %vm2251_vm0, %v2165_v63, 0.0  ;;  %4441 = vmatmul.mubr.msk.f32.gmra.mrb[56].mxu0 %vm859_vm2, %v2357_v41  ;;  %v2149_v62 = vadd.f32 1.0, %v4835_v51  ;;  %v2334_v46 = vld [vmem:[#allocation3 + $0x50] sm:$0xff]  ;;  %v2762_v63 = vld [vmem:[#allocation3 + $0x1c] sm:$0xff]  ;;  %v2763_v50 = vld [vmem:[#allocation3 + $0x24] sm:$0xff] }
 0x31b   : > { %2319 = vst.msk [vmem:[#allocation3 + $0x60] sm:$0xff] %vm859_vm2, %v2302_v6  ;;  %v2118_v21 = vmul.f32 0.70710677, %v2084_v17  ;;  %v2101_v7 = vmul.f32 0.5, %v2084_v17  ;;  %v2764_v1 = vld [vmem:[#allocation3 + $0x2c] sm:$0xff]  ;;  %v2765_v17 = vld [vmem:[#allocation3 + $0x34] sm:$0xff] }
 0x31c   : > { %v2166_v58 = vmul.f32 %v2149_v62, %v2098_v3  ;;  %v2766_v41 = vld [vmem:[#allocation3 + $0x3c] sm:$0xff]  ;;  %v2767_v51 = vld [vmem:[#allocation3 + $0x44] sm:$0xff]  ;;  %v2768_v6 = vld [vmem:[#allocation3 + $0x4c] sm:$0xff] }
 0x31d   : > { %4840 = verf.f32 %v2118_v21  ;;  %v4837_v13 = vpop.eup %4836 }
 0x31e   : > { %v2358_v25 = vld [vmem:[#allocation3 + $0x52] sm:$0xff]  ;;  %v2303_v11 = vsel %vm2252_vm4, %v2166_v58, 0.0  ;;  %v2150_v57 = vadd.f32 1.0, %v4837_v13 }
 0x31f   : > { %4443 = vmatprep.mubr.msk.f32.mxu0 %vm859_vm2, %v2358_v25  ;;  %2320 = vst.msk [vmem:[#allocation3 + $0x68] sm:$0xff] %vm859_vm2, %v2303_v11  ;;  %v2335_v29 = vld [vmem:[#allocation3 + $0x58] sm:$0xff]  ;;  %v3399_v13 = vld [vmem:[%s6717_s13] sm:$0xff] }
 0x320   : > { %v2167_v42 = vmul.f32 %v2150_v57, %v2099_v4  ;;  %v2769_v3 = vld [vmem:[#allocation3 + $0x54] sm:$0xff]  ;;  %v4658_v11 = vpack.c.bf16 %v3400_v0, %v3399_v13  ;;  %v6348_v4 = vld [vmem:[%s6714_s10] ss:$0 sm:$0xff] }
 0x321   : > { %v4839_v24 = vpop.eup %4838 }
 0x322   : > { %v2359_v31 = vld [vmem:[#allocation3 + $0x5a] sm:$0xff]  ;;  %v2304_v2 = vsel %vm2253_vm8, %v2167_v42, 0.0  ;;  %v2151_v26 = vadd.f32 1.0, %v4839_v24  ;;  %4659 = vmatprep.subr.bf16.mxu1 %v4658_v11 }
 0x323   : > { %4444 = vmatmul.mubr.msk.f32.gmra.mrb[58].mxu0 %vm859_vm2, %v2359_v31  ;;  %2321 = vst.msk [vmem:[#allocation3 + $0x70] sm:$0xff] %vm859_vm2, %v2304_v2  ;;  %v2336_v48 = vld [vmem:[#allocation3 + $0x60] sm:$0xff]  ;;  %4661 = vmatpush3.bf16.msra.mxu1 %v4658_v11 }
 0x324   : > { %v2168_v49 = vmul.f32 %v2151_v26, %v2100_v38  ;;  %v2770_v62 = vld [vmem:[#allocation3 + $0x5c] sm:$0xff] }
 0x326   : > { %v2305_v30 = vsel %vm2254_vm11, %v2168_v49, 0.0  ;;  %v2360_v5 = vld [vmem:[#allocation3 + $0x62] sm:$0xff] }
 0x327   : > { %v4841_v12 = vpop.eup %4840  ;;  %2322 = vst.msk [vmem:[#allocation3 + $0x78] sm:$0xff] %vm859_vm2, %v2305_v30  ;;  %4446 = vmatprep.mubr.msk.f32.mxu0 %vm859_vm2, %v2360_v5  ;;  %v2337_v59 = vld [vmem:[#allocation3 + $0x68] sm:$0xff] }
 0x328   : > { %v2152_v20 = vadd.f32 1.0, %v4841_v12  ;;  %v2771_v21 = vld [vmem:[#allocation3 + $0x64] sm:$0xff] }
 0x32a   : > { %v2169_v43 = vmul.f32 %v2152_v20, %v2101_v7  ;;  %v2361_v15 = vld [vmem:[#allocation3 + $0x6a] sm:$0xff] }
 0x32b   : > { %4447 = vmatmul.mubr.msk.f32.gmra.mrb[60].mxu0 %vm859_vm2, %v2361_v15  ;;  %v2338_v14 = vld [vmem:[#allocation3 + $0x70] sm:$0xff] }
 0x32c   : > { %v2306_v56 = vsel %vm2255_vm14, %v2169_v43, 0.0  ;;  %v2772_v58 = vld [vmem:[#allocation3 + $0x6c] sm:$0xff] }
 0x32d   : > { %2323 = vst.msk [vmem:[#allocation3 + $0x80] sm:$0xf] %vm1829_vm5, %v2306_v56  ;;  %vm3016_vm5 = vcmask 261120  }
 0x32e   : > { %v2362_v32 = vld [vmem:[#allocation3 + $0x72] sm:$0xff] }
 0x32f   : > { %4449 = vmatprep.mubr.msk.f32.mxu0 %vm859_vm2, %v2362_v32  ;;  %v2339_v9 = vld [vmem:[#allocation3 + $0x78] sm:$0xff] }
 0x330   : > { %v2773_v61 = vld [vmem:[#allocation3 + $0x74] sm:$0xff] }
 0x334   : > { %v2363_v22 = vld [vmem:[#allocation3 + $0x7a] sm:$0xff] }
 0x335   : > { %4450 = vmatmul.mubr.msk.f32.gmra.mrb[62].mxu0 %vm859_vm2, %v2363_v22  ;;  %v2774_v25 = vld [vmem:[#allocation3 + $0x7c] sm:$0xff] }
 0x336   : > { %4468 = vmatprep.mubr.msk.f32.mxu0 %vm859_vm2, %v2324_v23 }
 0x339   : > { %4469 = vmatmul.mubr.msk.f32.vlgmr.msra.gmra.mrb[48].mxu0 %vm859_vm2, %v2325_v45 }
 0x33a   : > { %4645 = vmatpush3.bf16.msra.mxu0 %v6182_v53  ;;  %4471 = vmatprep.mubr.msk.f32.mxu0 %vm859_vm2, %v2326_v18  ;;  %v4654_v53 = vpack.c.bf16 %v3929_v33, %v3928_v44 }
 0x33b   : > { %4647 = vmatprep.subr.bf16.mxu0 %v4646_v16 }
 0x33d   : > { %4472 = vmatmul.mubr.msk.f32.gmra.mrb[50].mxu0 %vm859_vm2, %v2327_v19 }
 0x33e   : > { %4474 = vmatprep.mubr.msk.f32.mxu0 %vm859_vm2, %v2328_v28  ;;  %4649 = vmatpush3.bf16.msra.mxu0 %v4646_v16 }
 0x33f   : > { %4651 = vmatprep.subr.bf16.mxu0 %v4650_v60 }
 0x341   : > { %4475 = vmatmul.mubr.msk.f32.gmra.mrb[52].mxu0 %vm859_vm2, %v2329_v10 }
 0x342   : > { %4477 = vmatprep.mubr.msk.f32.mxu0 %vm859_vm2, %v2330_v37  ;;  %4653 = vmatpush3.bf16.msra.mxu0 %v4650_v60 }
 0x343   : > { %4655 = vmatprep.subr.bf16.mxu0 %v4654_v53 }
 0x345   : > { %4478 = vmatmul.mubr.msk.f32.gmra.mrb[54].mxu0 %vm859_vm2, %v2331_v40 }
 0x346   : > { %4480 = vmatprep.mubr.msk.f32.mxu0 %vm859_vm2, %v2332_v27  ;;  %4657 = vmatpush3.bf16.msra.mxu0 %v4654_v53 }
 0x349   : > { %4481 = vmatmul.mubr.msk.f32.gmra.mrb[56].mxu0 %vm859_vm2, %v2333_v34 }
 0x34a   : > { %4483 = vmatprep.mubr.msk.f32.mxu0 %vm859_vm2, %v2334_v46 }
 0x34d   : > { %4484 = vmatmul.mubr.msk.f32.gmra.mrb[58].mxu0 %vm859_vm2, %v2335_v29 }
 0x34e   : > { %4486 = vmatprep.mubr.msk.f32.mxu0 %vm859_vm2, %v2336_v48 }
 0x351   : > { %4487 = vmatmul.mubr.msk.f32.gmra.mrb[60].mxu0 %vm859_vm2, %v2337_v59 }
 0x352   : > { %4489 = vmatprep.mubr.msk.f32.mxu0 %vm859_vm2, %v2338_v14 }
 0x355   : > { %4490 = vmatmul.mubr.msk.f32.gmra.mrb[62].mxu0 %vm859_vm2, %v2339_v9 }
 0x356   : > { %4508 = vmatprep.mubr.msk.f32.mxu0 %vm859_vm2, %v2759_v47 }
 0x359   : > { %4509 = vmatmul.mubr.msk.f32.vlgmr.msra.gmra.mrb[48].mxu0 %vm859_vm2, %v2760_v55 }
 0x35a   : > { %4511 = vmatprep.mubr.msk.f32.mxu0 %vm859_vm2, %v2761_v54 }
 0x35d   : > { %4512 = vmatmul.mubr.msk.f32.gmra.mrb[50].mxu0 %vm859_vm2, %v2762_v63 }
 0x35e   : > { %4514 = vmatprep.mubr.msk.f32.mxu0 %vm859_vm2, %v2763_v50 }
 0x361   : > { %4515 = vmatmul.mubr.msk.f32.gmra.mrb[52].mxu0 %vm859_vm2, %v2764_v1 }
 0x362   : > { %4517 = vmatprep.mubr.msk.f32.mxu0 %vm859_vm2, %v2765_v17 }
 0x365   : > { %4518 = vmatmul.mubr.msk.f32.gmra.mrb[54].mxu0 %vm859_vm2, %v2766_v41 }
 0x366   : > { %4520 = vmatprep.mubr.msk.f32.mxu0 %vm859_vm2, %v2767_v51 }
 0x369   : > { %4521 = vmatmul.mubr.msk.f32.gmra.mrb[56].mxu0 %vm859_vm2, %v2768_v6 }
 0x36a   : > { %4523 = vmatprep.mubr.msk.f32.mxu0 %vm859_vm2, %v2769_v3 }
 0x36d   : > { %4524 = vmatmul.mubr.msk.f32.gmra.mrb[58].mxu0 %vm859_vm2, %v2770_v62 }
 0x36e   : > { %4526 = vmatprep.mubr.msk.f32.mxu0 %vm859_vm2, %v2771_v21 }
 0x371   : > { %4527 = vmatmul.mubr.msk.f32.gmra.mrb[60].mxu0 %vm859_vm2, %v2772_v58 }
 0x372   : > { %4529 = vmatprep.mubr.msk.f32.mxu0 %vm859_vm2, %v2773_v61 }
 0x375   : > { %4530 = vmatmul.mubr.msk.f32.gmra.mrb[62].mxu0 %vm859_vm2, %v2774_v25 }
 0x42c   : > { %v4510_v57 = vpop.f32.mrb[48].mxu0 }
 0x42d   : > { %v6351_v42 = vadd.f32 %v4510_v57, %v6348_v4  ;;  %v2898_v24 = vpop.f32.mrb[49].mxu0 }
 0x42e   : > { %v6354_v39 = vadd.f32 %v6348_v4, %v2898_v24 }
 0x42f   : > { %v3020_v31 = vsel %vm3016_vm5, %v6351_v42, 0.0  ;;  %v3082_v2 = vmul.f32 %v6351_v42, %v6351_v42 }
 0x430   : > { %3021 = vadd.xlane.f32.xlu1 %v3020_v31  ;;  %v4513_v38 = vpop.f32.mrb[50].mxu0  ;;  %v3017_v26 = vsel %vm3016_vm5, %v6354_v39, 0.0  ;;  %v3081_v49 = vmul.f32 %v6354_v39, %v6354_v39 }
 0x431   : > { %3018 = vadd.xlane.f32.xlu0 %v3017_v26  ;;  %v2908_v12 = vpop.f32.mrb[51].mxu0  ;;  %v6365_v30 = vadd.f32 %v4513_v38, %v6348_v4  ;;  %v3100_v5 = vsel %vm3016_vm5, %v3082_v2, 0.0  ;;  %v3401_v2 = vld [vmem:[%s6717_s13 + $0x10] sm:$0xff]  ;;  %v3402_v38 = vld [vmem:[%s6717_s13 + $0x18] sm:$0xff] }
 0x432   : > { %v6369_v7 = vadd.f32 %v6348_v4, %v2908_v12  ;;  %v3097_v43 = vsel %vm3016_vm5, %v3081_v49, 0.0  ;;  %v4662_v26 = vpack.c.bf16 %v3402_v38, %v3401_v2 }
 0x433   : > { %v3026_v56 = vsel %vm3016_vm5, %v6365_v30, 0.0  ;;  %v3084_v32 = vmul.f32 %v6365_v30, %v6365_v30 }
 0x434   : > { %3101 = vadd.xlane.f32.xlu1 %v3100_v5  ;;  %v4516_v20 = vpop.f32.mrb[52].mxu0  ;;  %v3023_v35 = vsel %vm3016_vm5, %v6369_v7, 0.0  ;;  %v3083_v8 = vmul.f32 %v6369_v7, %v6369_v7  ;;  %4663 = vmatprep.subr.bf16.mxu1 %v4662_v26 }
 0x435   : > { %3098 = vadd.xlane.f32.xlu0 %v3097_v43  ;;  %v2918_v15 = vpop.f32.mrb[53].mxu0  ;;  %v6381_v16 = vadd.f32 %v4516_v20, %v6348_v4  ;;  %v3106_v45 = vsel %vm3016_vm5, %v3084_v32, 0.0  ;;  %4665 = vmatpush3.bf16.msra.mxu1 %v4662_v26 }
 0x436   : > { %v6385_v36 = vadd.f32 %v6348_v4, %v2918_v15  ;;  %v3103_v18 = vsel %vm3016_vm5, %v3083_v8, 0.0 }
 0x437   : > { %v3032_v19 = vsel %vm3016_vm5, %v6381_v16, 0.0  ;;  %v3086_v44 = vmul.f32 %v6381_v16, %v6381_v16 }
 0x438   : > { %3027 = vadd.xlane.f32.xlu1 %v3026_v56  ;;  %v4519_v22 = vpop.f32.mrb[54].mxu0  ;;  %v3029_v28 = vsel %vm3016_vm5, %v6385_v36, 0.0  ;;  %v3085_v53 = vmul.f32 %v6385_v36, %v6385_v36 }
 0x439   : > { %3024 = vadd.xlane.f32.xlu0 %v3023_v35  ;;  %v2928_v23 = vpop.f32.mrb[55].mxu0  ;;  %v6397_v37 = vadd.f32 %v4519_v22, %v6348_v4  ;;  %v3112_v40 = vsel %vm3016_vm5, %v3086_v44, 0.0 }
 0x43a   : > { %v6401_v27 = vadd.f32 %v6348_v4, %v2928_v23  ;;  %v3109_v46 = vsel %vm3016_vm5, %v3085_v53, 0.0 }
 0x43b   : > { %v3038_v48 = vsel %vm3016_vm5, %v6397_v37, 0.0  ;;  %v3088_v59 = vmul.f32 %v6397_v37, %v6397_v37 }
 0x43c   : > { %3107 = vadd.xlane.f32.xlu1 %v3106_v45  ;;  %v4522_v52 = vpop.f32.mrb[56].mxu0  ;;  %v3035_v9 = vsel %vm3016_vm5, %v6401_v27, 0.0  ;;  %v3087_v47 = vmul.f32 %v6401_v27, %v6401_v27 }
 0x43d   : > { %3104 = vadd.xlane.f32.xlu0 %v3103_v18  ;;  %v2938_v60 = vpop.f32.mrb[57].mxu0  ;;  %v6413_v54 = vadd.f32 %v4522_v52, %v6348_v4  ;;  %v3118_v63 = vsel %vm3016_vm5, %v3088_v59, 0.0 }
 0x43e   : > { %v6417_v50 = vadd.f32 %v6348_v4, %v2938_v60  ;;  %v3115_v1 = vsel %vm3016_vm5, %v3087_v47, 0.0 }
 0x43f   : > { %v3044_v17 = vsel %vm3016_vm5, %v6413_v54, 0.0  ;;  %v3090_v41 = vmul.f32 %v6413_v54, %v6413_v54 }
 0x440   : > { %3033 = vadd.xlane.f32.xlu1 %v3032_v19  ;;  %v4525_v33 = vpop.f32.mrb[58].mxu0  ;;  %v3041_v51 = vsel %vm3016_vm5, %v6417_v50, 0.0  ;;  %v3089_v6 = vmul.f32 %v6417_v50, %v6417_v50 }
 0x441   : > { %3030 = vadd.xlane.f32.xlu0 %v3029_v28  ;;  %v2948_v10 = vpop.f32.mrb[59].mxu0  ;;  %v6429_v3 = vadd.f32 %v4525_v33, %v6348_v4  ;;  %v3124_v62 = vsel %vm3016_vm5, %v3090_v41, 0.0 }
 0x442   : > { %v6433_v21 = vadd.f32 %v6348_v4, %v2948_v10  ;;  %v3121_v58 = vsel %vm3016_vm5, %v3089_v6, 0.0 }
 0x443   : > { %v3050_v61 = vsel %vm3016_vm5, %v6429_v3, 0.0  ;;  %v3092_v25 = vmul.f32 %v6429_v3, %v6429_v3 }
 0x444   : > { %3113 = vadd.xlane.f32.xlu1 %v3112_v40  ;;  %v4528_v34 = vpop.f32.mrb[60].mxu0  ;;  %v3047_v13 = vsel %vm3016_vm5, %v6433_v21, 0.0  ;;  %v3091_v0 = vmul.f32 %v6433_v21, %v6433_v21 }
 0x445   : > { %3110 = vadd.xlane.f32.xlu0 %v3109_v46  ;;  %v2958_v29 = vpop.f32.mrb[61].mxu0  ;;  %v6445_v11 = vadd.f32 %v4528_v34, %v6348_v4  ;;  %v3130_v57 = vsel %vm3016_vm5, %v3092_v25, 0.0 }
 0x446   : > { %v6449_v24 = vadd.f32 %v6348_v4, %v2958_v29  ;;  %v3127_v31 = vsel %vm3016_vm5, %v3091_v0, 0.0 }
 0x447   : > { %v3056_v49 = vsel %vm3016_vm5, %v6445_v11, 0.0  ;;  %v3094_v12 = vmul.f32 %v6445_v11, %v6445_v11 }
 0x448   : > { %3039 = vadd.xlane.f32.xlu1 %v3038_v48  ;;  %v4531_v14 = vpop.f32.mrb[62].mxu0  ;;  %v3053_v5 = vsel %vm3016_vm5, %v6449_v24, 0.0  ;;  %v3093_v20 = vmul.f32 %v6449_v24, %v6449_v24 }
 0x449   : > { %3036 = vadd.xlane.f32.xlu0 %v3035_v9  ;;  %v2968_v55 = vpop.f32.mrb[63].mxu0  ;;  %v6467_v43 = vadd.f32 %v4531_v14, %v6348_v4  ;;  %v3136_v15 = vsel %vm3016_vm5, %v3094_v12, 0.0 }
 0x44a   : > { %v6471_v56 = vadd.f32 %v6348_v4, %v2968_v55  ;;  %v3133_v32 = vsel %vm3016_vm5, %v3093_v20, 0.0 }
 0x44b   : > { %v3062_v22 = vsel %vm3016_vm5, %v6467_v43, 0.0  ;;  %v3096_v35 = vmul.f32 %v6467_v43, %v6467_v43 }
 0x44c   : > { %3119 = vadd.xlane.f32.xlu1 %v3118_v63  ;;  %v3059_v8 = vsel %vm3016_vm5, %v6471_v56, 0.0  ;;  %v3095_v23 = vmul.f32 %v6471_v56, %v6471_v56 }
 0x44d   : > { %3116 = vadd.xlane.f32.xlu0 %v3115_v1  ;;  %v3142_v4 = vsel %vm3016_vm5, %v3096_v35, 0.0 }
 0x44e   : > { %v3139_v45 = vsel %vm3016_vm5, %v3095_v23, 0.0 }
 0x450   : > { %3045 = vadd.xlane.f32.xlu1 %v3044_v17 }
 0x451   : > { %3042 = vadd.xlane.f32.xlu0 %v3041_v51 }
 0x454   : > { %3125 = vadd.xlane.f32.xlu1 %v3124_v62 }
 0x455   : > { %3122 = vadd.xlane.f32.xlu0 %v3121_v58 }
 0x458   : > { %3051 = vadd.xlane.f32.xlu1 %v3050_v61 }
 0x459   : > { %3048 = vadd.xlane.f32.xlu0 %v3047_v13 }
 0x45c   : > { %3131 = vadd.xlane.f32.xlu1 %v3130_v57 }
 0x45d   : > { %3128 = vadd.xlane.f32.xlu0 %v3127_v31 }
 0x460   : > { %3057 = vadd.xlane.f32.xlu1 %v3056_v49  ;;  %v6493_v49 = vld [vmem:[%s6715_s11] ss:$0 sm:$0xff] }
 0x461   : > { %3054 = vadd.xlane.f32.xlu0 %v3053_v5 }
 0x464   : > { %3137 = vadd.xlane.f32.xlu1 %v3136_v15 }
 0x465   : > { %3134 = vadd.xlane.f32.xlu0 %v3133_v32 }
 0x468   : > { %3063 = vadd.xlane.f32.xlu1 %v3062_v22 }
 0x469   : > { %3060 = vadd.xlane.f32.xlu0 %v3059_v8 }
 0x46c   : > { %3143 = vadd.xlane.f32.xlu1 %v3142_v4 }
 0x46d   : > { %3140 = vadd.xlane.f32.xlu0 %v3139_v45 }
 0x4bd   : > { %v3022_v52 = vpop.xlane.xlu1 %3021 }
 0x4be   : > { %v3066_v18 = vmul.f32 0.03125, %v3022_v52  ;;  %v3019_v60 = vpop.xlane.xlu0 %3018 }
 0x4bf   : > { %v3065_v19 = vmul.f32 0.03125, %v3019_v60 }
 0x4c0   : > { %v3162_v33 = vmul.f32 %v3066_v18, %v3066_v18  ;;  %v3194_v31 = vsub.f32 %v6351_v42, %v3066_v18 }
 0x4c1   : > { %v3102_v44 = vpop.xlane.xlu1 %3101  ;;  %v3161_v10 = vmul.f32 %v3065_v19, %v3065_v19  ;;  %v3193_v26 = vsub.f32 %v6354_v39, %v3065_v19  ;;  %v6502_v39 = vld [vmem:[%s6716_s12] ss:$0 sm:$0xff] }
 0x4c2   : > { %v3146_v28 = vmul.f32 0.03125, %v3102_v44  ;;  %v3099_v53 = vpop.xlane.xlu0 %3098 }
 0x4c3   : > { %v3145_v40 = vmul.f32 0.03125, %v3099_v53 }
 0x4c4   : > { %v3178_v34 = vsub.f32 %v3146_v28, %v3162_v33 }
 0x4c5   : > { %v3177_v46 = vsub.f32 %v3145_v40, %v3161_v10  ;;  %v3028_v29 = vpop.xlane.xlu1 %3027 }
 0x4c6   : > { %v3210_v48 = vadd.f32 1e-05, %v3178_v34  ;;  %v3068_v59 = vmul.f32 0.03125, %v3028_v29  ;;  %v3025_v14 = vpop.xlane.xlu0 %3024 }
 0x4c7   : > { %v3209_v9 = vadd.f32 1e-05, %v3177_v46  ;;  %v3067_v47 = vmul.f32 0.03125, %v3025_v14 }
 0x4c8   : > { %4842 = vrsqrt.f32 %v3210_v48  ;;  %v3164_v63 = vmul.f32 %v3068_v59, %v3068_v59  ;;  %v3196_v40 = vsub.f32 %v6365_v30, %v3068_v59 }
 0x4c9   : > { %4844 = vrsqrt.f32 %v3209_v9  ;;  %v3108_v55 = vpop.xlane.xlu1 %3107  ;;  %v3163_v41 = vmul.f32 %v3067_v47, %v3067_v47  ;;  %v3195_v29 = vsub.f32 %v6369_v7, %v3067_v47 }
 0x4ca   : > { %v3148_v1 = vmul.f32 0.03125, %v3108_v55  ;;  %v3105_v17 = vpop.xlane.xlu0 %3104 }
 0x4cb   : > { %v3147_v51 = vmul.f32 0.03125, %v3105_v17 }
 0x4cc   : > { %v3180_v6 = vsub.f32 %v3148_v1, %v3164_v63 }
 0x4cd   : > { %v3179_v62 = vsub.f32 %v3147_v51, %v3163_v41  ;;  %v3034_v58 = vpop.xlane.xlu1 %3033 }
 0x4ce   : > { %v3212_v61 = vadd.f32 1e-05, %v3180_v6  ;;  %v6484_v25 = vmul.f32 0.03125, %v3034_v58  ;;  %v3031_v13 = vpop.xlane.xlu0 %3030 }
 0x4cf   : > { %v3211_v0 = vadd.f32 1e-05, %v3179_v62  ;;  %v6486_v57 = vmul.f32 0.03125, %v3031_v13 }
 0x4d0   : > { %4846 = vrsqrt.f32 %v3212_v61  ;;  %v3166_v12 = vmul.f32 %v6484_v25, %v6484_v25 }
 0x4d1   : > { %4848 = vrsqrt.f32 %v3211_v0  ;;  %v3114_v2 = vpop.xlane.xlu1 %3113  ;;  %v3165_v42 = vmul.f32 %v6486_v57, %v6486_v57 }
 0x4d2   : > { %v4843_v38 = vpop.eup %4842  ;;  %v3150_v5 = vmul.f32 0.03125, %v3114_v2  ;;  %v3111_v20 = vpop.xlane.xlu0 %3110 }
 0x4d3   : > { %v4845_v15 = vpop.eup %4844  ;;  %v3242_v32 = vmul.f32 %v4843_v38, %v3194_v31  ;;  %v3149_v22 = vmul.f32 0.03125, %v3111_v20  ;;  %v3198_v38 = vsub.f32 %v6381_v16, %v6484_v25 }
 0x4d4   : > { %v3241_v35 = vmul.f32 %v4845_v15, %v3193_v26  ;;  %v3182_v8 = vsub.f32 %v3150_v5, %v3166_v12  ;;  %v3197_v26 = vsub.f32 %v6385_v36, %v6486_v57 }
 0x4d5   : > { %v3265_v23 = vmul.f32 %v6493_v49, %v3242_v32  ;;  %v3181_v4 = vsub.f32 %v3149_v22, %v3165_v42  ;;  %v3040_v45 = vpop.xlane.xlu1 %3039 }
 0x4d6   : > { %v3214_v52 = vadd.f32 1e-05, %v3182_v8  ;;  %v6505_v18 = vmul.f32 0.03125, %v3040_v45  ;;  %v3037_v60 = vpop.xlane.xlu0 %3036  ;;  %v3264_v19 = vmul.f32 %v6493_v49, %v3241_v35 }
 0x4d7   : > { %v3288_v44 = vadd.f32 %v6502_v39, %v3265_v23  ;;  %v3213_v33 = vadd.f32 1e-05, %v3181_v4  ;;  %v6509_v28 = vmul.f32 0.03125, %v3037_v60 }
 0x4d8   : > { %4850 = vrsqrt.f32 %v3214_v52  ;;  %v3287_v53 = vadd.f32 %v6502_v39, %v3264_v19  ;;  %v3168_v48 = vmul.f32 %v6505_v18, %v6505_v18 }
 0x4d9   : > { %v3320_v10 = vmul.f32 0.70710677, %v3288_v44  ;;  %4852 = vrsqrt.f32 %v3213_v33  ;;  %v3120_v34 = vpop.xlane.xlu1 %3119  ;;  %v3167_v17 = vmul.f32 %v6509_v28, %v6509_v28  ;;  %v3304_v60 = vmul.f32 0.5, %v3288_v44 }
 0x4da   : > { %v4847_v46 = vpop.eup %4846  ;;  %v3152_v14 = vmul.f32 0.03125, %v3120_v34  ;;  %v3117_v9 = vpop.xlane.xlu0 %3116  ;;  %v3319_v55 = vmul.f32 0.70710677, %v3287_v53  ;;  %v3303_v36 = vmul.f32 0.5, %v3287_v53 }
 0x4db   : > { %v4849_v63 = vpop.eup %4848  ;;  %4854 = verf.f32 %v3320_v10  ;;  %v3244_v1 = vmul.f32 %v4847_v46, %v3196_v40  ;;  %v3151_v41 = vmul.f32 0.03125, %v3117_v9 }
 0x4dc   : > { %v3243_v51 = vmul.f32 %v4849_v63, %v3195_v29  ;;  %v3184_v30 = vsub.f32 %v3152_v14, %v3168_v48  ;;  %4856 = verf.f32 %v3319_v55  ;;  %v3200_v55 = vsub.f32 %v6397_v37, %v6505_v18 }
 0x4dd   : > { %v3183_v59 = vsub.f32 %v3151_v41, %v3167_v17  ;;  %v3046_v6 = vpop.xlane.xlu1 %3045  ;;  %v3267_v7 = vmul.f32 %v6493_v49, %v3244_v1  ;;  %v3199_v63 = vsub.f32 %v6401_v27, %v6509_v28 }
 0x4de   : > { %v3216_v47 = vadd.f32 1e-05, %v3184_v30  ;;  %v6519_v62 = vmul.f32 0.03125, %v3046_v6  ;;  %v3043_v58 = vpop.xlane.xlu0 %3042  ;;  %v3266_v61 = vmul.f32 %v6493_v49, %v3243_v51 }
 0x4df   : > { %v3215_v13 = vadd.f32 1e-05, %v3183_v59  ;;  %v6522_v0 = vmul.f32 0.03125, %v3043_v58  ;;  %v6525_v31 = vadd.f32 %v6502_v39, %v3267_v7 }
 0x4e0   : > { %4858 = vrsqrt.f32 %v3216_v47  ;;  %v3289_v2 = vadd.f32 %v6502_v39, %v3266_v61  ;;  %v3170_v20 = vmul.f32 %v6519_v62, %v6519_v62 }
 0x4e1   : > { %4860 = vrsqrt.f32 %v3215_v13  ;;  %v3126_v12 = vpop.xlane.xlu1 %3125  ;;  %v3322_v22 = vmul.f32 0.70710677, %v6525_v31  ;;  %v3169_v23 = vmul.f32 %v6522_v0, %v6522_v0 }
 0x4e2   : > { %v4851_v5 = vpop.eup %4850  ;;  %v3154_v15 = vmul.f32 0.03125, %v3126_v12  ;;  %v3123_v32 = vpop.xlane.xlu0 %3122  ;;  %v3321_v42 = vmul.f32 0.70710677, %v3289_v2 }
 0x4e3   : > { %v4853_v35 = vpop.eup %4852  ;;  %v3246_v8 = vmul.f32 %v4851_v5, %v3198_v38  ;;  %v3153_v16 = vmul.f32 0.03125, %v3123_v32  ;;  %v3305_v5 = vmul.f32 0.5, %v3289_v2 }
 0x4e4   : > { %v3245_v25 = vmul.f32 %v4853_v35, %v3197_v26  ;;  %v3186_v4 = vsub.f32 %v3154_v15, %v3170_v20  ;;  %4862 = verf.f32 %v3321_v42 }
 0x4e5   : > { %v4855_v57 = vpop.eup %4854  ;;  %v3185_v45 = vsub.f32 %v3153_v16, %v3169_v23  ;;  %v3052_v52 = vpop.xlane.xlu1 %3051  ;;  %4864 = verf.f32 %v3322_v22  ;;  %v3269_v19 = vmul.f32 %v6493_v49, %v3246_v8 }
 0x4e6   : > { %v4857_v33 = vpop.eup %4856  ;;  %v3218_v10 = vadd.f32 1e-05, %v3186_v4  ;;  %v6538_v40 = vmul.f32 0.03125, %v3052_v52  ;;  %v3049_v34 = vpop.xlane.xlu0 %3048  ;;  %v3352_v46 = vadd.f32 1.0, %v4855_v57  ;;  %v3268_v29 = vmul.f32 %v6493_v49, %v3245_v25 }
 0x4e7   : > { %v3217_v48 = vadd.f32 1e-05, %v3185_v45  ;;  %v6541_v14 = vmul.f32 0.03125, %v3049_v34  ;;  %v3351_v53 = vadd.f32 1.0, %v4857_v33  ;;  %v6544_v9 = vadd.f32 %v6502_v39, %v3269_v19 }
 0x4e8   : > { %4866 = vrsqrt.f32 %v3218_v10  ;;  %v3368_v44 = vmul.f32 %v3352_v46, %v3304_v60  ;;  %v3172_v51 = vmul.f32 %v6538_v40, %v6538_v40  ;;  %v6555_v7 = vadd.f32 %v6502_v39, %v3268_v29 }
 0x4e9   : > { %4868 = vrsqrt.f32 %v3217_v48  ;;  %v3132_v1 = vpop.xlane.xlu1 %3131  ;;  %v3367_v17 = vmul.f32 %v3351_v53, %v3303_v36  ;;  %v3171_v30 = vmul.f32 %v6541_v14, %v6541_v14  ;;  %v3324_v27 = vmul.f32 0.70710677, %v6544_v9 }
 0x4ea   : > { %v4859_v41 = vpop.eup %4858  ;;  %v3156_v59 = vmul.f32 0.03125, %v3132_v1  ;;  %v3129_v6 = vpop.xlane.xlu0 %3128  ;;  %v3384_v13 = vmax.f32 %v3368_v44, 0.0  ;;  %v3323_v38 = vmul.f32 0.70710677, %v6555_v7  ;;  %v3202_v4 = vsub.f32 %v6413_v54, %v6519_v62 }
 0x4eb   : > { %v4861_v47 = vpop.eup %4860  ;;  %v3248_v37 = vmul.f32 %v4859_v41, %v3200_v55  ;;  %v3155_v18 = vmul.f32 0.03125, %v3129_v6  ;;  %v3383_v58 = vmax.f32 %v3367_v17, 0.0  ;;  %4870 = verf.f32 %v3324_v27 }
 0x4ec   : > { %v3247_v28 = vmul.f32 %v4861_v47, %v3199_v63  ;;  %v3188_v61 = vsub.f32 %v3156_v59, %v3172_v51  ;;  %4872 = verf.f32 %v3323_v38  ;;  %v3306_v36 = vmul.f32 0.5, %v6525_v31 }
 0x4ed   : > { %v3187_v26 = vsub.f32 %v3155_v18, %v3171_v30  ;;  %4540 = vmatprep.mubr.msk.f32.mxu1 %vm3016_vm5, %v3383_v58  ;;  %v3058_v12 = vpop.xlane.xlu1 %3057  ;;  %v3271_v20 = vmul.f32 %v6493_v49, %v3248_v37  ;;  %v3201_v45 = vsub.f32 %v6417_v50, %v6522_v0  ;;  %v3204_v51 = vsub.f32 %v6429_v3, %v6538_v40 }
 0x4ee   : > { %v4863_v15 = vpop.eup %4862  ;;  %v3220_v32 = vadd.f32 1e-05, %v3188_v61  ;;  %v6561_v42 = vmul.f32 0.03125, %v3058_v12  ;;  %4541 = vmatmul.mubr.msk.f32.vlgmr.msra.gmra.mrb[74].mxu1 %vm3016_vm5, %v3384_v13  ;;  %v3055_v22 = vpop.xlane.xlu0 %3054  ;;  %v3270_v35 = vmul.f32 %v6493_v49, %v3247_v28  ;;  %v3203_v3 = vsub.f32 %v6433_v21, %v6541_v14 }
 0x4ef   : > { %v4865_v8 = vpop.eup %4864  ;;  %v3219_v23 = vadd.f32 1e-05, %v3187_v26  ;;  %v6565_v16 = vmul.f32 0.03125, %v3055_v22  ;;  %v3353_v25 = vadd.f32 1.0, %v4863_v15  ;;  %v6568_v2 = vadd.f32 %v6502_v39, %v3271_v20 }
 0x4f0   : > { %4874 = vrsqrt.f32 %v3220_v32  ;;  %v3354_v57 = vadd.f32 1.0, %v4865_v8  ;;  %v3174_v52 = vmul.f32 %v6561_v42, %v6561_v42  ;;  %v6580_v62 = vadd.f32 %v6502_v39, %v3270_v35 }
 0x4f1   : > { %4876 = vrsqrt.f32 %v3219_v23  ;;  %v3138_v60 = vpop.xlane.xlu1 %3137  ;;  %v3369_v19 = vmul.f32 %v3353_v25, %v3305_v5  ;;  %v3173_v10 = vmul.f32 %v6565_v16, %v6565_v16  ;;  %v3326_v0 = vmul.f32 0.70710677, %v6568_v2 }
 0x4f2   : > { %v4867_v33 = vpop.eup %4866  ;;  %v3158_v34 = vmul.f32 0.03125, %v3138_v60  ;;  %v3135_v46 = vpop.xlane.xlu0 %3134  ;;  %v3370_v54 = vmul.f32 %v3354_v57, %v3306_v36  ;;  %v3325_v17 = vmul.f32 0.70710677, %v6580_v62  ;;  %v3308_v40 = vmul.f32 0.5, %v6544_v9 }
 0x4f3   : > { %v4869_v31 = vpop.eup %4868  ;;  %v3250_v29 = vmul.f32 %v4867_v33, %v3202_v4  ;;  %v3157_v48 = vmul.f32 0.03125, %v3135_v46  ;;  %v3385_v50 = vmax.f32 %v3369_v19, 0.0  ;;  %4878 = verf.f32 %v3326_v0 }
 0x4f4   : > { %v3249_v53 = vmul.f32 %v4869_v31, %v3201_v45  ;;  %v3190_v44 = vsub.f32 %v3158_v34, %v3174_v52  ;;  %v3386_v55 = vmax.f32 %v3370_v54, 0.0  ;;  %4880 = verf.f32 %v3325_v17 }
 0x4f5   : > { %v3189_v63 = vsub.f32 %v3157_v48, %v3173_v10  ;;  %4543 = vmatprep.mubr.msk.f32.mxu1 %vm3016_vm5, %v3385_v50  ;;  %v3064_v1 = vpop.xlane.xlu1 %3063  ;;  %v3273_v41 = vmul.f32 %v6493_v49, %v3250_v29  ;;  %v4871_v37 = vpop.eup %4870  ;;  %v3307_v26 = vmul.f32 0.5, %v6555_v7  ;;  %v3206_v29 = vsub.f32 %v6445_v11, %v6561_v42 }
 0x4f6   : > { %v3222_v30 = vadd.f32 1e-05, %v3190_v44  ;;  %v6588_v59 = vmul.f32 0.03125, %v3064_v1  ;;  %4544 = vmatmul.mubr.msk.f32.gmra.mrb[76].mxu1 %vm3016_vm5, %v3386_v55  ;;  %v3061_v6 = vpop.xlane.xlu0 %3060  ;;  %v3272_v47 = vmul.f32 %v6493_v49, %v3249_v53  ;;  %v4873_v28 = vpop.eup %4872  ;;  %v3356_v61 = vadd.f32 1.0, %v4871_v37 }
 0x4f7   : > { %v3221_v18 = vadd.f32 1e-05, %v3189_v63  ;;  %v6592_v58 = vmul.f32 0.03125, %v3061_v6  ;;  %v6595_v27 = vadd.f32 %v6502_v39, %v3273_v41  ;;  %v3355_v12 = vadd.f32 1.0, %v4873_v28 }
 0x4f8   : > { %4882 = vrsqrt.f32 %v3222_v30  ;;  %v3176_v13 = vmul.f32 %v6588_v59, %v6588_v59  ;;  %v3372_v22 = vmul.f32 %v3356_v61, %v3308_v40  ;;  %v3295_v21 = vadd.f32 %v6502_v39, %v3272_v47 }
 0x4f9   : > { %4884 = vrsqrt.f32 %v3221_v18  ;;  %v3144_v38 = vpop.xlane.xlu1 %3143  ;;  %v3175_v20 = vmul.f32 %v6592_v58, %v6592_v58  ;;  %v3371_v8 = vmul.f32 %v3355_v12, %v3307_v26  ;;  %v3328_v23 = vmul.f32 0.70710677, %v6595_v27 }
 0x4fa   : > { %v4875_v5 = vpop.eup %4874  ;;  %v3160_v15 = vmul.f32 0.03125, %v3144_v38  ;;  %v3141_v32 = vpop.xlane.xlu0 %3140  ;;  %v3327_v57 = vmul.f32 0.70710677, %v3295_v21  ;;  %v3388_v52 = vmax.f32 %v3372_v22, 0.0  ;;  %v3310_v48 = vmul.f32 0.5, %v6568_v2 }
 0x4fb   : > { %v4877_v14 = vpop.eup %4876  ;;  %v3252_v9 = vmul.f32 %v4875_v5, %v3204_v51  ;;  %v3159_v35 = vmul.f32 0.03125, %v3141_v32  ;;  %v3387_v7 = vmax.f32 %v3371_v8, 0.0  ;;  %4886 = verf.f32 %v3328_v23 }
 0x4fc   : > { %v3251_v25 = vmul.f32 %v4877_v14, %v3203_v3  ;;  %v3192_v4 = vsub.f32 %v3160_v15, %v3176_v13  ;;  %4888 = verf.f32 %v3327_v57  ;;  %v3205_v0 = vsub.f32 %v6449_v24, %v6565_v16 }
 0x4fd   : > { %v3191_v36 = vsub.f32 %v3159_v35, %v3175_v20  ;;  %v3275_v19 = vmul.f32 %v6493_v49, %v3252_v9  ;;  %v4879_v33 = vpop.eup %4878  ;;  %4546 = vmatprep.mubr.msk.f32.mxu1 %vm3016_vm5, %v3387_v7  ;;  %v3309_v53 = vmul.f32 0.5, %v6580_v62  ;;  %v3208_v18 = vsub.f32 %v6467_v43, %v6588_v59 }
 0x4fe   : > { %v3224_v45 = vadd.f32 1e-05, %v3192_v4  ;;  %v3274_v60 = vmul.f32 %v6493_v49, %v3251_v25  ;;  %4547 = vmatmul.mubr.msk.f32.gmra.mrb[78].mxu1 %vm3016_vm5, %v3388_v52  ;;  %v3358_v34 = vadd.f32 1.0, %v4879_v33  ;;  %v4881_v31 = vpop.eup %4880  ;;  %v3312_v28 = vmul.f32 0.5, %v6595_v27 }
 0x4ff   : > { %v3223_v10 = vadd.f32 1e-05, %v3191_v36  ;;  %v3298_v54 = vadd.f32 %v6502_v39, %v3275_v19  ;;  %v3357_v44 = vadd.f32 1.0, %v4881_v31  ;;  %v3207_v61 = vsub.f32 %v6471_v56, %v6592_v58 }
 0x500   : > { %4890 = vrsqrt.f32 %v3224_v45  ;;  %v3297_v46 = vadd.f32 %v6502_v39, %v3274_v60  ;;  %v3374_v17 = vmul.f32 %v3358_v34, %v3310_v48  ;;  %v3311_v13 = vmul.f32 0.5, %v3295_v21 }
 0x501   : > { %4892 = vrsqrt.f32 %v3223_v10  ;;  %v3330_v41 = vmul.f32 0.70710677, %v3298_v54  ;;  %v3373_v30 = vmul.f32 %v3357_v44, %v3309_v53  ;;  %v3314_v21 = vmul.f32 0.5, %v3298_v54 }
 0x502   : > { %v4883_v50 = vpop.eup %4882  ;;  %v3329_v55 = vmul.f32 0.70710677, %v3297_v46  ;;  %v3390_v47 = vmax.f32 %v3374_v17, 0.0  ;;  %v3313_v35 = vmul.f32 0.5, %v3297_v46  ;;  %v3949_v17 = vld [vmem:[%s6769_s27] ss:$0 sm:$0xff] }
 0x503   : > { %v4885_v63 = vpop.eup %4884  ;;  %v3254_v1 = vmul.f32 %v4883_v50, %v3206_v29  ;;  %v3389_v42 = vmax.f32 %v3373_v30, 0.0  ;;  %s4906_s27 = scalar_lea.vmem %s6648_s14, 16 }
 0x504   : > { %v3253_v51 = vmul.f32 %v4885_v63, %v3205_v0  ;;  %4894 = verf.f32 %v3329_v55  ;;  %p4907_p4 = scmp.ne.s32.totalorder %s6648_s14, %s4906_s27  ;;  %p4914_p9 = scmp.lt.s32.totalorder %s4912_s0, %s4906_s27 }
 0x505   : > { %4896 = verf.f32 %v3330_v41  ;;  %v3277_v11 = vmul.f32 %v6493_v49, %v3254_v1  ;;  %v4887_v6 = vpop.eup %4886  ;;  %4549 = vmatprep.mubr.msk.f32.mxu1 %vm3016_vm5, %v3389_v42 }
 0x506   : > { %v3276_v2 = vmul.f32 %v6493_v49, %v3253_v51  ;;  %v3360_v16 = vadd.f32 1.0, %v4887_v6  ;;  %v4889_v37 = vpop.eup %4888  ;;  %4550 = vmatmul.mubr.msk.f32.gmra.mrb[80].mxu1 %vm3016_vm5, %v3390_v47  ;;  %p4908_p5 = pnand %p4907_p4, %p5137_p3  ;;  %p4915_p10 = por %p4914_p9, %p4913_p7 }
 0x507   : > { %v3300_v24 = vadd.f32 %v6502_v39, %v3277_v11  ;;  %v3359_v38 = vadd.f32 1.0, %v4889_v37 }
 0x508   : > { %v3299_v62 = vadd.f32 %v6502_v39, %v3276_v2  ;;  %v3376_v20 = vmul.f32 %v3360_v16, %v3312_v28  ;;  %p4909_p6 = pneg %p4908_p5 }
 0x509   : > { %v3332_v3 = vmul.f32 0.70710677, %v3300_v24  ;;  %v3375_v32 = vmul.f32 %v3359_v38, %v3311_v13  ;;  %v3316_v60 = vmul.f32 0.5, %v3300_v24 }
 0x50a   : > { %v4891_v40 = vpop.eup %4890  ;;  %v3331_v26 = vmul.f32 0.70710677, %v3299_v62  ;;  %v3392_v9 = vmax.f32 %v3376_v20, 0.0  ;;  %v3315_v33 = vmul.f32 0.5, %v3299_v62  ;;  %p4916_p11 = pnand %p4915_p10, %p4909_p6 }
 0x50b   : > { %v4893_v12 = vpop.eup %4892  ;;  %v3256_v5 = vmul.f32 %v4891_v40, %v3208_v18  ;;  %4898 = verf.f32 %v3332_v3  ;;  %v3391_v22 = vmax.f32 %v3375_v32, 0.0 }
 0x50c   : > { %v3255_v15 = vmul.f32 %v4893_v12, %v3207_v61  ;;  %4900 = verf.f32 %v3331_v26 }
 0x50d   : > { %v3279_v43 = vmul.f32 %v6493_v49, %v3256_v5  ;;  %4552 = vmatprep.mubr.msk.f32.mxu1 %vm3016_vm5, %v3391_v22 }
 0x50e   : > { %v4895_v59 = vpop.eup %4894  ;;  %v3278_v27 = vmul.f32 %v6493_v49, %v3255_v15  ;;  %4553 = vmatmul.mubr.msk.f32.gmra.mrb[82].mxu1 %vm3016_vm5, %v3392_v9 }
 0x50f   : > { %v4897_v14 = vpop.eup %4896  ;;  %v3361_v56 = vadd.f32 1.0, %v4895_v59  ;;  %v3302_v58 = vadd.f32 %v6502_v39, %v3279_v43 }
 0x510   : > { %v3362_v8 = vadd.f32 1.0, %v4897_v14  ;;  %v3301_v23 = vadd.f32 %v6502_v39, %v3278_v27 }
 0x511   : > { %v3377_v25 = vmul.f32 %v3361_v56, %v3313_v35  ;;  %v3334_v4 = vmul.f32 0.70710677, %v3302_v58  ;;  %v3318_v48 = vmul.f32 0.5, %v3302_v58 }
 0x512   : > { %v3378_v36 = vmul.f32 %v3362_v8, %v3314_v21  ;;  %v3333_v7 = vmul.f32 0.70710677, %v3301_v23  ;;  %v3317_v0 = vmul.f32 0.5, %v3301_v23 }
 0x513   : > { %v3393_v57 = vmax.f32 %v3377_v25, 0.0  ;;  %4902 = verf.f32 %v3334_v4 }
 0x514   : > { %v3394_v49 = vmax.f32 %v3378_v36, 0.0  ;;  %4904 = verf.f32 %v3333_v7 }
 0x515   : > { %v4899_v45 = vpop.eup %4898  ;;  %4555 = vmatprep.mubr.msk.f32.mxu1 %vm3016_vm5, %v3393_v57 }
 0x516   : > { %v4901_v52 = vpop.eup %4900  ;;  %4556 = vmatmul.mubr.msk.f32.gmra.mrb[84].mxu1 %vm3016_vm5, %v3394_v49  ;;  %v3364_v19 = vadd.f32 1.0, %v4899_v45 }
 0x517   : > { %v3363_v39 = vadd.f32 1.0, %v4901_v52 }
 0x518   : > { %v3380_v10 = vmul.f32 %v3364_v19, %v3316_v60 }
 0x519   : > { %v3379_v34 = vmul.f32 %v3363_v39, %v3315_v33 }
 0x51a   : > { %v3396_v54 = vmax.f32 %v3380_v10, 0.0 }
 0x51b   : > { %v3395_v46 = vmax.f32 %v3379_v34, 0.0 }
 0x51d   : > { %v4903_v31 = vpop.eup %4902  ;;  %4558 = vmatprep.mubr.msk.f32.mxu1 %vm3016_vm5, %v3395_v46 }
 0x51e   : > { %v4905_v29 = vpop.eup %4904  ;;  %4559 = vmatmul.mubr.msk.f32.gmra.mrb[86].mxu1 %vm3016_vm5, %v3396_v54  ;;  %v3366_v50 = vadd.f32 1.0, %v4903_v31 }
 0x51f   : > { %v3365_v53 = vadd.f32 1.0, %v4905_v29 }
 0x520   : > { %v3382_v44 = vmul.f32 %v3366_v50, %v3318_v48 }
 0x521   : > { %v3381_v55 = vmul.f32 %v3365_v53, %v3317_v0 }
 0x522   : > { %v3398_v1 = vmax.f32 %v3382_v44, 0.0 }
 0x523   : > { %v3397_v63 = vmax.f32 %v3381_v55, 0.0 }
 0x525   : > { %4561 = vmatprep.mubr.msk.f32.mxu1 %vm3016_vm5, %v3397_v63 }
 0x526   : > { %4562 = vmatmul.mubr.msk.f32.gmra.mrb[88].mxu1 %vm3016_vm5, %v3398_v1 }
 0x5c1   : > { %v4542_v41 = vpop.f32.mrb[74].mxu1 }
 0x5c2   : > { %v3524_v51 = vpop.f32.mrb[75].mxu1  ;;  %v3530_v11 = vadd.f32 %v4542_v41, %v3949_v17 }
 0x5c3   : > { %v3525_v30 = vadd.f32 %v3949_v17, %v3524_v51 }
 0x5c5   : > { %3603 = vxpose.xlu0.b32.start [1/16] (narrow) %v3525_v30, 8 }
 0x5c9   : > { %v4545_v42 = vpop.f32.mrb[76].mxu1  ;;  %3604 = vxpose.xlu0.b32.cont [2/16] (narrow) %v3530_v11, 8 }
 0x5ca   : > { %v3534_v2 = vpop.f32.mrb[77].mxu1  ;;  %v3540_v47 = vadd.f32 %v4545_v42, %v3949_v17 }
 0x5cb   : > { %v3535_v6 = vadd.f32 %v3949_v17, %v3534_v2 }
 0x5cd   : > { %3605 = vxpose.xlu0.b32.cont [3/16] (narrow) %v3535_v6, 8 }
 0x5d1   : > { %3606 = vxpose.xlu0.b32.cont [4/16] (narrow) %v3540_v47, 8  ;;  %v4548_v24 = vpop.f32.mrb[78].mxu1 }
 0x5d2   : > { %v3544_v16 = vpop.f32.mrb[79].mxu1  ;;  %v3550_v37 = vadd.f32 %v4548_v24, %v3949_v17 }
 0x5d3   : > { %v3545_v62 = vadd.f32 %v3949_v17, %v3544_v16 }
 0x5d5   : > { %3607 = vxpose.xlu0.b32.cont [5/16] (narrow) %v3545_v62, 8 }
 0x5d9   : > { %3608 = vxpose.xlu0.b32.cont [6/16] (narrow) %v3550_v37, 8  ;;  %v4551_v18 = vpop.f32.mrb[80].mxu1 }
 0x5da   : > { %v3554_v28 = vpop.f32.mrb[81].mxu1  ;;  %v3560_v40 = vadd.f32 %v4551_v18, %v3949_v17 }
 0x5db   : > { %v3555_v3 = vadd.f32 %v3949_v17, %v3554_v28 }
 0x5dd   : > { %3609 = vxpose.xlu0.b32.cont [7/16] (narrow) %v3555_v3, 8 }
 0x5e1   : > { %v4554_v61 = vpop.f32.mrb[82].mxu1  ;;  %3610 = vxpose.xlu0.b32.cont [8/16] (narrow) %v3560_v40, 8 }
 0x5e2   : > { %v3564_v13 = vpop.f32.mrb[83].mxu1  ;;  %v3570_v12 = vadd.f32 %v4554_v61, %v3949_v17 }
 0x5e3   : > { %v3565_v38 = vadd.f32 %v3949_v17, %v3564_v13 }
 0x5e5   : > { %3611 = vxpose.xlu0.b32.cont [9/16] (narrow) %v3565_v38, 8 }
 0x5e9   : > { %v4557_v26 = vpop.f32.mrb[84].mxu1  ;;  %3612 = vxpose.xlu0.b32.cont [10/16] (narrow) %v3570_v12, 8 }
 0x5ea   : > { %v3574_v5 = vpop.f32.mrb[85].mxu1  ;;  %v3580_v32 = vadd.f32 %v4557_v26, %v3949_v17 }
 0x5eb   : > { %v3575_v20 = vadd.f32 %v3949_v17, %v3574_v5 }
 0x5ed   : > { %3613 = vxpose.xlu0.b32.cont [11/16] (narrow) %v3575_v20, 8 }
 0x5f1   : > { %v4560_v15 = vpop.f32.mrb[86].mxu1  ;;  %3614 = vxpose.xlu0.b32.cont [12/16] (narrow) %v3580_v32, 8 }
 0x5f2   : > { %v3584_v43 = vpop.f32.mrb[87].mxu1  ;;  %v3590_v27 = vadd.f32 %v4560_v15, %v3949_v17 }
 0x5f3   : > { %v3585_v59 = vadd.f32 %v3949_v17, %v3584_v43 }
 0x5f5   : > { %3615 = vxpose.xlu0.b32.cont [13/16] (narrow) %v3585_v59, 8 }
 0x5f9   : > { %v4563_v22 = vpop.f32.mrb[88].mxu1  ;;  %3616 = vxpose.xlu0.b32.cont [14/16] (narrow) %v3590_v27, 8 }
 0x5fa   : > { %v3594_v14 = vpop.f32.mrb[89].mxu1  ;;  %v3600_v35 = vadd.f32 %v4563_v22, %v3949_v17 }
 0x5fb   : > { %v3595_v9 = vadd.f32 %v3949_v17, %v3594_v14 }
 0x5fd   : > { %3617 = vxpose.xlu0.b32.cont [15/16] (narrow) %v3595_v9, 8 }
 0x601   : > { %3618 = vxpose.xlu0.b32.end [16/16] (narrow) %v3600_v35, 8 }
 0x645   : > { %v3619_v56 = vpop.trf.xlu0 }
 0x646   : > { %3635 = vst [vmem:[%s597_s23] sm:$0x1] %v3619_v56 }
 0x647   : > { %4919 = shalt.err (!%p4916_p11)
}
 0x648   : > { %s4920_s17 = scalar_lea.hbm %s6653_s30, 16  ;;  %s4924_s26 = scalar_lea.hbm %s6771_s29, 64 }
 0x649   : > { %p4921_p12 = scmp.ne.s32.totalorder %s6653_s30, %s4920_s17  ;;  %p4925_p1 = scmp.lt.u32.totalorder %s6653_s30, %s6771_s29 }
 0x64a   : > { %p4926_p2 = scmp.lt.u32.totalorder %s4924_s26, %s4920_s17  ;;  %p4928_p5 = scmp.lt.u32.totalorder %s4920_s17, %s6653_s30 }
 0x64b   : > { %p4922_p13 = pnand %p4921_p12, %p5137_p3 }
 0x64c   : > { %p4927_p4 = por %p4926_p2, %p4925_p1 }
 0x64d   : > { %p4923_p0 = pneg %p4922_p13 }
 0x64e   : > { %p4929_p6 = por %p4928_p5, %p4927_p4 }
 0x650   : > { %p4930_p7 = pnand %p4929_p6, %p4923_p0 }
 0x652   : > { %4933 = shalt.err (!%p4930_p7)
}
 0x653   : > { %4700 = dma.vmem_to_hbm [thread:$0]  (%p5137_p3), %s6648_s14, 16, %s6653_s30, %s3637_s16  }
 0x654 PF: > { %s6772_s27 = sld [smem:[#allocation7_spill]]  ;;  %p4706_p9 = scmp.ge.s32.totalorder %s5000_s25, 2 }
 0x656   : > { %p4703_p10 = pnand %p4706_p9, %p5146_p8 }
 0x65a   : > { %s3663_s22 = sand.u32 1, %s6772_s27  }
 0x65b   : > { %s3664_s0 = scalar_lea.sflag [#allocation5], %s3663_s22 }
 0x65c   : > { %4967 = dma.done.wait (!%p4703_p10), %s3664_s0, 16  }
 0x65d   : > { %4969 = vsyncadd (!%p4703_p10), %s3664_s0, 4294967280  ;;  %s28_s25 = sadd.s32 1, %s5000_s25   ;;  %s6774_s21 = sld [smem:[#allocation8_spill]] }
 0x65e   : > { %p25_p11 = scmp.ge.s32.totalorder %s28_s25, 6   ;;  %s6775_s22 = sld [smem:[#allocation9_spill]] }
 0x65f   : > { %s6776_s23 = sld [smem:[#allocation10_spill]]  ;;  %s6777_s24 = sld [smem:[#allocation12_spill]] }
 0x660   : > { %s6778_s18 = smov %s4976_s19  ;;  %s6779_s19 = smov %s4980_s20 }
 0x661   : > { %s6780_s20 = smov %s5155_s28  ;;  %27 = sbr.rel (!%p25_p11) target bundleno = 10 (0xa), region = 125 }
 0x668   :  { %3668 = vsyncpa [#allocation5], 1 }
 0x669   :  { %3670 = vsyncpa [#allocation5 + $0x1], 1 }

</bundles_post_ra>
